<compile_context>
chip_gen: v7x
topology: tpu7x:2x2x1
jax: 0.10.0
libtpu: 0.0.40
codegen_flags: <defaults>
</compile_context>

<pallas_src>
import jax
import jax.numpy as jnp
from jax.experimental import pallas as pl
from jax.experimental.pallas import tpu as pltpu


# ----------------------------------------------------------------------------
# Fused kernel: one batch element per grid step, everything resident in VMEM.
# ----------------------------------------------------------------------------
def _ste_t4_kernel(
    x_ref,                                  # (T, 512)  bf16  one batch element
    w1_ref, s1_ref, t1_ref,                 # conv_1     (512,128) bf16, (1,128) f32 x2
    w2_ref, s2_ref, t2_ref,                 # conv_e_1a  (384,256), (1,256)
    w3_ref, s3_ref, t3_ref,                 # conv_e_2a  (768,512), (1,512)
    w4_ref, s4_ref, t4_ref,                 # conv_3     (T2*512,256), (1,256)
    wha_ref, bha_ref,                       # merged fc_a|fc_f_a (256,512), (1,512)
    whb_ref, bhb_ref,                       # block-diag fc_b/fc_f_b (512,NOUT), (1,NOUT)
    spt_ref, snt_ref,                       # (T,T)   shift prev / shift next
    sph_ref, snh_ref,                       # (T2,T2) shift prev / shift next
    se_ref, so_ref,                         # (T2,T)  even / odd row selectors
    out_ref,                                # (1, NOUT) f32
    h3_scr,                                 # (T2, 512) f32 scratch
):
    f32 = jnp.float32
    bf16 = jnp.bfloat16

    # conv_1: Conv2d(1,128,(1,512)) == per-frame 512->128 linear, + BN + ReLU.
    h1 = jnp.dot(x_ref[...], w1_ref[...], preferred_element_type=f32)
    h1 = jnp.maximum(h1 * s1_ref[...] + t1_ref[...], 0.0)              # (T,128)

    # conv_e_1a: Conv1d(k=3, pad=1) == [x_{t-1} | x_t | x_{t+1}] @ W (k-major).
    h1p = jnp.dot(spt_ref[...], h1, preferred_element_type=f32)        # x_{t-1}
    h1n = jnp.dot(snt_ref[...], h1, preferred_element_type=f32)        # x_{t+1}
    cat2 = jnp.concatenate([h1p, h1, h1n], axis=-1).astype(bf16)       # (T,384)
    h2 = jnp.dot(cat2, w2_ref[...], preferred_element_type=f32)
    h2 = jnp.maximum(h2 * s2_ref[...] + t2_ref[...], 0.0)              # (T,256)

    # MaxPool1d(kernel=2, stride=2) along time.
    h_even = jnp.dot(se_ref[...], h2, preferred_element_type=f32)      # (T2,256)
    h_odd = jnp.dot(so_ref[...], h2, preferred_element_type=f32)
    hp = jnp.maximum(h_even, h_odd)                                    # (T2,256)

    # conv_e_2a: Conv1d(k=3, pad=1) + BN + ReLU.
    hpp = jnp.dot(sph_ref[...], hp, preferred_element_type=f32)
    hpn = jnp.dot(snh_ref[...], hp, preferred_element_type=f32)
    cat3 = jnp.concatenate([hpp, hp, hpn], axis=-1).astype(bf16)       # (T2,768)
    h3 = jnp.dot(cat3, w3_ref[...], preferred_element_type=f32)
    h3 = jnp.maximum(h3 * s3_ref[...] + t3_ref[...], 0.0)              # (T2,512)

    # conv_3: kernel spans the whole pooled time axis -> single 256 vector:
    #   h4 = sum_t h3[t,:] @ W4_t.  Rows are read back from a VMEM scratch
    # (sub-window ref reads) to avoid an in-kernel (T2,512)->(1,T2*512) reshape.
    h3_scr[...] = h3
    T2, C = h3_scr.shape
    acc = jnp.zeros((1, w4_ref.shape[1]), f32)
    for t in range(T2):                     # static unroll, T2 is tiny (8)
        row = h3_scr[pl.ds(t, 1), :].astype(bf16)                      # (1,512)
        wblk = w4_ref[pl.ds(t * C, C), :]                              # (512,256)
        acc = acc + jnp.dot(row, wblk, preferred_element_type=f32)
    h4 = jnp.maximum(acc * s4_ref[...] + t4_ref[...], 0.0)             # (1,256)

    # Heads: [fc_a | fc_f_a] -> ReLU -> block-diag [fc_b ; fc_f_b] -> sigmoid.
    oa = jnp.dot(h4.astype(bf16), wha_ref[...], preferred_element_type=f32)
    oa = jnp.maximum(oa + bha_ref[...], 0.0)                           # (1,512)
    ob = jnp.dot(oa.astype(bf16), whb_ref[...], preferred_element_type=f32)
    ob = ob + bhb_ref[...]                                             # (1,NOUT)
    sig = pl.reciprocal(1.0 + jnp.exp(-ob), approx=True)
    out_ref[...] = sig.astype(out_ref.dtype)


# ----------------------------------------------------------------------------
# Parameter preparation: BN folding, conv->matmul layouts, head merging,
# structural 0/1 matrices, bf16 casts.  Call once, reuse across forwards.
# ----------------------------------------------------------------------------
def _bn_fold(bias, gamma, beta, mean, var, eps=1e-5):
    # BN(conv(x) + bias) == conv(x) * s + ((bias - mean) * s + beta)
    s = gamma / jnp.sqrt(var + eps)
    return s, (bias - mean) * s + beta


def _conv1d_weight_to_mat(w):
    # PyTorch Conv1d weight (out, in, k) -> (k*in, out), rows k-major / in-minor.
    oc, ic, k = w.shape
    return jnp.transpose(w, (2, 1, 0)).reshape(k * ic, oc)


def prepare_params(p):
    f32, bf16 = jnp.float32, jnp.bfloat16
    T2 = p["conv_3_w"].shape[2]
    T = 2 * T2

    def row(v):
        return v.reshape(1, -1).astype(f32)

    q = {}
    ic = p["conv_1_w"].shape[-1]
    s, t = _bn_fold(p["conv_1_b"], **p["bn_conv1"])
    q["w1"] = p["conv_1_w"].reshape(-1, ic).T.astype(bf16)             # (512,128)
    q["s1"], q["t1"] = row(s), row(t)
    s, t = _bn_fold(p["conv_e_1a_b"], **p["bn_e_1a"])
    q["w2"] = _conv1d_weight_to_mat(p["conv_e_1a_w"]).astype(bf16)     # (384,256)
    q["s2"], q["t2"] = row(s), row(t)
    s, t = _bn_fold(p["conv_e_2a_b"], **p["bn_e_2a"])
    q["w3"] = _conv1d_weight_to_mat(p["conv_e_2a_w"]).astype(bf16)     # (768,512)
    q["s3"], q["t3"] = row(s), row(t)
    s, t = _bn_fold(p["conv_3_b"], **p["bn_conv3"])
    q["w4"] = _conv1d_weight_to_mat(p["conv_3_w"]).astype(bf16)        # (T2*512,256)
    q["s4"], q["t4"] = row(s), row(t)

    # Merged heads.
    q["wha"] = jnp.concatenate([p["fc_a_w"].T, p["fc_f_a_w"].T], axis=1).astype(bf16)
    q["bha"] = row(jnp.concatenate([p["fc_a_b"], p["fc_f_a_b"]]))
    nb, nf = p["fc_b_w"].shape[0], p["fc_f_b_w"].shape[0]
    whb = jnp.zeros((512, nb + nf), f32)
    whb = whb.at[0:256, 0:nb].set(p["fc_b_w"].T)
    whb = whb.at[256:512, nb:nb + nf].set(p["fc_f_b_w"].T)
    q["whb"] = whb.astype(bf16)
    q["bhb"] = row(jnp.concatenate([p["fc_b_b"], p["fc_f_b_b"]]))

    # Structural 0/1 matrices (exact): time shifts for the k=3 convs and
    # even/odd selectors for MaxPool1d(2).
    q["sp_t"] = jnp.eye(T, k=-1, dtype=f32)
    q["sn_t"] = jnp.eye(T, k=1, dtype=f32)
    q["sp_h"] = jnp.eye(T2, k=-1, dtype=f32)
    q["sn_h"] = jnp.eye(T2, k=1, dtype=f32)
    i2 = jnp.arange(T2)
    q["se"] = jnp.zeros((T2, T), f32).at[i2, 2 * i2].set(1.0)
    q["so"] = jnp.zeros((T2, T), f32).at[i2, 2 * i2 + 1].set(1.0)
    return q


_WEIGHT_ORDER = ("w1", "s1", "t1", "w2", "s2", "t2", "w3", "s3", "t3",
                 "w4", "s4", "t4", "wha", "bha", "whb", "bhb",
                 "sp_t", "sn_t", "sp_h", "sn_h", "se", "so")


# ----------------------------------------------------------------------------
# Forward pass (eval mode): one pallas_call for the whole model.
# ----------------------------------------------------------------------------
def ste_t4_forward(x, q):
    """x: (BS, T, 512) float32; q: output of prepare_params()."""
    BS, T, IC = x.shape
    # TODO(synk): feature_extractor branch (input_size != 512) not implemented;
    # default config (input_size == 512) is the only path exercised here.
    assert IC == 512
    T2 = T // 2
    nout = q["bhb"].shape[1]
    ops = [q[k] for k in _WEIGHT_ORDER]

    def _full(a):                       # whole array resident, constant index_map
        nd = a.ndim
        return pl.BlockSpec(a.shape, lambda b, _nd=nd: (0,) * _nd)

    out = pl.pallas_call(
        _ste_t4_kernel,
        out_shape=jax.ShapeDtypeStruct((BS, 1, nout), jnp.float32),
        grid=(BS,),
        in_specs=[pl.BlockSpec((None, T, IC), lambda b: (b, 0, 0))]
                 + [_full(a) for a in ops],
        out_specs=pl.BlockSpec((None, 1, nout), lambda b: (b, 0, 0)),
        scratch_shapes=[pltpu.VMEM((T2, 512), jnp.float32)],
        compiler_params=pltpu.CompilerParams(
            dimension_semantics=("parallel",)),   # v7x: batch split across cores
    )(x.astype(jnp.bfloat16), *ops)
    return out.reshape(BS, nout)


# ----------------------------------------------------------------------------
# Pure-JAX f32 reference (mirrors the PyTorch eval-mode forward) for checking.
# ----------------------------------------------------------------------------
def ste_t4_reference(x, p):
    BS, T, IC = x.shape
    relu = lambda v: jnp.maximum(v, 0.0)

    def im2col_k3_pad1(h):
        _, L, _ = h.shape
        hp = jnp.pad(h, ((0, 0), (1, 1), (0, 0)))
        return jnp.concatenate([hp[:, 0:L], hp[:, 1:L + 1], hp[:, 2:L + 2]], -1)

    s1, t1 = _bn_fold(p["conv_1_b"], **p["bn_conv1"])
    w1 = p["conv_1_w"].reshape(-1, IC).T
    h1 = relu((x.reshape(BS * T, IC) @ w1) * s1 + t1).reshape(BS, T, -1)
    s2, t2 = _bn_fold(p["conv_e_1a_b"], **p["bn_e_1a"])
    h2 = relu((im2col_k3_pad1(h1) @ _conv1d_weight_to_mat(p["conv_e_1a_w"])) * s2 + t2)
    hpool = jnp.maximum(h2[:, 0::2], h2[:, 1::2])
    s3, t3 = _bn_fold(p["conv_e_2a_b"], **p["bn_e_2a"])
    h3 = relu((im2col_k3_pad1(hpool) @ _conv1d_weight_to_mat(p["conv_e_2a_w"])) * s3 + t3)
    s4, t4 = _bn_fold(p["conv_3_b"], **p["bn_conv3"])
    h4 = relu((h3.reshape(BS, (T // 2) * 512) @ _conv1d_weight_to_mat(p["conv_3_w"])) * s4 + t4)
    o1a = relu(h4 @ p["fc_a_w"].T + p["fc_a_b"])
    o1b = jax.nn.sigmoid(o1a @ p["fc_b_w"].T + p["fc_b_b"])
    o2a = relu(h4 @ p["fc_f_a_w"].T + p["fc_f_a_b"])
    o2b = jax.nn.sigmoid(o2a @ p["fc_f_b_w"].T + p["fc_f_b_b"])
    return jnp.concatenate([o1b, o2b], axis=-1)


# ----------------------------------------------------------------------------
# Deterministic parameter init (same shapes as the PyTorch module __init__).
# ----------------------------------------------------------------------------
def init_params(key, input_size=512, num_classes=17, window_size_frame=16):
    ks = jax.random.split(key, 32)

    def nrm(k, shape, scale=0.05):
        return scale * jax.random.normal(k, shape, dtype=jnp.float32)

    def bn(k, c):
        k1, k2, k3, k4 = jax.random.split(k, 4)
        return dict(gamma=1.0 + 0.1 * jax.random.normal(k1, (c,), dtype=jnp.float32),
                    beta=0.1 * jax.random.normal(k2, (c,), dtype=jnp.float32),
                    mean=0.1 * jax.random.normal(k3, (c,), dtype=jnp.float32),
                    var=jax.random.uniform(k4, (c,), minval=0.5, maxval=1.5,
                                           dtype=jnp.float32))

    T2 = window_size_frame // 2
    p = {}
    p["conv_1_w"] = nrm(ks[0], (128, 1, 1, input_size))     # Conv2d(1,128,(1,512))
    p["conv_1_b"] = nrm(ks[1], (128,))
    p["bn_conv1"] = bn(ks[2], 128)
    p["conv_e_1a_w"] = nrm(ks[3], (256, 128, 3))            # Conv1d(128,256,k=3,p=1)
    p["conv_e_1a_b"] = nrm(ks[4], (256,))
    p["bn_e_1a"] = bn(ks[5], 256)
    p["conv_e_2a_w"] = nrm(ks[6], (512, 256, 3))            # Conv1d(256,512,k=3,p=1)
    p["conv_e_2a_b"] = nrm(ks[7], (512,))
    p["bn_e_2a"] = bn(ks[8], 512)
    p["conv_3_w"] = nrm(ks[9], (256, 512, T2))              # Conv1d(512,256,k=T/2)
    p["conv_3_b"] = nrm(ks[10], (256,))
    p["bn_conv3"] = bn(ks[11], 256)
    p["fc_a_w"] = nrm(ks[12], (256, 256)); p["fc_a_b"] = nrm(ks[13], (256,))
    p["fc_b_w"] = nrm(ks[14], (num_classes + 1, 256))
    p["fc_b_b"] = nrm(ks[15], (num_classes + 1,))
    p["fc_f_a_w"] = nrm(ks[16], (256, 256)); p["fc_f_a_b"] = nrm(ks[17], (256,))
    p["fc_f_b_w"] = nrm(ks[18], (window_size_frame, 256))
    p["fc_f_b_b"] = nrm(ks[19], (window_size_frame,))
    return p


if __name__ == "__main__":
    key = jax.random.PRNGKey(0)
    kx, kp = jax.random.split(key)

    BS, window_size, framerate, num_classes = 2, 8, 2, 17
    T = window_size * framerate                          # window_size_frame = 16
    x = jax.random.normal(kx, (BS, T, 512), dtype=jnp.float32)
    params = init_params(kp, input_size=512, num_classes=num_classes,
                         window_size_frame=T)

    q = prepare_params(params)
    out = jax.jit(ste_t4_forward)(x, q)
    out = jax.block_until_ready(out)

    assert out.shape == (BS, (num_classes + 1) + T), out.shape
    assert bool(jnp.all(jnp.isfinite(out)))
    # bf16 MXU kernel vs f32 reference: loose tolerance on sigmoid outputs.
    ref = ste_t4_reference(x, params)
    assert float(jnp.max(jnp.abs(out - ref))) < 0.1
    print("KERNEL_OK")
</pallas_src>

<mosaic_0001>
module attributes {stable_mosaic.version = 11 : i64} {
  func.func @_ste_t4_kernel(%arg0: i32, %arg1: memref<1x16x512xbf16, #tpu.memory_space<vmem>>, %arg2: memref<512x128xbf16, #tpu.memory_space<vmem>>, %arg3: memref<1x128xf32, #tpu.memory_space<vmem>>, %arg4: memref<1x128xf32, #tpu.memory_space<vmem>>, %arg5: memref<384x256xbf16, #tpu.memory_space<vmem>>, %arg6: memref<1x256xf32, #tpu.memory_space<vmem>>, %arg7: memref<1x256xf32, #tpu.memory_space<vmem>>, %arg8: memref<768x512xbf16, #tpu.memory_space<vmem>>, %arg9: memref<1x512xf32, #tpu.memory_space<vmem>>, %arg10: memref<1x512xf32, #tpu.memory_space<vmem>>, %arg11: memref<4096x256xbf16, #tpu.memory_space<vmem>>, %arg12: memref<1x256xf32, #tpu.memory_space<vmem>>, %arg13: memref<1x256xf32, #tpu.memory_space<vmem>>, %arg14: memref<256x512xbf16, #tpu.memory_space<vmem>>, %arg15: memref<1x512xf32, #tpu.memory_space<vmem>>, %arg16: memref<512x34xbf16, #tpu.memory_space<vmem>>, %arg17: memref<1x34xf32, #tpu.memory_space<vmem>>, %arg18: memref<16x16xf32, #tpu.memory_space<vmem>>, %arg19: memref<16x16xf32, #tpu.memory_space<vmem>>, %arg20: memref<8x8xf32, #tpu.memory_space<vmem>>, %arg21: memref<8x8xf32, #tpu.memory_space<vmem>>, %arg22: memref<8x16xf32, #tpu.memory_space<vmem>>, %arg23: memref<8x16xf32, #tpu.memory_space<vmem>>, %arg24: memref<1x1x34xf32, #tpu.memory_space<vmem>>, %arg25: memref<8x512xf32, #tpu.memory_space<vmem>>) attributes {dimension_semantics = [#tpu.dimension_semantics<parallel>], iteration_bounds = array<i64: 2>, scalar_prefetch = 0 : i64, scratch_operands = 1 : i64, tpu.core_type = #tpu.core_type<tc>, window_params = [{transform_indices = @transform_0, window_bounds = array<i64: 1, 16, 512>}, {pipeline_mode = #tpu.pipeline_mode<synchronous>, transform_indices = @transform_1, window_bounds = array<i64: 512, 128>}, {pipeline_mode = #tpu.pipeline_mode<synchronous>, transform_indices = @transform_2, window_bounds = array<i64: 1, 128>}, {pipeline_mode = #tpu.pipeline_mode<synchronous>, transform_indices = @transform_3, window_bounds = array<i64: 1, 128>}, {pipeline_mode = #tpu.pipeline_mode<synchronous>, transform_indices = @transform_4, window_bounds = array<i64: 384, 256>}, {pipeline_mode = #tpu.pipeline_mode<synchronous>, transform_indices = @transform_5, window_bounds = array<i64: 1, 256>}, {pipeline_mode = #tpu.pipeline_mode<synchronous>, transform_indices = @transform_6, window_bounds = array<i64: 1, 256>}, {pipeline_mode = #tpu.pipeline_mode<synchronous>, transform_indices = @transform_7, window_bounds = array<i64: 768, 512>}, {pipeline_mode = #tpu.pipeline_mode<synchronous>, transform_indices = @transform_8, window_bounds = array<i64: 1, 512>}, {pipeline_mode = #tpu.pipeline_mode<synchronous>, transform_indices = @transform_9, window_bounds = array<i64: 1, 512>}, {pipeline_mode = #tpu.pipeline_mode<synchronous>, transform_indices = @transform_10, window_bounds = array<i64: 4096, 256>}, {pipeline_mode = #tpu.pipeline_mode<synchronous>, transform_indices = @transform_11, window_bounds = array<i64: 1, 256>}, {pipeline_mode = #tpu.pipeline_mode<synchronous>, transform_indices = @transform_12, window_bounds = array<i64: 1, 256>}, {pipeline_mode = #tpu.pipeline_mode<synchronous>, transform_indices = @transform_13, window_bounds = array<i64: 256, 512>}, {pipeline_mode = #tpu.pipeline_mode<synchronous>, transform_indices = @transform_14, window_bounds = array<i64: 1, 512>}, {pipeline_mode = #tpu.pipeline_mode<synchronous>, transform_indices = @transform_15, window_bounds = array<i64: 512, 34>}, {pipeline_mode = #tpu.pipeline_mode<synchronous>, transform_indices = @transform_16, window_bounds = array<i64: 1, 34>}, {pipeline_mode = #tpu.pipeline_mode<synchronous>, transform_indices = @transform_17, window_bounds = array<i64: 16, 16>}, {pipeline_mode = #tpu.pipeline_mode<synchronous>, transform_indices = @transform_18, window_bounds = array<i64: 16, 16>}, {pipeline_mode = #tpu.pipeline_mode<synchronous>, transform_indices = @transform_19, window_bounds = array<i64: 8, 8>}, {pipeline_mode = #tpu.pipeline_mode<synchronous>, transform_indices = @transform_20, window_bounds = array<i64: 8, 8>}, {pipeline_mode = #tpu.pipeline_mode<synchronous>, transform_indices = @transform_21, window_bounds = array<i64: 8, 16>}, {pipeline_mode = #tpu.pipeline_mode<synchronous>, transform_indices = @transform_22, window_bounds = array<i64: 8, 16>}, {transform_indices = @transform_23, window_bounds = array<i64: 1, 1, 34>}]} {
    %c0 = arith.constant 0 : index
    %c0_0 = arith.constant 0 : index
    %c0_1 = arith.constant 0 : index
    %0 = vector.load %arg1[%c0, %c0_0, %c0_1] : memref<1x16x512xbf16, #tpu.memory_space<vmem>>, vector<1x16x512xbf16>
    %1 = vector.shape_cast %0 : vector<1x16x512xbf16> to vector<16x512xbf16>
    %c0_2 = arith.constant 0 : index
    %c0_3 = arith.constant 0 : index
    %2 = vector.load %arg2[%c0_2, %c0_3] : memref<512x128xbf16, #tpu.memory_space<vmem>>, vector<512x128xbf16>
    %cst = arith.constant dense<0.000000e+00> : vector<16x128xf32>
    %3 = tpu.matmul %1, %2, %cst {dimension_numbers = #tpu.dot_dimension_numbers<[1], [0], [0], [1], [0, 0, 1, 1], [], []>} : vector<16x512xbf16>, vector<512x128xbf16>, vector<16x128xf32> -> vector<16x128xf32>
    %c0_4 = arith.constant 0 : index
    %c0_5 = arith.constant 0 : index
    %4 = vector.load %arg3[%c0_4, %c0_5] : memref<1x128xf32, #tpu.memory_space<vmem>>, vector<1x128xf32>
    %5 = vector.broadcast %4 : vector<1x128xf32> to vector<16x128xf32>
    %6 = arith.mulf %3, %5 : vector<16x128xf32>
    %c0_6 = arith.constant 0 : index
    %c0_7 = arith.constant 0 : index
    %7 = vector.load %arg4[%c0_6, %c0_7] : memref<1x128xf32, #tpu.memory_space<vmem>>, vector<1x128xf32>
    %8 = vector.broadcast %7 : vector<1x128xf32> to vector<16x128xf32>
    %9 = arith.addf %6, %8 : vector<16x128xf32>
    %cst_8 = arith.constant 0.000000e+00 : f32
    %10 = vector.broadcast %cst_8 : f32 to vector<16x128xf32>
    %11 = arith.maximumf %9, %10 : vector<16x128xf32>
    %c0_9 = arith.constant 0 : index
    %c0_10 = arith.constant 0 : index
    %12 = vector.load %arg18[%c0_9, %c0_10] : memref<16x16xf32, #tpu.memory_space<vmem>>, vector<16x16xf32>
    %cst_11 = arith.constant dense<0.000000e+00> : vector<16x128xf32>
    %13 = tpu.matmul %12, %11, %cst_11 {dimension_numbers = #tpu.dot_dimension_numbers<[1], [0], [0], [1], [0, 0, 1, 1], [], []>} : vector<16x16xf32>, vector<16x128xf32>, vector<16x128xf32> -> vector<16x128xf32>
    %c0_12 = arith.constant 0 : index
    %c0_13 = arith.constant 0 : index
    %14 = vector.load %arg19[%c0_12, %c0_13] : memref<16x16xf32, #tpu.memory_space<vmem>>, vector<16x16xf32>
    %cst_14 = arith.constant dense<0.000000e+00> : vector<16x128xf32>
    %15 = tpu.matmul %14, %11, %cst_14 {dimension_numbers = #tpu.dot_dimension_numbers<[1], [0], [0], [1], [0, 0, 1, 1], [], []>} : vector<16x16xf32>, vector<16x128xf32>, vector<16x128xf32> -> vector<16x128xf32>
    %16 = tpu.concatenate %13, %11, %15 in 1 : vector<16x128xf32>, vector<16x128xf32>, vector<16x128xf32> -> vector<16x384xf32>
    %17 = arith.truncf %16 : vector<16x384xf32> to vector<16x384xbf16>
    %c0_15 = arith.constant 0 : index
    %c0_16 = arith.constant 0 : index
    %18 = vector.load %arg5[%c0_15, %c0_16] : memref<384x256xbf16, #tpu.memory_space<vmem>>, vector<384x256xbf16>
    %cst_17 = arith.constant dense<0.000000e+00> : vector<16x256xf32>
    %19 = tpu.matmul %17, %18, %cst_17 {dimension_numbers = #tpu.dot_dimension_numbers<[1], [0], [0], [1], [0, 0, 1, 1], [], []>} : vector<16x384xbf16>, vector<384x256xbf16>, vector<16x256xf32> -> vector<16x256xf32>
    %c0_18 = arith.constant 0 : index
    %c0_19 = arith.constant 0 : index
    %20 = vector.load %arg6[%c0_18, %c0_19] : memref<1x256xf32, #tpu.memory_space<vmem>>, vector<1x256xf32>
    %21 = vector.broadcast %20 : vector<1x256xf32> to vector<16x256xf32>
    %22 = arith.mulf %19, %21 : vector<16x256xf32>
    %c0_20 = arith.constant 0 : index
    %c0_21 = arith.constant 0 : index
    %23 = vector.load %arg7[%c0_20, %c0_21] : memref<1x256xf32, #tpu.memory_space<vmem>>, vector<1x256xf32>
    %24 = vector.broadcast %23 : vector<1x256xf32> to vector<16x256xf32>
    %25 = arith.addf %22, %24 : vector<16x256xf32>
    %cst_22 = arith.constant 0.000000e+00 : f32
    %26 = vector.broadcast %cst_22 : f32 to vector<16x256xf32>
    %27 = arith.maximumf %25, %26 : vector<16x256xf32>
    %c0_23 = arith.constant 0 : index
    %c0_24 = arith.constant 0 : index
    %28 = vector.load %arg22[%c0_23, %c0_24] : memref<8x16xf32, #tpu.memory_space<vmem>>, vector<8x16xf32>
    %cst_25 = arith.constant dense<0.000000e+00> : vector<8x256xf32>
    %29 = tpu.matmul %28, %27, %cst_25 {dimension_numbers = #tpu.dot_dimension_numbers<[1], [0], [0], [1], [0, 0, 1, 1], [], []>} : vector<8x16xf32>, vector<16x256xf32>, vector<8x256xf32> -> vector<8x256xf32>
    %c0_26 = arith.constant 0 : index
    %c0_27 = arith.constant 0 : index
    %30 = vector.load %arg23[%c0_26, %c0_27] : memref<8x16xf32, #tpu.memory_space<vmem>>, vector<8x16xf32>
    %cst_28 = arith.constant dense<0.000000e+00> : vector<8x256xf32>
    %31 = tpu.matmul %30, %27, %cst_28 {dimension_numbers = #tpu.dot_dimension_numbers<[1], [0], [0], [1], [0, 0, 1, 1], [], []>} : vector<8x16xf32>, vector<16x256xf32>, vector<8x256xf32> -> vector<8x256xf32>
    %32 = arith.maximumf %29, %31 : vector<8x256xf32>
    %c0_29 = arith.constant 0 : index
    %c0_30 = arith.constant 0 : index
    %33 = vector.load %arg20[%c0_29, %c0_30] : memref<8x8xf32, #tpu.memory_space<vmem>>, vector<8x8xf32>
    %cst_31 = arith.constant dense<0.000000e+00> : vector<8x256xf32>
    %34 = tpu.matmul %33, %32, %cst_31 {dimension_numbers = #tpu.dot_dimension_numbers<[1], [0], [0], [1], [0, 0, 1, 1], [], []>} : vector<8x8xf32>, vector<8x256xf32>, vector<8x256xf32> -> vector<8x256xf32>
    %c0_32 = arith.constant 0 : index
    %c0_33 = arith.constant 0 : index
    %35 = vector.load %arg21[%c0_32, %c0_33] : memref<8x8xf32, #tpu.memory_space<vmem>>, vector<8x8xf32>
    %cst_34 = arith.constant dense<0.000000e+00> : vector<8x256xf32>
    %36 = tpu.matmul %35, %32, %cst_34 {dimension_numbers = #tpu.dot_dimension_numbers<[1], [0], [0], [1], [0, 0, 1, 1], [], []>} : vector<8x8xf32>, vector<8x256xf32>, vector<8x256xf32> -> vector<8x256xf32>
    %37 = tpu.concatenate %34, %32, %36 in 1 : vector<8x256xf32>, vector<8x256xf32>, vector<8x256xf32> -> vector<8x768xf32>
    %38 = arith.truncf %37 : vector<8x768xf32> to vector<8x768xbf16>
    %c0_35 = arith.constant 0 : index
    %c0_36 = arith.constant 0 : index
    %39 = vector.load %arg8[%c0_35, %c0_36] : memref<768x512xbf16, #tpu.memory_space<vmem>>, vector<768x512xbf16>
    %cst_37 = arith.constant dense<0.000000e+00> : vector<8x512xf32>
    %40 = tpu.matmul %38, %39, %cst_37 {dimension_numbers = #tpu.dot_dimension_numbers<[1], [0], [0], [1], [0, 0, 1, 1], [], []>} : vector<8x768xbf16>, vector<768x512xbf16>, vector<8x512xf32> -> vector<8x512xf32>
    %c0_38 = arith.constant 0 : index
    %c0_39 = arith.constant 0 : index
    %41 = vector.load %arg9[%c0_38, %c0_39] : memref<1x512xf32, #tpu.memory_space<vmem>>, vector<1x512xf32>
    %42 = vector.broadcast %41 : vector<1x512xf32> to vector<8x512xf32>
    %43 = arith.mulf %40, %42 : vector<8x512xf32>
    %c0_40 = arith.constant 0 : index
    %c0_41 = arith.constant 0 : index
    %44 = vector.load %arg10[%c0_40, %c0_41] : memref<1x512xf32, #tpu.memory_space<vmem>>, vector<1x512xf32>
    %45 = vector.broadcast %44 : vector<1x512xf32> to vector<8x512xf32>
    %46 = arith.addf %43, %45 : vector<8x512xf32>
    %cst_42 = arith.constant 0.000000e+00 : f32
    %47 = vector.broadcast %cst_42 : f32 to vector<8x512xf32>
    %48 = arith.maximumf %46, %47 : vector<8x512xf32>
    %c0_43 = arith.constant 0 : index
    %c0_44 = arith.constant 0 : index
    %49 = vector.load %arg25[%c0_43, %c0_44] : memref<8x512xf32, #tpu.memory_space<vmem>>, vector<8x512xf32>
    tpu.vector_store %arg25[%c0_43, %c0_44], %48 {strides = array<i32>} : memref<8x512xf32, #tpu.memory_space<vmem>>, vector<8x512xf32>,
    %cst_45 = arith.constant 0.000000e+00 : f32
    %50 = vector.broadcast %cst_45 : f32 to vector<1x256xf32>
    %c0_46 = arith.constant 0 : index
    %c0_47 = arith.constant 0 : index
    %51 = vector.load %arg25[%c0_46, %c0_47] : memref<8x512xf32, #tpu.memory_space<vmem>>, vector<1x512xf32>
    %52 = arith.truncf %51 : vector<1x512xf32> to vector<1x512xbf16>
    %c0_48 = arith.constant 0 : index
    %c0_49 = arith.constant 0 : index
    %53 = vector.load %arg11[%c0_48, %c0_49] : memref<4096x256xbf16, #tpu.memory_space<vmem>>, vector<512x256xbf16>
    %cst_50 = arith.constant dense<0.000000e+00> : vector<1x256xf32>
    %54 = tpu.matmul %52, %53, %cst_50 {dimension_numbers = #tpu.dot_dimension_numbers<[1], [0], [0], [1], [0, 0, 1, 1], [], []>} : vector<1x512xbf16>, vector<512x256xbf16>, vector<1x256xf32> -> vector<1x256xf32>
    %55 = arith.addf %50, %54 : vector<1x256xf32>
    %c1 = arith.constant 1 : index
    %c0_51 = arith.constant 0 : index
    %56 = vector.load %arg25[%c1, %c0_51] : memref<8x512xf32, #tpu.memory_space<vmem>>, vector<1x512xf32>
    %57 = arith.truncf %56 : vector<1x512xf32> to vector<1x512xbf16>
    %c512 = arith.constant 512 : index
    %c0_52 = arith.constant 0 : index
    %58 = vector.load %arg11[%c512, %c0_52] : memref<4096x256xbf16, #tpu.memory_space<vmem>>, vector<512x256xbf16>
    %cst_53 = arith.constant dense<0.000000e+00> : vector<1x256xf32>
    %59 = tpu.matmul %57, %58, %cst_53 {dimension_numbers = #tpu.dot_dimension_numbers<[1], [0], [0], [1], [0, 0, 1, 1], [], []>} : vector<1x512xbf16>, vector<512x256xbf16>, vector<1x256xf32> -> vector<1x256xf32>
    %60 = arith.addf %55, %59 : vector<1x256xf32>
    %c2 = arith.constant 2 : index
    %c0_54 = arith.constant 0 : index
    %61 = vector.load %arg25[%c2, %c0_54] : memref<8x512xf32, #tpu.memory_space<vmem>>, vector<1x512xf32>
    %62 = arith.truncf %61 : vector<1x512xf32> to vector<1x512xbf16>
    %c1024 = arith.constant 1024 : index
    %c0_55 = arith.constant 0 : index
    %63 = vector.load %arg11[%c1024, %c0_55] : memref<4096x256xbf16, #tpu.memory_space<vmem>>, vector<512x256xbf16>
    %cst_56 = arith.constant dense<0.000000e+00> : vector<1x256xf32>
    %64 = tpu.matmul %62, %63, %cst_56 {dimension_numbers = #tpu.dot_dimension_numbers<[1], [0], [0], [1], [0, 0, 1, 1], [], []>} : vector<1x512xbf16>, vector<512x256xbf16>, vector<1x256xf32> -> vector<1x256xf32>
    %65 = arith.addf %60, %64 : vector<1x256xf32>
    %c3 = arith.constant 3 : index
    %c0_57 = arith.constant 0 : index
    %66 = vector.load %arg25[%c3, %c0_57] : memref<8x512xf32, #tpu.memory_space<vmem>>, vector<1x512xf32>
    %67 = arith.truncf %66 : vector<1x512xf32> to vector<1x512xbf16>
    %c1536 = arith.constant 1536 : index
    %c0_58 = arith.constant 0 : index
    %68 = vector.load %arg11[%c1536, %c0_58] : memref<4096x256xbf16, #tpu.memory_space<vmem>>, vector<512x256xbf16>
    %cst_59 = arith.constant dense<0.000000e+00> : vector<1x256xf32>
    %69 = tpu.matmul %67, %68, %cst_59 {dimension_numbers = #tpu.dot_dimension_numbers<[1], [0], [0], [1], [0, 0, 1, 1], [], []>} : vector<1x512xbf16>, vector<512x256xbf16>, vector<1x256xf32> -> vector<1x256xf32>
    %70 = arith.addf %65, %69 : vector<1x256xf32>
    %c4 = arith.constant 4 : index
    %c0_60 = arith.constant 0 : index
    %71 = vector.load %arg25[%c4, %c0_60] : memref<8x512xf32, #tpu.memory_space<vmem>>, vector<1x512xf32>
    %72 = arith.truncf %71 : vector<1x512xf32> to vector<1x512xbf16>
    %c2048 = arith.constant 2048 : index
    %c0_61 = arith.constant 0 : index
    %73 = vector.load %arg11[%c2048, %c0_61] : memref<4096x256xbf16, #tpu.memory_space<vmem>>, vector<512x256xbf16>
    %cst_62 = arith.constant dense<0.000000e+00> : vector<1x256xf32>
    %74 = tpu.matmul %72, %73, %cst_62 {dimension_numbers = #tpu.dot_dimension_numbers<[1], [0], [0], [1], [0, 0, 1, 1], [], []>} : vector<1x512xbf16>, vector<512x256xbf16>, vector<1x256xf32> -> vector<1x256xf32>
    %75 = arith.addf %70, %74 : vector<1x256xf32>
    %c5 = arith.constant 5 : index
    %c0_63 = arith.constant 0 : index
    %76 = vector.load %arg25[%c5, %c0_63] : memref<8x512xf32, #tpu.memory_space<vmem>>, vector<1x512xf32>
    %77 = arith.truncf %76 : vector<1x512xf32> to vector<1x512xbf16>
    %c2560 = arith.constant 2560 : index
    %c0_64 = arith.constant 0 : index
    %78 = vector.load %arg11[%c2560, %c0_64] : memref<4096x256xbf16, #tpu.memory_space<vmem>>, vector<512x256xbf16>
    %cst_65 = arith.constant dense<0.000000e+00> : vector<1x256xf32>
    %79 = tpu.matmul %77, %78, %cst_65 {dimension_numbers = #tpu.dot_dimension_numbers<[1], [0], [0], [1], [0, 0, 1, 1], [], []>} : vector<1x512xbf16>, vector<512x256xbf16>, vector<1x256xf32> -> vector<1x256xf32>
    %80 = arith.addf %75, %79 : vector<1x256xf32>
    %c6 = arith.constant 6 : index
    %c0_66 = arith.constant 0 : index
    %81 = vector.load %arg25[%c6, %c0_66] : memref<8x512xf32, #tpu.memory_space<vmem>>, vector<1x512xf32>
    %82 = arith.truncf %81 : vector<1x512xf32> to vector<1x512xbf16>
    %c3072 = arith.constant 3072 : index
    %c0_67 = arith.constant 0 : index
    %83 = vector.load %arg11[%c3072, %c0_67] : memref<4096x256xbf16, #tpu.memory_space<vmem>>, vector<512x256xbf16>
    %cst_68 = arith.constant dense<0.000000e+00> : vector<1x256xf32>
    %84 = tpu.matmul %82, %83, %cst_68 {dimension_numbers = #tpu.dot_dimension_numbers<[1], [0], [0], [1], [0, 0, 1, 1], [], []>} : vector<1x512xbf16>, vector<512x256xbf16>, vector<1x256xf32> -> vector<1x256xf32>
    %85 = arith.addf %80, %84 : vector<1x256xf32>
    %c7 = arith.constant 7 : index
    %c0_69 = arith.constant 0 : index
    %86 = vector.load %arg25[%c7, %c0_69] : memref<8x512xf32, #tpu.memory_space<vmem>>, vector<1x512xf32>
    %87 = arith.truncf %86 : vector<1x512xf32> to vector<1x512xbf16>
    %c3584 = arith.constant 3584 : index
    %c0_70 = arith.constant 0 : index
    %88 = vector.load %arg11[%c3584, %c0_70] : memref<4096x256xbf16, #tpu.memory_space<vmem>>, vector<512x256xbf16>
    %cst_71 = arith.constant dense<0.000000e+00> : vector<1x256xf32>
    %89 = tpu.matmul %87, %88, %cst_71 {dimension_numbers = #tpu.dot_dimension_numbers<[1], [0], [0], [1], [0, 0, 1, 1], [], []>} : vector<1x512xbf16>, vector<512x256xbf16>, vector<1x256xf32> -> vector<1x256xf32>
    %90 = arith.addf %85, %89 : vector<1x256xf32>
    %c0_72 = arith.constant 0 : index
    %c0_73 = arith.constant 0 : index
    %91 = vector.load %arg12[%c0_72, %c0_73] : memref<1x256xf32, #tpu.memory_space<vmem>>, vector<1x256xf32>
    %92 = arith.mulf %90, %91 : vector<1x256xf32>
    %c0_74 = arith.constant 0 : index
    %c0_75 = arith.constant 0 : index
    %93 = vector.load %arg13[%c0_74, %c0_75] : memref<1x256xf32, #tpu.memory_space<vmem>>, vector<1x256xf32>
    %94 = arith.addf %92, %93 : vector<1x256xf32>
    %cst_76 = arith.constant 0.000000e+00 : f32
    %95 = vector.broadcast %cst_76 : f32 to vector<1x256xf32>
    %96 = arith.maximumf %94, %95 : vector<1x256xf32>
    %97 = arith.truncf %96 : vector<1x256xf32> to vector<1x256xbf16>
    %c0_77 = arith.constant 0 : index
    %c0_78 = arith.constant 0 : index
    %98 = vector.load %arg14[%c0_77, %c0_78] : memref<256x512xbf16, #tpu.memory_space<vmem>>, vector<256x512xbf16>
    %cst_79 = arith.constant dense<0.000000e+00> : vector<1x512xf32>
    %99 = tpu.matmul %97, %98, %cst_79 {dimension_numbers = #tpu.dot_dimension_numbers<[1], [0], [0], [1], [0, 0, 1, 1], [], []>} : vector<1x256xbf16>, vector<256x512xbf16>, vector<1x512xf32> -> vector<1x512xf32>
    %c0_80 = arith.constant 0 : index
    %c0_81 = arith.constant 0 : index
    %100 = vector.load %arg15[%c0_80, %c0_81] : memref<1x512xf32, #tpu.memory_space<vmem>>, vector<1x512xf32>
    %101 = arith.addf %99, %100 : vector<1x512xf32>
    %cst_82 = arith.constant 0.000000e+00 : f32
    %102 = vector.broadcast %cst_82 : f32 to vector<1x512xf32>
    %103 = arith.maximumf %101, %102 : vector<1x512xf32>
    %104 = arith.truncf %103 : vector<1x512xf32> to vector<1x512xbf16>
    %c0_83 = arith.constant 0 : index
    %c0_84 = arith.constant 0 : index
    %105 = vector.load %arg16[%c0_83, %c0_84] : memref<512x34xbf16, #tpu.memory_space<vmem>>, vector<512x34xbf16>
    %cst_85 = arith.constant dense<0.000000e+00> : vector<1x34xf32>
    %106 = tpu.matmul %104, %105, %cst_85 {dimension_numbers = #tpu.dot_dimension_numbers<[1], [0], [0], [1], [0, 0, 1, 1], [], []>} : vector<1x512xbf16>, vector<512x34xbf16>, vector<1x34xf32> -> vector<1x34xf32>
    %c0_86 = arith.constant 0 : index
    %c0_87 = arith.constant 0 : index
    %107 = vector.load %arg17[%c0_86, %c0_87] : memref<1x34xf32, #tpu.memory_space<vmem>>, vector<1x34xf32>
    %108 = arith.addf %106, %107 : vector<1x34xf32>
    %cst_88 = arith.constant 0.000000e+00 : f32
    %109 = vector.broadcast %cst_88 : f32 to vector<1x34xf32>
    %110 = arith.subf %109, %108 : vector<1x34xf32>
    %111 = math.exp %110 : vector<1x34xf32>
    %cst_89 = arith.constant 1.000000e+00 : f32
    %112 = vector.broadcast %cst_89 : f32 to vector<1x34xf32>
    %113 = arith.addf %112, %111 : vector<1x34xf32>
    %114 = tpu.reciprocal %113 {approx = true} : vector<1x34xf32> -> vector<1x34xf32>
    %c0_90 = arith.constant 0 : index
    %c0_91 = arith.constant 0 : index
    %c0_92 = arith.constant 0 : index
    %115 = vector.load %arg24[%c0_90, %c0_91, %c0_92] : memref<1x1x34xf32, #tpu.memory_space<vmem>>, vector<1x1x34xf32>
    %116 = vector.shape_cast %115 : vector<1x1x34xf32> to vector<1x34xf32>
    %117 = vector.shape_cast %114 : vector<1x34xf32> to vector<1x1x34xf32>
    tpu.vector_store %arg24[%c0_90, %c0_91, %c0_92], %117 {strides = array<i32>} : memref<1x1x34xf32, #tpu.memory_space<vmem>>, vector<1x1x34xf32>,
    return
  }
  func.func @transform_0(%arg0: i32) -> (i32, i32, i32) {
    %c0_i32 = arith.constant 0 : i32
    %c0_i32_0 = arith.constant 0 : i32
    %c0_i32_1 = arith.constant 0 : i32
    return %arg0, %c0_i32, %c0_i32_0 : i32, i32, i32
  }
  func.func @transform_1(%arg0: i32) -> (i32, i32) {
    %c0_i32 = arith.constant 0 : i32
    %c0_i32_0 = arith.constant 0 : i32
    %c0_i32_1 = arith.constant 0 : i32
    return %c0_i32, %c0_i32_0 : i32, i32
  }
  func.func @transform_2(%arg0: i32) -> (i32, i32) {
    %c0_i32 = arith.constant 0 : i32
    %c0_i32_0 = arith.constant 0 : i32
    %c0_i32_1 = arith.constant 0 : i32
    return %c0_i32, %c0_i32_0 : i32, i32
  }
  func.func @transform_3(%arg0: i32) -> (i32, i32) {
    %c0_i32 = arith.constant 0 : i32
    %c0_i32_0 = arith.constant 0 : i32
    %c0_i32_1 = arith.constant 0 : i32
    return %c0_i32, %c0_i32_0 : i32, i32
  }
  func.func @transform_4(%arg0: i32) -> (i32, i32) {
    %c0_i32 = arith.constant 0 : i32
    %c0_i32_0 = arith.constant 0 : i32
    %c0_i32_1 = arith.constant 0 : i32
    return %c0_i32, %c0_i32_0 : i32, i32
  }
  func.func @transform_5(%arg0: i32) -> (i32, i32) {
    %c0_i32 = arith.constant 0 : i32
    %c0_i32_0 = arith.constant 0 : i32
    %c0_i32_1 = arith.constant 0 : i32
    return %c0_i32, %c0_i32_0 : i32, i32
  }
  func.func @transform_6(%arg0: i32) -> (i32, i32) {
    %c0_i32 = arith.constant 0 : i32
    %c0_i32_0 = arith.constant 0 : i32
    %c0_i32_1 = arith.constant 0 : i32
    return %c0_i32, %c0_i32_0 : i32, i32
  }
  func.func @transform_7(%arg0: i32) -> (i32, i32) {
    %c0_i32 = arith.constant 0 : i32
    %c0_i32_0 = arith.constant 0 : i32
    %c0_i32_1 = arith.constant 0 : i32
    return %c0_i32, %c0_i32_0 : i32, i32
  }
  func.func @transform_8(%arg0: i32) -> (i32, i32) {
    %c0_i32 = arith.constant 0 : i32
    %c0_i32_0 = arith.constant 0 : i32
    %c0_i32_1 = arith.constant 0 : i32
    return %c0_i32, %c0_i32_0 : i32, i32
  }
  func.func @transform_9(%arg0: i32) -> (i32, i32) {
    %c0_i32 = arith.constant 0 : i32
    %c0_i32_0 = arith.constant 0 : i32
    %c0_i32_1 = arith.constant 0 : i32
    return %c0_i32, %c0_i32_0 : i32, i32
  }
  func.func @transform_10(%arg0: i32) -> (i32, i32) {
    %c0_i32 = arith.constant 0 : i32
    %c0_i32_0 = arith.constant 0 : i32
    %c0_i32_1 = arith.constant 0 : i32
    return %c0_i32, %c0_i32_0 : i32, i32
  }
  func.func @transform_11(%arg0: i32) -> (i32, i32) {
    %c0_i32 = arith.constant 0 : i32
    %c0_i32_0 = arith.constant 0 : i32
    %c0_i32_1 = arith.constant 0 : i32
    return %c0_i32, %c0_i32_0 : i32, i32
  }
  func.func @transform_12(%arg0: i32) -> (i32, i32) {
    %c0_i32 = arith.constant 0 : i32
    %c0_i32_0 = arith.constant 0 : i32
    %c0_i32_1 = arith.constant 0 : i32
    return %c0_i32, %c0_i32_0 : i32, i32
  }
  func.func @transform_13(%arg0: i32) -> (i32, i32) {
    %c0_i32 = arith.constant 0 : i32
    %c0_i32_0 = arith.constant 0 : i32
    %c0_i32_1 = arith.constant 0 : i32
    return %c0_i32, %c0_i32_0 : i32, i32
  }
  func.func @transform_14(%arg0: i32) -> (i32, i32) {
    %c0_i32 = arith.constant 0 : i32
    %c0_i32_0 = arith.constant 0 : i32
    %c0_i32_1 = arith.constant 0 : i32
    return %c0_i32, %c0_i32_0 : i32, i32
  }
  func.func @transform_15(%arg0: i32) -> (i32, i32) {
    %c0_i32 = arith.constant 0 : i32
    %c0_i32_0 = arith.constant 0 : i32
    %c0_i32_1 = arith.constant 0 : i32
    return %c0_i32, %c0_i32_0 : i32, i32
  }
  func.func @transform_16(%arg0: i32) -> (i32, i32) {
    %c0_i32 = arith.constant 0 : i32
    %c0_i32_0 = arith.constant 0 : i32
    %c0_i32_1 = arith.constant 0 : i32
    return %c0_i32, %c0_i32_0 : i32, i32
  }
  func.func @transform_17(%arg0: i32) -> (i32, i32) {
    %c0_i32 = arith.constant 0 : i32
    %c0_i32_0 = arith.constant 0 : i32
    %c0_i32_1 = arith.constant 0 : i32
    return %c0_i32, %c0_i32_0 : i32, i32
  }
  func.func @transform_18(%arg0: i32) -> (i32, i32) {
    %c0_i32 = arith.constant 0 : i32
    %c0_i32_0 = arith.constant 0 : i32
    %c0_i32_1 = arith.constant 0 : i32
    return %c0_i32, %c0_i32_0 : i32, i32
  }
  func.func @transform_19(%arg0: i32) -> (i32, i32) {
    %c0_i32 = arith.constant 0 : i32
    %c0_i32_0 = arith.constant 0 : i32
    %c0_i32_1 = arith.constant 0 : i32
    return %c0_i32, %c0_i32_0 : i32, i32
  }
  func.func @transform_20(%arg0: i32) -> (i32, i32) {
    %c0_i32 = arith.constant 0 : i32
    %c0_i32_0 = arith.constant 0 : i32
    %c0_i32_1 = arith.constant 0 : i32
    return %c0_i32, %c0_i32_0 : i32, i32
  }
  func.func @transform_21(%arg0: i32) -> (i32, i32) {
    %c0_i32 = arith.constant 0 : i32
    %c0_i32_0 = arith.constant 0 : i32
    %c0_i32_1 = arith.constant 0 : i32
    return %c0_i32, %c0_i32_0 : i32, i32
  }
  func.func @transform_22(%arg0: i32) -> (i32, i32) {
    %c0_i32 = arith.constant 0 : i32
    %c0_i32_0 = arith.constant 0 : i32
    %c0_i32_1 = arith.constant 0 : i32
    return %c0_i32, %c0_i32_0 : i32, i32
  }
  func.func @transform_23(%arg0: i32) -> (i32, i32, i32) {
    %c0_i32 = arith.constant 0 : i32
    %c0_i32_0 = arith.constant 0 : i32
    %c0_i32_1 = arith.constant 0 : i32
    return %arg0, %c0_i32, %c0_i32_0 : i32, i32, i32
  }
}

</mosaic_0001>

<bundles_post_ra>
// kernel: ste_t4_forward.1
= control target key start
LH: loop header
LB: loop body
LE: loop exit
PB: predicated region body
PF: predicated region fallthrough
CT: control target
= control target key end

     0   :  { %s13237_s0 = inlined_call_operand.vmem [shape: bf16[2,16,512], index: 0, kind: input, shape index: {}]   ;;  %s13238_s1 = inlined_call_operand.hbm [shape: bf16[512,128], index: 1, kind: input, shape index: {}]   ;;  %s13239_s2 = inlined_call_operand.hbm [shape: f32[1,128], index: 2, kind: input, shape index: {}]   ;;  %s13240_s3 = inlined_call_operand.hbm [shape: f32[1,128], index: 3, kind: input, shape index: {}]   ;;  %s13241_s4 = inlined_call_operand.hbm [shape: bf16[384,256], index: 4, kind: input, shape index: {}]   ;;  %s13242_s5 = inlined_call_operand.hbm [shape: f32[1,256], index: 5, kind: input, shape index: {}]   ;;  %s13243_s6 = inlined_call_operand.hbm [shape: f32[1,256], index: 6, kind: input, shape index: {}]   ;;  %s13244_s7 = inlined_call_operand.hbm [shape: bf16[768,512], index: 7, kind: input, shape index: {}]   ;;  %s13245_s8 = inlined_call_operand.hbm [shape: f32[1,512], index: 8, kind: input, shape index: {}]   ;;  %s13246_s9 = inlined_call_operand.hbm [shape: f32[1,512], index: 9, kind: input, shape index: {}]   ;;  %s13247_s10 = inlined_call_operand.hbm [shape: bf16[4096,256], index: 10, kind: input, shape index: {}]   ;;  %s13248_s11 = inlined_call_operand.hbm [shape: f32[1,256], index: 11, kind: input, shape index: {}]   ;;  %s13249_s12 = inlined_call_operand.hbm [shape: f32[1,256], index: 12, kind: input, shape index: {}]   ;;  %s13250_s13 = inlined_call_operand.hbm [shape: bf16[256,512], index: 13, kind: input, shape index: {}]   ;;  %s13251_s14 = inlined_call_operand.hbm [shape: f32[1,512], index: 14, kind: input, shape index: {}]   ;;  %s13252_s15 = inlined_call_operand.vmem [shape: bf16[512,34], index: 15, kind: input, shape index: {}]   ;;  %s13253_s16 = inlined_call_operand.hbm [shape: f32[1,34], index: 16, kind: input, shape index: {}]   ;;  %s13254_s17 = inlined_call_operand.hbm [shape: f32[16,16], index: 17, kind: input, shape index: {}]   ;;  %s13255_s18 = inlined_call_operand.hbm [shape: f32[16,16], index: 18, kind: input, shape index: {}]   ;;  %s13256_s19 = inlined_call_operand.hbm [shape: f32[8,8], index: 19, kind: input, shape index: {}]   ;;  %s13257_s20 = inlined_call_operand.hbm [shape: f32[8,8], index: 20, kind: input, shape index: {}]   ;;  %s13258_s21 = inlined_call_operand.hbm [shape: f32[8,16], index: 21, kind: input, shape index: {}]   ;;  %s13259_s22 = inlined_call_operand.hbm [shape: f32[8,16], index: 22, kind: input, shape index: {}]   ;;  %s13260_s23 = inlined_call_operand.hbm [shape: f32[2,1,34], index: 23, kind: output, shape index: {}]  }
   0x1   :  { %13291 = sst [smem:[#allocation59_spill]] %s13237_s0 }
   0x2   :  { %13292 = sst [smem:[#allocation60_spill]] %s13238_s1 }
   0x3   :  { %13293 = sst [smem:[#allocation61_spill]] %s13239_s2 }
   0x4   :  { %13294 = sst [smem:[#allocation62_spill]] %s13240_s3 }
   0x5   :  { %13295 = sst [smem:[#allocation63_spill]] %s13241_s4 }
   0x6   :  { %13296 = sst [smem:[#allocation64_spill]] %s13242_s5 }
   0x7   :  { %13297 = sst [smem:[#allocation65_spill]] %s13243_s6 }
   0x8   :  { %13298 = sst [smem:[#allocation66_spill]] %s13244_s7 }
   0x9   :  { %13299 = sst [smem:[#allocation67_spill]] %s13245_s8 }
   0xa   :  { %13300 = sst [smem:[#allocation68_spill]] %s13247_s10 }
   0xb   :  { %13301 = sst [smem:[#allocation69_spill]] %s13249_s12 }
   0xc   :  { %13302 = sst [smem:[#allocation70_spill]] %s13251_s14 }
   0xd   :  { %13303 = sst [smem:[#allocation71_spill]] %s13252_s15 }
   0xe   :  { %13304 = sst [smem:[#allocation72_spill]] %s13254_s17 }
   0xf   :  { %13305 = sst [smem:[#allocation73_spill]] %s13256_s19 }
  0x10   :  { %13306 = sst [smem:[#allocation74_spill]] %s13260_s23 }
  0x11   :  { %28 = vsyncpa [#allocation4], 0 }
  0x12   :  { %29 = vsyncpa [#allocation7], 0 }
  0x13   :  { %30 = vsyncpa [#allocation10], 0 }
  0x14   :  { %31 = vsyncpa [#allocation13], 0 }
  0x15   :  { %32 = vsyncpa [#allocation16], 0 }
  0x16   :  { %33 = vsyncpa [#allocation19], 0 }
  0x17   :  { %34 = vsyncpa [#allocation22], 0 }
  0x18   :  { %35 = vsyncpa [#allocation25], 0 }
  0x19   :  { %36 = vsyncpa [#allocation28], 0 }
  0x1a   :  { %37 = vsyncpa [#allocation31], 0 }
  0x1b   :  { %38 = vsyncpa [#allocation34], 0 }
  0x1c   :  { %39 = vsyncpa [#allocation5], 0 }
  0x1d   :  { %41 = vsyncpa [#allocation5 + $0x1], 0  ;;  %s12364_s4 = smov 0   ;;  %s12366_s30 = smov 0  }
  0x1e   :  { %s12368_s24 = smov 0   ;;  %s12370_s25 = smov 0  }
  0x1f LB: > { %13307 = sst [smem:[#allocation49_spill]] %s12200_s4  ;;  %s12385_s5 = sadd.s32 4294967295, %s12212_s25   ;;  %s12212_s25 = sphi %s12370_s25, %s13373_s25   ;;  %s12208_s24 = sphi %s12368_s24, %s13376_s24   ;;  %s12204_s30 = sphi %s12366_s30, %s13375_s30   ;;  %s12200_s4 = sphi %s12364_s4, %s13374_s4  }
  0x20   : > { %13308 = sst [smem:[#allocation50_spill]] %s12204_s30  ;;  %s8812_s1 = sadd.s32 4294967294, %s12212_s25  }
  0x21   : > { %13309 = sst [smem:[#allocation51_spill]] %s12208_s24  ;;  %s12389_s26 = sadd.s32 1, %s12212_s25  }
  0x22   : > { %13310 = sst [smem:[#allocation52_spill]] %s12212_s25  ;;  %s542_s2 = sadd.s32 1, %s12208_s24 }
  0x23   : > { %13311 = sst [smem:[#allocation53_spill]] %s12385_s5  ;;  %s539_s6 = ssub.s32 %s12212_s25, %s12389_s26 }
  0x24   : > { %13312 = sst [smem:[#allocation54_spill]] %s12389_s26  ;;  %p552_p0 = scmp.ne.s32.totalorder %s12208_s24, %s12204_s30 }
  0x25   : > { %p540_p1 = scmp.eq.s32.totalorder %s539_s6, 0  ;;  %p553_p2 = scmp.eq.s32.totalorder %s12385_s5, 1 }
  0x26   : > { %p558_p3 = scmp.ne.s32.totalorder %s12204_s30, %s12200_s4  ;;  %p559_p4 = scmp.eq.s32.totalorder %s8812_s1, 1 }
  0x27   : > { %s12400_s27 = scalar_select %p540_p1, %s12208_s24, %s542_s2  }
  0x28   : > { %p12402_p5 = por %p553_p2, %p552_p0  ;;  %p12406_p6 = por %p559_p4, %p558_p3 }
  0x29   : > { %13313 = sst [smem:[#allocation55_spill]] %s12400_s27  ;;  %p8813_p7 = scmp.ge.s32.totalorder %s12212_s25, 1 }
  0x2a   : > { %s13314_s7 = scalar_select %p12402_p5, 1, 0 }
  0x2b   : > { %s13316_s28 = scalar_select %p12406_p6, 1, 0 }
  0x2c   : > { %13315 = sst [smem:[#allocation56_spill]] %s13314_s7  ;;  %p566_p8 = scmp.lt.s32.totalorder %s12212_s25, 3 }
  0x2d   : > { %13317 = sst [smem:[#allocation57_spill]] %s13316_s28  ;;  %p13278_p9 = scmp.eq.s32.totalorder %s12385_s5, 0 }
  0x2e   : > { %p12413_p10 = pnand %p8813_p7, %p566_p8  ;;  %s12214_s3 = smov [#allocation6]  }
  0x2f   : > { %s592_s0 = sshll.u32 %s12214_s3, 4  ;;  %s12215_s1 = smov [#allocation9]   ;;  %s593_s0 = int_to_ptr.vmem [resolvable:$true] %s592_s0 }
  0x30   : > { %s13318_s29 = scalar_select %p12413_p10, 1, 0 }
  0x31   : > { %p10048_p11 = pneg %p12413_p10  ;;  %s613_s2 = sshll.u32 %s12215_s1, 4  ;;  %s12425_s2 = int_to_ptr.vmem [resolvable:$true] %s613_s2 }
  0x32   : > { %13319 = sst [smem:[#allocation58_spill]] %s13318_s29  ;;  %s12216_s27 = smov [#allocation12]  }
  0x33   : > { %p12421_p12 = pnand %p13278_p9, %p10048_p11  ;;  %s12427_s24 = sshll.u32 %s12216_s27, 4  ;;  %s639_s24 = int_to_ptr.vmem [resolvable:$true] %s12427_s24 }
  0x34   : > { %s13321_s4 = sld [smem:[#allocation61_spill]] }
  0x35   : > { %p12437_p0 = pneg %p12421_p12 }
  0x3a   : > { %s13322_s23 = smov %s13321_s4  ;;  %s11518_s3 = scalar_lea.hbm %s13321_s4, 16 }
  0x3b   : > { %p11519_p13 = scmp.ne.s32.totalorder %s13322_s23, %s11518_s3  ;;  %p11525_p3 = scmp.lt.u32.totalorder %s11518_s3, %s13322_s23 }
  0x3d   : > { %p11521_p1 = pnand %p12437_p0, %p11519_p13 }
  0x3f   : > { %p11522_p2 = pneg %p11521_p1 }
  0x41   : > { %p11527_p4 = pnand %p11525_p3, %p11522_p2 }
  0x43   : > { %11530 = shalt.err (!%p11527_p4)
}
  0x44   : > { %s11531_s4 = scalar_lea.vmem %s593_s0, 16  ;;  %s11538_s25 = scalar_lea.vmem %s593_s0, 32 }
  0x45   : > { %p11532_p7 = scmp.ne.s32.totalorder %s593_s0, %s11531_s4  ;;  %p11539_p9 = scmp.lt.s32.totalorder %s593_s0, %s593_s0 }
  0x46   : > { %p11540_p6 = scmp.lt.s32.totalorder %s11538_s25, %s11531_s4 }
  0x47   : > { %p11534_p8 = pnand %p11532_p7, %p12437_p0 }
  0x48   : > { %p11541_p5 = por %p11540_p6, %p11539_p9 }
  0x49   : > { %p11535_p11 = pneg %p11534_p8 }
  0x4b   : > { %p11542_p10 = pnand %p11541_p5, %p11535_p11 }
  0x4d   : > { %11545 = shalt.err (!%p11542_p10)
}
  0x4e   : > { %10054 = dma.hbm_to_vmem [thread:$0]  (!%p12421_p12), %s13322_s23, 16, %s593_s0, [#allocation7]  }
  0x4f   : > { %s13324_s3 = sld [smem:[#allocation63_spill]] }
  0x55   : > { %s11546_s27 = scalar_lea.hbm %s13324_s3, 6144 }
  0x56   : > { %p11547_p13 = scmp.ne.s32.totalorder %s13324_s3, %s11546_s27  ;;  %p11553_p5 = scmp.lt.u32.totalorder %s11546_s27, %s13324_s3 }
  0x58   : > { %p11549_p1 = pnand %p11547_p13, %p12437_p0 }
  0x5a   : > { %p11550_p6 = pneg %p11549_p1 }
  0x5c   : > { %p11555_p9 = pnand %p11553_p5, %p11550_p6 }
  0x5e   : > { %11558 = shalt.err (!%p11555_p9)
}
  0x5f   : > { %s11559_s0 = scalar_lea.vmem %s12425_s2, 6144  ;;  %p11567_p4 = scmp.lt.s32.totalorder %s12425_s2, %s12425_s2 }
  0x60   : > { %p11560_p10 = scmp.ne.s32.totalorder %s12425_s2, %s11559_s0  ;;  %p11568_p7 = scmp.lt.s32.totalorder %s11559_s0, %s11559_s0 }
  0x62   : > { %p11562_p2 = pnand %p11560_p10, %p12437_p0  ;;  %p11569_p8 = por %p11568_p7, %p11567_p4 }
  0x64   : > { %p11563_p3 = pneg %p11562_p2 }
  0x66   : > { %p11570_p11 = pnand %p11569_p8, %p11563_p3 }
  0x68   : > { %11573 = shalt.err (!%p11570_p11)
}
  0x69   : > { %s13286_s15 = smov 128   ;;  %s13288_s5 = smov 8  }
  0x6a   : > { %10060 = dma.hbm_to_vmem [thread:$0]  (!%p12421_p12), %s13324_s3, 6144, %s12425_s2, [#allocation10], %s13286_s15, %s13286_s15, %s13288_s5  }
  0x6b   : > { %s13325_s27 = sld [smem:[#allocation65_spill]] }
  0x71   : > { %s11574_s4 = scalar_lea.hbm %s13325_s27, 32 }
  0x72   : > { %p11575_p13 = scmp.ne.s32.totalorder %s13325_s27, %s11574_s4  ;;  %p11581_p5 = scmp.lt.u32.totalorder %s11574_s4, %s13325_s27 }
  0x74   : > { %p11577_p1 = pnand %p11575_p13, %p12437_p0 }
  0x76   : > { %p11578_p6 = pneg %p11577_p1 }
  0x78   : > { %p11583_p9 = pnand %p11581_p5, %p11578_p6 }
  0x7a   : > { %11586 = shalt.err (!%p11583_p9)
}
  0x7b   : > { %s11587_s26 = scalar_lea.vmem %s639_s24, 32  ;;  %p11595_p4 = scmp.lt.s32.totalorder %s639_s24, %s639_s24 }
  0x7c   : > { %p11588_p10 = scmp.ne.s32.totalorder %s639_s24, %s11587_s26  ;;  %p11596_p7 = scmp.lt.s32.totalorder %s11587_s26, %s11587_s26 }
  0x7e   : > { %p11590_p2 = pnand %p11588_p10, %p12437_p0  ;;  %p11597_p8 = por %p11596_p7, %p11595_p4 }
  0x80   : > { %p11591_p3 = pneg %p11590_p2 }
  0x82   : > { %p11598_p11 = pnand %p11597_p8, %p11591_p3 }
  0x84   : > { %11601 = shalt.err (!%p11598_p11)
}
  0x85   : > { %10066 = dma.hbm_to_vmem [thread:$0]  (!%p12421_p12), %s13325_s27, 32, %s639_s24, [#allocation13]  }
  0x86   : > { %s12219_s23 = smov [#allocation15]   ;;  %s12220_s30 = smov [#allocation18]  }
  0x87   : > { %s662_s29 = sshll.u32 %s12219_s23, 4  ;;  %s683_s28 = sshll.u32 %s12220_s30, 4  ;;  %s663_s29 = int_to_ptr.vmem [resolvable:$true] %s662_s29  ;;  %s684_s28 = int_to_ptr.vmem [resolvable:$true] %s683_s28 }
  0x88   : > { %s13326_s8 = sld [smem:[#allocation67_spill]] }
  0x8e   : > { %s11602_s0 = scalar_lea.hbm %s13326_s8, 64 }
  0x8f   : > { %p11603_p13 = scmp.ne.s32.totalorder %s13326_s8, %s11602_s0  ;;  %p11609_p5 = scmp.lt.u32.totalorder %s11602_s0, %s13326_s8 }
  0x91   : > { %p11605_p1 = pnand %p11603_p13, %p12437_p0 }
  0x93   : > { %p11606_p6 = pneg %p11605_p1 }
  0x95   : > { %p11611_p9 = pnand %p11609_p5, %p11606_p6 }
  0x97   : > { %11614 = shalt.err (!%p11611_p9)
}
  0x98   : > { %s11615_s24 = scalar_lea.vmem %s663_s29, 64  ;;  %p11623_p4 = scmp.lt.s32.totalorder %s663_s29, %s663_s29 }
  0x99   : > { %p11616_p10 = scmp.ne.s32.totalorder %s663_s29, %s11615_s24  ;;  %p11624_p7 = scmp.lt.s32.totalorder %s11615_s24, %s11615_s24 }
  0x9b   : > { %p11618_p2 = pnand %p11616_p10, %p12437_p0  ;;  %p11625_p8 = por %p11624_p7, %p11623_p4 }
  0x9d   : > { %p11619_p3 = pneg %p11618_p2 }
  0x9f   : > { %p11626_p11 = pnand %p11625_p8, %p11619_p3 }
  0xa1   : > { %11629 = shalt.err (!%p11626_p11)
}
  0xa2   : > { %10072 = dma.hbm_to_vmem [thread:$0]  (!%p12421_p12), %s13326_s8, 64, %s663_s29, [#allocation16]  }
  0xa3   : > { %s13327_s10 = sld [smem:[#allocation68_spill]] }
  0xa9   : > { %s11630_s30 = scalar_lea.hbm %s13327_s10, 65536 }
  0xaa   : > { %p11631_p13 = scmp.ne.s32.totalorder %s13327_s10, %s11630_s30  ;;  %p11637_p5 = scmp.lt.u32.totalorder %s11630_s30, %s13327_s10 }
  0xac   : > { %p11633_p1 = pnand %p11631_p13, %p12437_p0 }
  0xae   : > { %p11634_p6 = pneg %p11633_p1 }
  0xb0   : > { %p11639_p9 = pnand %p11637_p5, %p11634_p6 }
  0xb2   : > { %11642 = shalt.err (!%p11639_p9)
}
  0xb3   : > { %s11643_s2 = scalar_lea.vmem %s684_s28, 65536  ;;  %p11651_p4 = scmp.lt.s32.totalorder %s684_s28, %s684_s28 }
  0xb4   : > { %p11644_p10 = scmp.ne.s32.totalorder %s684_s28, %s11643_s2  ;;  %p11652_p7 = scmp.lt.s32.totalorder %s11643_s2, %s11643_s2 }
  0xb6   : > { %p11646_p2 = pnand %p11644_p10, %p12437_p0  ;;  %p11653_p8 = por %p11652_p7, %p11651_p4 }
  0xb8   : > { %p11647_p3 = pneg %p11646_p2 }
  0xba   : > { %p11654_p11 = pnand %p11653_p8, %p11647_p3 }
  0xbc   : > { %11657 = shalt.err (!%p11654_p11)
}
  0xbd   : > { %s13328_s29 = smov 8   ;;  %s13329_s24 = smov 128  }
  0xbe   : > { %10078 = dma.hbm_to_vmem [thread:$0]  (!%p12421_p12), %s13327_s10, 65536, %s684_s28, [#allocation19], %s13329_s24, %s13329_s24, %s13328_s29  }
  0xbf   : > { %s12221_s5 = smov [#allocation21]   ;;  %s12222_s30 = smov [#allocation24]  }
  0xc0   : > { %s708_s23 = sshll.u32 %s12221_s5, 4  ;;  %s732_s4 = sshll.u32 %s12222_s30, 4  ;;  %s709_s23 = int_to_ptr.vmem [resolvable:$true] %s708_s23  ;;  %s733_s4 = int_to_ptr.vmem [resolvable:$true] %s732_s4 }
  0xc1   : > { %s13330_s12 = sld [smem:[#allocation69_spill]] }
  0xc7   : > { %s11658_s26 = scalar_lea.hbm %s13330_s12, 32 }
  0xc8   : > { %p11659_p13 = scmp.ne.s32.totalorder %s13330_s12, %s11658_s26  ;;  %p11665_p5 = scmp.lt.u32.totalorder %s11658_s26, %s13330_s12 }
  0xca   : > { %p11661_p1 = pnand %p11659_p13, %p12437_p0 }
  0xcc   : > { %p11662_p6 = pneg %p11661_p1 }
  0xce   : > { %p11667_p9 = pnand %p11665_p5, %p11662_p6 }
  0xd0   : > { %11670 = shalt.err (!%p11667_p9)
}
  0xd1   : > { %s11671_s28 = scalar_lea.vmem %s709_s23, 32  ;;  %p11679_p4 = scmp.lt.s32.totalorder %s709_s23, %s709_s23 }
  0xd2   : > { %p11672_p10 = scmp.ne.s32.totalorder %s709_s23, %s11671_s28  ;;  %p11680_p7 = scmp.lt.s32.totalorder %s11671_s28, %s11671_s28 }
  0xd4   : > { %p11674_p2 = pnand %p11672_p10, %p12437_p0  ;;  %p11681_p8 = por %p11680_p7, %p11679_p4 }
  0xd6   : > { %p11675_p3 = pneg %p11674_p2 }
  0xd8   : > { %p11682_p11 = pnand %p11681_p8, %p11675_p3 }
  0xda   : > { %11685 = shalt.err (!%p11682_p11)
}
  0xdb   : > { %10084 = dma.hbm_to_vmem [thread:$0]  (!%p12421_p12), %s13330_s12, 32, %s709_s23, [#allocation22]  }
  0xdc   : > { %s13331_s14 = sld [smem:[#allocation70_spill]] }
  0xe2   : > { %s11686_s30 = scalar_lea.hbm %s13331_s14, 64 }
  0xe3   : > { %p11687_p13 = scmp.ne.s32.totalorder %s13331_s14, %s11686_s30  ;;  %p11693_p5 = scmp.lt.u32.totalorder %s11686_s30, %s13331_s14 }
  0xe5   : > { %p11689_p1 = pnand %p11687_p13, %p12437_p0 }
  0xe7   : > { %p11690_p6 = pneg %p11689_p1 }
  0xe9   : > { %p11695_p9 = pnand %p11693_p5, %p11690_p6 }
  0xeb   : > { %11698 = shalt.err (!%p11695_p9)
}
  0xec   : > { %s11699_s15 = scalar_lea.vmem %s733_s4, 64  ;;  %p11707_p4 = scmp.lt.s32.totalorder %s733_s4, %s733_s4 }
  0xed   : > { %p11700_p10 = scmp.ne.s32.totalorder %s733_s4, %s11699_s15  ;;  %p11708_p7 = scmp.lt.s32.totalorder %s11699_s15, %s11699_s15 }
  0xef   : > { %p11702_p2 = pnand %p11700_p10, %p12437_p0  ;;  %p11709_p8 = por %p11708_p7, %p11707_p4 }
  0xf1   : > { %p11703_p3 = pneg %p11702_p2 }
  0xf3   : > { %p11710_p11 = pnand %p11709_p8, %p11703_p3 }
  0xf5   : > { %11713 = shalt.err (!%p11710_p11)
}
  0xf6   : > { %10090 = dma.hbm_to_vmem [thread:$0]  (!%p12421_p12), %s13331_s14, 64, %s733_s4, [#allocation25]  }
  0xf7   : > { %s12223_s3 = smov [#allocation27]   ;;  %s12224_s8 = smov [#allocation30]  }
  0xf8   : > { %s756_s7 = sshll.u32 %s12223_s3, 4  ;;  %s783_s5 = sshll.u32 %s12224_s8, 4  ;;  %s757_s7 = int_to_ptr.vmem [resolvable:$true] %s756_s7  ;;  %s784_s5 = int_to_ptr.vmem [resolvable:$true] %s783_s5 }
  0xf9   : > { %s13332_s17 = sld [smem:[#allocation72_spill]] }
  0xff   : > { %s11714_s0 = scalar_lea.hbm %s13332_s17, 256 }
 0x100   : > { %p11715_p13 = scmp.ne.s32.totalorder %s13332_s17, %s11714_s0  ;;  %p11721_p5 = scmp.lt.u32.totalorder %s11714_s0, %s13332_s17 }
 0x102   : > { %p11717_p1 = pnand %p11715_p13, %p12437_p0 }
 0x104   : > { %p11718_p6 = pneg %p11717_p1 }
 0x106   : > { %p11723_p9 = pnand %p11721_p5, %p11718_p6 }
 0x108   : > { %11726 = shalt.err (!%p11723_p9)
}
 0x109   : > { %s11727_s4 = scalar_lea.vmem %s757_s7, 256  ;;  %p11735_p4 = scmp.lt.s32.totalorder %s757_s7, %s757_s7 }
 0x10a   : > { %p11728_p10 = scmp.ne.s32.totalorder %s757_s7, %s11727_s4  ;;  %p11736_p7 = scmp.lt.s32.totalorder %s11727_s4, %s11727_s4 }
 0x10c   : > { %p11730_p2 = pnand %p11728_p10, %p12437_p0  ;;  %p11737_p8 = por %p11736_p7, %p11735_p4 }
 0x10e   : > { %p11731_p3 = pneg %p11730_p2 }
 0x110   : > { %p11738_p11 = pnand %p11737_p8, %p11731_p3 }
 0x112   : > { %11741 = shalt.err (!%p11738_p11)
}
 0x113   : > { %10096 = dma.hbm_to_vmem [thread:$0]  (!%p12421_p12), %s13332_s17, 256, %s757_s7, [#allocation28], %s13329_s24, %s13329_s24, %s13328_s29  }
 0x114   : > { %s13333_s19 = sld [smem:[#allocation73_spill]] }
 0x11a   : > { %s11742_s25 = scalar_lea.hbm %s13333_s19, 128 }
 0x11b   : > { %p11743_p13 = scmp.ne.s32.totalorder %s13333_s19, %s11742_s25  ;;  %p11749_p5 = scmp.lt.u32.totalorder %s11742_s25, %s13333_s19 }
 0x11d   : > { %p11745_p1 = pnand %p11743_p13, %p12437_p0 }
 0x11f   : > { %p11746_p6 = pneg %p11745_p1 }
 0x121   : > { %p11751_p9 = pnand %p11749_p5, %p11746_p6 }
 0x123   : > { %11754 = shalt.err (!%p11751_p9)
}
 0x124   : > { %s11755_s23 = scalar_lea.vmem %s784_s5, 128  ;;  %p11763_p4 = scmp.lt.s32.totalorder %s784_s5, %s784_s5 }
 0x125   : > { %p11756_p10 = scmp.ne.s32.totalorder %s784_s5, %s11755_s23  ;;  %p11764_p7 = scmp.lt.s32.totalorder %s11755_s23, %s11755_s23 }
 0x127   : > { %p11758_p2 = pnand %p11756_p10, %p12437_p0  ;;  %p11765_p8 = por %p11764_p7, %p11763_p4 }
 0x129   : > { %p11759_p3 = pneg %p11758_p2 }
 0x12b   : > { %p11766_p11 = pnand %p11765_p8, %p11759_p3 }
 0x12d   : > { %11769 = shalt.err (!%p11766_p11)
}
 0x12e   : > { %10102 = dma.hbm_to_vmem [thread:$0]  (!%p12421_p12), %s13333_s19, 128, %s784_s5, [#allocation31]  }
 0x12f   : > { %s12225_s28 = smov [#allocation33]   ;;  %s12226_s8 = smov [#allocation3]  }
 0x130   : > { %s805_s3 = sshll.u32 %s12225_s28, 4  ;;  %s578_s30 = sshll.u32 %s12226_s8, 4  ;;  %s806_s3 = int_to_ptr.vmem [resolvable:$true] %s805_s3  ;;  %s579_s30 = int_to_ptr.vmem [resolvable:$true] %s578_s30 }
 0x131   : > { %s11770_s26 = scalar_lea.hbm %s13258_s21, 128 }
 0x132   : > { %p11771_p13 = scmp.ne.s32.totalorder %s13258_s21, %s11770_s26  ;;  %p11777_p5 = scmp.lt.u32.totalorder %s11770_s26, %s13258_s21 }
 0x134   : > { %p11773_p1 = pnand %p11771_p13, %p12437_p0 }
 0x136   : > { %p11774_p6 = pneg %p11773_p1 }
 0x138   : > { %p11779_p9 = pnand %p11777_p5, %p11774_p6 }
 0x13a   : > { %11782 = shalt.err (!%p11779_p9)
}
 0x13b   : > { %s11783_s5 = scalar_lea.vmem %s806_s3, 128  ;;  %p11791_p4 = scmp.lt.s32.totalorder %s806_s3, %s806_s3 }
 0x13c   : > { %p11784_p10 = scmp.ne.s32.totalorder %s806_s3, %s11783_s5  ;;  %p11792_p7 = scmp.lt.s32.totalorder %s11783_s5, %s11783_s5 }
 0x13e   : > { %p11786_p2 = pnand %p11784_p10, %p12437_p0  ;;  %p11793_p8 = por %p11792_p7, %p11791_p4 }
 0x140   : > { %p11787_p3 = pneg %p11786_p2 }
 0x142   : > { %p11794_p11 = pnand %p11793_p8, %p11787_p3 }
 0x144   : > { %11797 = shalt.err (!%p11794_p11)
}
 0x145   : > { %10108 = dma.hbm_to_vmem [thread:$0]  (!%p12421_p12), %s13258_s21, 128, %s806_s3, [#allocation34]  }
 0x146   : > { %s13334_s0 = sld [smem:[#allocation60_spill]] }
 0x14c   : > { %s11798_s26 = scalar_lea.hbm %s13334_s0, 4096 }
 0x14d   : > { %p11799_p13 = scmp.ne.s32.totalorder %s13334_s0, %s11798_s26  ;;  %p11805_p5 = scmp.lt.u32.totalorder %s11798_s26, %s13334_s0 }
 0x14f   : > { %p11801_p1 = pnand %p11799_p13, %p12437_p0 }
 0x151   : > { %p11802_p6 = pneg %p11801_p1 }
 0x153   : > { %p11807_p9 = pnand %p11805_p5, %p11802_p6 }
 0x155   : > { %11810 = shalt.err (!%p11807_p9)
}
 0x156   : > { %s11811_s5 = scalar_lea.vmem %s579_s30, 4096  ;;  %p11819_p4 = scmp.lt.s32.totalorder %s579_s30, %s579_s30 }
 0x157   : > { %p11812_p10 = scmp.ne.s32.totalorder %s579_s30, %s11811_s5  ;;  %p11820_p7 = scmp.lt.s32.totalorder %s11811_s5, %s11811_s5 }
 0x159   : > { %p11814_p2 = pnand %p11812_p10, %p12437_p0  ;;  %p11821_p8 = por %p11820_p7, %p11819_p4 }
 0x15b   : > { %p11815_p3 = pneg %p11814_p2 }
 0x15d   : > { %p11822_p11 = pnand %p11821_p8, %p11815_p3 }
 0x15f   : > { %11825 = shalt.err (!%p11822_p11)
}
 0x160   : > { %s12227_s3 = smov 64   ;;  %s12228_s4 = smov 4  }
 0x161   : > { %10051 = dma.hbm_to_vmem [thread:$0]  (!%p12421_p12), %s13334_s0, 4096, %s579_s30, [#allocation4], %s12227_s3, %s12227_s3, %s12228_s4  }
 0x162   : > { %s12229_s25 = smov [#allocation8]   ;;  %s12230_s2 = smov [#allocation11]  }
 0x163   : > { %s603_s26 = sshll.u32 %s12229_s25, 4  ;;  %s627_s15 = sshll.u32 %s12230_s2, 4  ;;  %s604_s26 = int_to_ptr.vmem [resolvable:$true] %s603_s26  ;;  %s628_s15 = int_to_ptr.vmem [resolvable:$true] %s627_s15 }
 0x164   : > { %s13335_s5 = sld [smem:[#allocation62_spill]] }
 0x16a   : > { %s11826_s10 = scalar_lea.hbm %s13335_s5, 16 }
 0x16b   : > { %p11827_p13 = scmp.ne.s32.totalorder %s13335_s5, %s11826_s10  ;;  %p11833_p5 = scmp.lt.u32.totalorder %s11826_s10, %s13335_s5 }
 0x16d   : > { %p11829_p1 = pnand %p11827_p13, %p12437_p0 }
 0x16f   : > { %p11830_p6 = pneg %p11829_p1 }
 0x171   : > { %p11835_p9 = pnand %p11833_p5, %p11830_p6 }
 0x173   : > { %11838 = shalt.err (!%p11835_p9)
}
 0x174   : > { %s11839_s30 = scalar_lea.vmem %s604_s26, 16  ;;  %s11846_s3 = scalar_lea.vmem %s604_s26, 32 }
 0x175   : > { %p11840_p10 = scmp.ne.s32.totalorder %s604_s26, %s11839_s30  ;;  %p11847_p4 = scmp.lt.s32.totalorder %s604_s26, %s604_s26 }
 0x176   : > { %p11848_p7 = scmp.lt.s32.totalorder %s11846_s3, %s11839_s30 }
 0x177   : > { %p11842_p2 = pnand %p11840_p10, %p12437_p0 }
 0x178   : > { %p11849_p8 = por %p11848_p7, %p11847_p4 }
 0x179   : > { %p11843_p3 = pneg %p11842_p2 }
 0x17b   : > { %p11850_p11 = pnand %p11849_p8, %p11843_p3 }
 0x17d   : > { %11853 = shalt.err (!%p11850_p11)
}
 0x17e   : > { %10057 = dma.hbm_to_vmem [thread:$0]  (!%p12421_p12), %s13335_s5, 16, %s604_s26, [#allocation7]  }
 0x17f   : > { %s13336_s19 = sld [smem:[#allocation64_spill]] }
 0x185   : > { %s11854_s4 = scalar_lea.hbm %s13336_s19, 32 }
 0x186   : > { %p11855_p13 = scmp.ne.s32.totalorder %s13336_s19, %s11854_s4  ;;  %p11861_p5 = scmp.lt.u32.totalorder %s11854_s4, %s13336_s19 }
 0x188   : > { %p11857_p1 = pnand %p11855_p13, %p12437_p0 }
 0x18a   : > { %p11858_p6 = pneg %p11857_p1 }
 0x18c   : > { %p11863_p9 = pnand %p11861_p5, %p11858_p6 }
 0x18e   : > { %11866 = shalt.err (!%p11863_p9)
}
 0x18f   : > { %s11867_s23 = scalar_lea.vmem %s628_s15, 32  ;;  %p11875_p4 = scmp.lt.s32.totalorder %s628_s15, %s628_s15 }
 0x190   : > { %p11868_p10 = scmp.ne.s32.totalorder %s628_s15, %s11867_s23  ;;  %p11876_p7 = scmp.lt.s32.totalorder %s11867_s23, %s11867_s23 }
 0x192   : > { %p11870_p2 = pnand %p11868_p10, %p12437_p0  ;;  %p11877_p8 = por %p11876_p7, %p11875_p4 }
 0x194   : > { %p11871_p3 = pneg %p11870_p2 }
 0x196   : > { %p11878_p11 = pnand %p11877_p8, %p11871_p3 }
 0x198   : > { %11881 = shalt.err (!%p11878_p11)
}
 0x199   : > { %10063 = dma.hbm_to_vmem [thread:$0]  (!%p12421_p12), %s13336_s19, 32, %s628_s15, [#allocation10]  }
 0x19a   : > { %s12231_s30 = smov [#allocation14]   ;;  %s13337_s10 = sld [smem:[#allocation66_spill]] }
 0x19b   : > { %s648_s3 = sshll.u32 %s12231_s30, 4  ;;  %s649_s3 = int_to_ptr.vmem [resolvable:$true] %s648_s3 }
 0x1a0   : > { %s11882_s17 = scalar_lea.hbm %s13337_s10, 24576 }
 0x1a1   : > { %p11883_p13 = scmp.ne.s32.totalorder %s13337_s10, %s11882_s17  ;;  %p11889_p5 = scmp.lt.u32.totalorder %s11882_s17, %s13337_s10 }
 0x1a3   : > { %p11885_p1 = pnand %p11883_p13, %p12437_p0 }
 0x1a5   : > { %p11886_p6 = pneg %p11885_p1 }
 0x1a7   : > { %p11891_p9 = pnand %p11889_p5, %p11886_p6 }
 0x1a9   : > { %11894 = shalt.err (!%p11891_p9)
}
 0x1aa   : > { %s11895_s15 = scalar_lea.vmem %s649_s3, 24576  ;;  %p11903_p4 = scmp.lt.s32.totalorder %s649_s3, %s649_s3 }
 0x1ab   : > { %p11896_p10 = scmp.ne.s32.totalorder %s649_s3, %s11895_s15  ;;  %p11904_p7 = scmp.lt.s32.totalorder %s11895_s15, %s11895_s15 }
 0x1ad   : > { %p11898_p2 = pnand %p11896_p10, %p12437_p0  ;;  %p11905_p8 = por %p11904_p7, %p11903_p4 }
 0x1af   : > { %p11899_p3 = pneg %p11898_p2 }
 0x1b1   : > { %p11906_p11 = pnand %p11905_p8, %p11899_p3 }
 0x1b3   : > { %11909 = shalt.err (!%p11906_p11)
}
 0x1b4   : > { %s12232_s2 = smov 256   ;;  %s12233_s23 = smov 16  }
 0x1b5   : > { %10069 = dma.hbm_to_vmem [thread:$0]  (!%p12421_p12), %s13337_s10, 24576, %s649_s3, [#allocation13], %s12232_s2, %s12232_s2, %s12233_s23  }
 0x1b6   : > { %s12234_s30 = smov [#allocation17]   ;;  %s12235_s14 = smov [#allocation20]  }
 0x1b7   : > { %s673_s12 = sshll.u32 %s12234_s30, 4  ;;  %s697_s17 = sshll.u32 %s12235_s14, 4  ;;  %s674_s12 = int_to_ptr.vmem [resolvable:$true] %s673_s12  ;;  %s12705_s17 = int_to_ptr.vmem [resolvable:$true] %s697_s17 }
 0x1b8   : > { %s11910_s8 = scalar_lea.hbm %s13246_s9, 64 }
 0x1b9   : > { %p11911_p13 = scmp.ne.s32.totalorder %s13246_s9, %s11910_s8  ;;  %p11917_p5 = scmp.lt.u32.totalorder %s11910_s8, %s13246_s9 }
 0x1bb   : > { %p11913_p1 = pnand %p11911_p13, %p12437_p0 }
 0x1bd   : > { %p11914_p6 = pneg %p11913_p1 }
 0x1bf   : > { %p11919_p9 = pnand %p11917_p5, %p11914_p6 }
 0x1c1   : > { %11922 = shalt.err (!%p11919_p9)
}
 0x1c2   : > { %s11923_s7 = scalar_lea.vmem %s674_s12, 64  ;;  %p11931_p4 = scmp.lt.s32.totalorder %s674_s12, %s674_s12 }
 0x1c3   : > { %p11924_p10 = scmp.ne.s32.totalorder %s674_s12, %s11923_s7  ;;  %p11932_p7 = scmp.lt.s32.totalorder %s11923_s7, %s11923_s7 }
 0x1c5   : > { %p11926_p2 = pnand %p11924_p10, %p12437_p0  ;;  %p11933_p8 = por %p11932_p7, %p11931_p4 }
 0x1c7   : > { %p11927_p3 = pneg %p11926_p2 }
 0x1c9   : > { %p11934_p11 = pnand %p11933_p8, %p11927_p3 }
 0x1cb   : > { %11937 = shalt.err (!%p11934_p11)
}
 0x1cc   : > { %10075 = dma.hbm_to_vmem [thread:$0]  (!%p12421_p12), %s13246_s9, 64, %s674_s12, [#allocation16]  }
 0x1cd   : > { %s11938_s8 = scalar_lea.hbm %s13248_s11, 32 }
 0x1ce   : > { %p11939_p13 = scmp.ne.s32.totalorder %s13248_s11, %s11938_s8  ;;  %p11945_p5 = scmp.lt.u32.totalorder %s11938_s8, %s13248_s11 }
 0x1d0   : > { %p11941_p1 = pnand %p11939_p13, %p12437_p0 }
 0x1d2   : > { %p11942_p6 = pneg %p11941_p1 }
 0x1d4   : > { %p11947_p9 = pnand %p11945_p5, %p11942_p6 }
 0x1d6   : > { %11950 = shalt.err (!%p11947_p9)
}
 0x1d7   : > { %s11951_s12 = scalar_lea.vmem %s12705_s17, 32  ;;  %p11959_p4 = scmp.lt.s32.totalorder %s12705_s17, %s12705_s17 }
 0x1d8   : > { %p11952_p10 = scmp.ne.s32.totalorder %s12705_s17, %s11951_s12  ;;  %p11960_p7 = scmp.lt.s32.totalorder %s11951_s12, %s11951_s12 }
 0x1da   : > { %p11954_p2 = pnand %p11952_p10, %p12437_p0  ;;  %p11961_p8 = por %p11960_p7, %p11959_p4 }
 0x1dc   : > { %p11955_p3 = pneg %p11954_p2 }
 0x1de   : > { %p11962_p11 = pnand %p11961_p8, %p11955_p3 }
 0x1e0   : > { %11965 = shalt.err (!%p11962_p11)
}
 0x1e1   : > { %10081 = dma.hbm_to_vmem [thread:$0]  (!%p12421_p12), %s13248_s11, 32, %s12705_s17, [#allocation19]  }
 0x1e2   : > { %s12236_s14 = smov [#allocation23]   ;;  %s12237_s28 = smov [#allocation26]  }
 0x1e3   : > { %s718_s4 = sshll.u32 %s12236_s14, 4  ;;  %s746_s8 = sshll.u32 %s12237_s28, 4  ;;  %s719_s4 = int_to_ptr.vmem [resolvable:$true] %s718_s4  ;;  %s12748_s8 = int_to_ptr.vmem [resolvable:$true] %s746_s8 }
 0x1e4   : > { %s11966_s26 = scalar_lea.hbm %s13250_s13, 8192 }
 0x1e5   : > { %p11967_p13 = scmp.ne.s32.totalorder %s13250_s13, %s11966_s26  ;;  %p11973_p5 = scmp.lt.u32.totalorder %s11966_s26, %s13250_s13 }
 0x1e7   : > { %p11969_p1 = pnand %p11967_p13, %p12437_p0 }
 0x1e9   : > { %p11970_p6 = pneg %p11969_p1 }
 0x1eb   : > { %p11975_p9 = pnand %p11973_p5, %p11970_p6 }
 0x1ed   : > { %11978 = shalt.err (!%p11975_p9)
}
 0x1ee   : > { %s11979_s30 = scalar_lea.vmem %s719_s4, 8192  ;;  %p11987_p4 = scmp.lt.s32.totalorder %s719_s4, %s719_s4 }
 0x1ef   : > { %p11980_p10 = scmp.ne.s32.totalorder %s719_s4, %s11979_s30  ;;  %p11988_p7 = scmp.lt.s32.totalorder %s11979_s30, %s11979_s30 }
 0x1f1   : > { %p11982_p2 = pnand %p11980_p10, %p12437_p0  ;;  %p11989_p8 = por %p11988_p7, %p11987_p4 }
 0x1f3   : > { %p11983_p3 = pneg %p11982_p2 }
 0x1f5   : > { %p11990_p11 = pnand %p11989_p8, %p11983_p3 }
 0x1f7   : > { %11993 = shalt.err (!%p11990_p11)
}
 0x1f8   : > { %10087 = dma.hbm_to_vmem [thread:$0]  (!%p12421_p12), %s13250_s13, 8192, %s719_s4, [#allocation22], %s12232_s2, %s12232_s2, %s12233_s23  }
 0x1f9   : > { %s11994_s26 = scalar_lea.hbm %s13253_s16, 16 }
 0x1fa   : > { %p11995_p13 = scmp.ne.s32.totalorder %s13253_s16, %s11994_s26  ;;  %p12001_p5 = scmp.lt.u32.totalorder %s11994_s26, %s13253_s16 }
 0x1fc   : > { %p11997_p1 = pnand %p11995_p13, %p12437_p0 }
 0x1fe   : > { %p11998_p6 = pneg %p11997_p1 }
 0x200   : > { %p12003_p9 = pnand %p12001_p5, %p11998_p6 }
 0x202   : > { %12006 = shalt.err (!%p12003_p9)
}
 0x203   : > { %s12007_s2 = scalar_lea.vmem %s12748_s8, 16  ;;  %s12014_s23 = scalar_lea.vmem %s12748_s8, 32 }
 0x204   : > { %p12008_p10 = scmp.ne.s32.totalorder %s12748_s8, %s12007_s2  ;;  %p12015_p4 = scmp.lt.s32.totalorder %s12748_s8, %s12748_s8 }
 0x205   : > { %p12016_p7 = scmp.lt.s32.totalorder %s12014_s23, %s12007_s2 }
 0x206   : > { %p12010_p2 = pnand %p12008_p10, %p12437_p0 }
 0x207   : > { %p12017_p8 = por %p12016_p7, %p12015_p4 }
 0x208   : > { %p12011_p3 = pneg %p12010_p2 }
 0x20a   : > { %p12018_p11 = pnand %p12017_p8, %p12011_p3 }
 0x20c   : > { %12021 = shalt.err (!%p12018_p11)
}
 0x20d   : > { %10093 = dma.hbm_to_vmem [thread:$0]  (!%p12421_p12), %s13253_s16, 16, %s12748_s8, [#allocation25]  }
 0x20e   : > { %s12238_s14 = smov [#allocation29]   ;;  %s12239_s25 = smov [#allocation32]  }
 0x20f   : > { %s769_s28 = sshll.u32 %s12238_s14, 4  ;;  %s794_s15 = sshll.u32 %s12239_s25, 4  ;;  %s770_s28 = int_to_ptr.vmem [resolvable:$true] %s769_s28  ;;  %s12795_s15 = int_to_ptr.vmem [resolvable:$true] %s794_s15 }
 0x210   : > { %s12022_s12 = scalar_lea.hbm %s13255_s18, 256 }
 0x211   : > { %p12023_p13 = scmp.ne.s32.totalorder %s13255_s18, %s12022_s12  ;;  %p12029_p5 = scmp.lt.u32.totalorder %s12022_s12, %s13255_s18 }
 0x213   : > { %p12025_p1 = pnand %p12023_p13, %p12437_p0 }
 0x215   : > { %p12026_p6 = pneg %p12025_p1 }
 0x217   : > { %p12031_p9 = pnand %p12029_p5, %p12026_p6 }
 0x219   : > { %12034 = shalt.err (!%p12031_p9)
}
 0x21a   : > { %s12035_s23 = scalar_lea.vmem %s770_s28, 256  ;;  %p12043_p4 = scmp.lt.s32.totalorder %s770_s28, %s770_s28 }
 0x21b   : > { %p12036_p10 = scmp.ne.s32.totalorder %s770_s28, %s12035_s23  ;;  %p12044_p7 = scmp.lt.s32.totalorder %s12035_s23, %s12035_s23 }
 0x21d   : > { %p12038_p2 = pnand %p12036_p10, %p12437_p0  ;;  %p12045_p8 = por %p12044_p7, %p12043_p4 }
 0x21f   : > { %p12039_p3 = pneg %p12038_p2 }
 0x221   : > { %p12046_p11 = pnand %p12045_p8, %p12039_p3 }
 0x223   : > { %12049 = shalt.err (!%p12046_p11)
}
 0x224   : > { %10099 = dma.hbm_to_vmem [thread:$0]  (!%p12421_p12), %s13255_s18, 256, %s770_s28, [#allocation28], %s13329_s24, %s13329_s24, %s13328_s29  }
 0x225   : > { %s12050_s26 = scalar_lea.hbm %s13257_s20, 128 }
 0x226   : > { %p12051_p13 = scmp.ne.s32.totalorder %s13257_s20, %s12050_s26  ;;  %p12057_p5 = scmp.lt.u32.totalorder %s12050_s26, %s13257_s20 }
 0x228   : > { %p12053_p1 = pnand %p12051_p13, %p12437_p0 }
 0x22a   : > { %p12054_p6 = pneg %p12053_p1 }
 0x22c   : > { %p12059_p9 = pnand %p12057_p5, %p12054_p6 }
 0x22e   : > { %12062 = shalt.err (!%p12059_p9)
}
 0x22f   : > { %s12063_s29 = scalar_lea.vmem %s12795_s15, 128  ;;  %p12071_p4 = scmp.lt.s32.totalorder %s12795_s15, %s12795_s15 }
 0x230   : > { %p12064_p10 = scmp.ne.s32.totalorder %s12795_s15, %s12063_s29  ;;  %p12072_p7 = scmp.lt.s32.totalorder %s12063_s29, %s12063_s29 }
 0x232   : > { %p12066_p2 = pnand %p12064_p10, %p12437_p0  ;;  %p12073_p8 = por %p12072_p7, %p12071_p4 }
 0x234   : > { %p12067_p3 = pneg %p12066_p2 }
 0x236   : > { %p12074_p11 = pnand %p12073_p8, %p12067_p3 }
 0x238   : > { %12077 = shalt.err (!%p12074_p11)
}
 0x239   : > { %10105 = dma.hbm_to_vmem [thread:$0]  (!%p12421_p12), %s13257_s20, 128, %s12795_s15, [#allocation31]  }
 0x23a   : > { %s12240_s2 = smov [#allocation35]   ;;  %s12078_s30 = scalar_lea.hbm %s13259_s22, 128 }
 0x23b   : > { %s816_s8 = sshll.u32 %s12240_s2, 4  ;;  %p12079_p13 = scmp.ne.s32.totalorder %s13259_s22, %s12078_s30  ;;  %s817_s8 = int_to_ptr.vmem [resolvable:$true] %s816_s8 }
 0x23c   : > { %p12085_p5 = scmp.lt.u32.totalorder %s12078_s30, %s13259_s22 }
 0x23d   : > { %p12081_p1 = pnand %p12079_p13, %p12437_p0 }
 0x23f   : > { %p12082_p6 = pneg %p12081_p1 }
 0x241   : > { %p12087_p9 = pnand %p12085_p5, %p12082_p6 }
 0x243   : > { %12090 = shalt.err (!%p12087_p9)
}
 0x244   : > { %s12091_s15 = scalar_lea.vmem %s817_s8, 128  ;;  %p12099_p4 = scmp.lt.s32.totalorder %s817_s8, %s817_s8 }
 0x245   : > { %p12092_p10 = scmp.ne.s32.totalorder %s817_s8, %s12091_s15  ;;  %p12100_p7 = scmp.lt.s32.totalorder %s12091_s15, %s12091_s15 }
 0x247   : > { %p12094_p2 = pnand %p12092_p10, %p12437_p0  ;;  %p12101_p8 = por %p12100_p7, %p12099_p4 }
 0x249   : > { %p12095_p3 = pneg %p12094_p2 }
 0x24b   : > { %p12102_p11 = pnand %p12101_p8, %p12095_p3 }
 0x24d   : > { %12105 = shalt.err (!%p12102_p11)
}
 0x24e   : > { %10111 = dma.hbm_to_vmem [thread:$0]  (!%p12421_p12), %s13259_s22, 128, %s817_s8, [#allocation34]  }
 0x24f   : > { %s13338_s17 = sld [smem:[#allocation58_spill]] }
 0x255   : > { %p13339_p13 = scmp.ne.s32.totalorder %s13338_s17, 0 }
 0x256   : > { %s13340_s29 = sld [smem:[#allocation53_spill]] (!%p13339_p13) }
 0x257   : > { %837 = sbr.rel (%p13339_p13) target bundleno = 3903 (0xf3f), region = 112 }
 0x25c   : > { %p13341_p1 = scmp.eq.s32.totalorder (!%p13339_p13), %s13340_s29, 0 }
 0x25e   : > { %12151 = dma.done.wait (%p13341_p1), [#allocation4], 4096   ;;  %p13342_p0 = pmov %p13341_p1 }
 0x260   : > { %12153 = vsyncadd (%p13342_p0), [#allocation4], 4294963200  ;;  %p13343_p6 = pmov %p13342_p0 }
 0x261   : > { %p13344_p5 = pmov %p13342_p0 }
 0x262   : > { %12155 = dma.done.wait (%p13343_p6), [#allocation7], 32  }
 0x263   : > { %12157 = vsyncadd (%p13344_p5), [#allocation7], 4294967264  ;;  %p13345_p9 = pmov %p13342_p0 }
 0x264   : > { %p13346_p12 = pmov %p13342_p0 }
 0x265   : > { %12159 = dma.done.wait (%p13345_p9), [#allocation10], 6176  }
 0x266   : > { %12161 = vsyncadd (%p13346_p12), [#allocation10], 4294961120  ;;  %p13347_p10 = pmov %p13342_p0 }
 0x267   : > { %p13348_p2 = pmov %p13342_p0 }
 0x268   : > { %12163 = dma.done.wait (%p13347_p10), [#allocation13], 24608  }
 0x269   : > { %12165 = vsyncadd (%p13348_p2), [#allocation13], 4294942688  ;;  %p13349_p3 = pmov %p13342_p0 }
 0x26a   : > { %p13350_p4 = pmov %p13342_p0 }
 0x26b   : > { %12167 = dma.done.wait (%p13349_p3), [#allocation16], 128  }
 0x26c   : > { %12169 = vsyncadd (%p13350_p4), [#allocation16], 4294967168  ;;  %p13351_p7 = pmov %p13342_p0 }
 0x26d   : > { %p13352_p8 = pmov %p13342_p0 }
 0x26e   : > { %12171 = dma.done.wait (%p13351_p7), [#allocation19], 65568  }
 0x26f   : > { %12173 = vsyncadd (%p13352_p8), [#allocation19], 4294901728  ;;  %p13353_p11 = pmov %p13342_p0 }
 0x270   : > { %p13354_p13 = pmov %p13342_p0 }
 0x271   : > { %12175 = dma.done.wait (%p13353_p11), [#allocation22], 8224  }
 0x272   : > { %12177 = vsyncadd (%p13354_p13), [#allocation22], 4294959072  ;;  %p13355_p1 = pmov %p13342_p0 }
 0x274   : > { %12179 = dma.done.wait (%p13355_p1), [#allocation25], 80  }
 0x275   : > { %12181 = vsyncadd (%p13342_p0), [#allocation25], 4294967216  ;;  %p13356_p6 = pmov %p13342_p0 }
 0x276   : > { %p13357_p5 = pmov %p13342_p0 }
 0x277   : > { %12183 = dma.done.wait (%p13356_p6), [#allocation28], 512  }
 0x278   : > { %12185 = vsyncadd (%p13357_p5), [#allocation28], 4294966784  ;;  %p13358_p9 = pmov %p13342_p0 }
 0x279   : > { %p13359_p12 = pmov %p13342_p0 }
 0x27a   : > { %12187 = dma.done.wait (%p13358_p9), [#allocation31], 256  }
 0x27b   : > { %12189 = vsyncadd (%p13359_p12), [#allocation31], 4294967040  ;;  %p13360_p10 = pmov %p13342_p0 }
 0x27c   : > { %p13361_p2 = pmov %p13342_p0 }
 0x27d   : > { %12191 = dma.done.wait (%p13360_p10), [#allocation34], 256  }
 0x27e   : > { %12193 = vsyncadd (%p13361_p2), [#allocation34], 4294967040  ;;  %v10220_v0 = vld [vmem:[#allocation3 + $0x40] sm:$0xff]   ;;  %v10224_v4 = vld [vmem:[#allocation3 + $0x48] sm:$0xff]   ;;  %p980_p3 = scmp.lt.s32.totalorder %s13340_s29, 1  ;;  %s13362_s2 = sld [smem:[#allocation59_spill]] }
 0x27f   : > { %v10221_v1 = vld [vmem:[#allocation3 + $0xc0] sm:$0xff]   ;;  %9758 = vmatprep.subr.bf16.mxu0 %v10220_v0  ;;  %v10225_v5 = vld [vmem:[#allocation3 + $0xc8] sm:$0xff]   ;;  %v10228_v8 = vld [vmem:[#allocation3 + $0x50] sm:$0xff]   ;;  %vm1370_vm0 = vcmask 130048   ;;  %vm2101_vm1 = vcmask 64512   ;;  %s13363_s30 = sld [smem:[#allocation71_spill]] }
 0x280   : > { %v10222_v2 = vld [vmem:[#allocation3] sm:$0xff]   ;;  %9780 = vmatprep.subr.bf16.mxu1 %v10221_v1  ;;  %v10226_v6 = vld [vmem:[#allocation3 + $0x8] sm:$0xff]   ;;  %v10229_v9 = vld [vmem:[#allocation3 + $0xd0] sm:$0xff]   ;;  %s981_s6 = scalar_select %p980_p3, %s13340_s29, 1  ;;  %vm8540_vm2 = vcmask 270336  }
 0x281   : > { %v10223_v3 = vld [vmem:[#allocation3 + $0x80] sm:$0xff]   ;;  %9759 = vmatpush3.bf16.msra.mxu0 %v10222_v2  ;;  %v10227_v7 = vld [vmem:[#allocation3 + $0x88] sm:$0xff]   ;;  %v10230_v10 = vld [vmem:[#allocation3 + $0x10] sm:$0xff]   ;;  %s13365_s4 = sld [smem:[#allocation50_spill]]  ;;  %s9754_s26 = sshll.u32 %s13340_s29, 4 }
 0x282   : > { %9781 = vmatpush3.bf16.msra.mxu1 %v10223_v3  ;;  %9760 = vmatprep.subr.bf16.mxu0 %v10224_v4  ;;  %v10231_v11 = vld [vmem:[#allocation3 + $0x90] sm:$0xff]   ;;  %v10232_v12 = vld [vmem:[#allocation3 + $0x58] sm:$0xff]   ;;  %v10236_v16 = vld [vmem:[#allocation3 + $0x60] sm:$0xff]   ;;  %s9757_s1 = sshll.u32 %s981_s6, 5  ;;  %s13367_s17 = sld [smem:[#allocation74_spill]] }
 0x283   : > { %9782 = vmatprep.subr.bf16.mxu1 %v10225_v5  ;;  %v10233_v13 = vld [vmem:[#allocation3 + $0xd8] sm:$0xff]   ;;  %v10237_v17 = vld [vmem:[#allocation3 + $0xe0] sm:$0xff]   ;;  %v10240_v20 = vld [vmem:[#allocation3 + $0x68] sm:$0xff]   ;;  %s12243_s29 = smov [#allocation36]  }
 0x284   : > { %v10234_v14 = vld [vmem:[#allocation3 + $0x18] sm:$0xff]   ;;  %v10238_v18 = vld [vmem:[#allocation3 + $0x20] sm:$0xff]   ;;  %v10241_v21 = vld [vmem:[#allocation3 + $0xe8] sm:$0xff]   ;;  %s984_s8 = scalar_lea.vmem %s13362_s2, %s9757_s1  ;;  %s12110_s28 = sshll.u32 %s12243_s29, 4  ;;  %s12111_s28 = int_to_ptr.vmem [resolvable:$false] %s12110_s28 }
 0x285   : > { %9761 = vmatpush3.bf16.msra.mxu0 %v10226_v6  ;;  %v10235_v15 = vld [vmem:[#allocation3 + $0x98] sm:$0xff]   ;;  %v10239_v19 = vld [vmem:[#allocation3 + $0xa0] sm:$0xff]   ;;  %v10242_v22 = vld [vmem:[#allocation3 + $0x28] sm:$0xff]   ;;  %s13364_s14 = smov %s13363_s30  ;;  %s12112_s2 = scalar_lea.vmem %s12111_s28, 32 }
 0x286   : > { %9783 = vmatpush3.bf16.msra.mxu1 %v10227_v7  ;;  %9762 = vmatprep.subr.bf16.mxu0 %v10228_v8  ;;  %v10243_v23 = vld [vmem:[#allocation3 + $0xa8] sm:$0xff]   ;;  %v10244_v24 = vld [vmem:[#allocation3 + $0x70] sm:$0xff]   ;;  %v10248_v28 = vld [vmem:[#allocation3 + $0x78] sm:$0xff]  }
 0x287   : > { %9784 = vmatprep.subr.bf16.mxu1 %v10229_v9  ;;  %v10245_v25 = vld [vmem:[#allocation3 + $0xf0] sm:$0xff]   ;;  %v10249_v29 = vld [vmem:[#allocation3 + $0xf8] sm:$0xff]   ;;  %v10258_v37 = vld [vmem:[#allocation9] ss:$8 sps:$4 sm:$0xff]   ;;  %s978_s25 = sand.u32 1, %s13365_s4  }
 0x288   : > { %v10246_v26 = vld [vmem:[#allocation3 + $0x30] sm:$0xff]   ;;  %v10250_v30 = vld [vmem:[#allocation3 + $0x38] sm:$0xff]   ;;  %v10264_v42 = vld [vmem:[#allocation9 + $0x20] ss:$8 sps:$4 sm:$0xff]   ;;  %s979_s3 = scalar_lea.vmem [#allocation36], %s978_s25  ;;  %s13195_s6 = scalar_lea.hbm %s13367_s17, %s9754_s26 }
 0x289   : > { %9763 = vmatpush3.bf16.msra.mxu0 %v10230_v10  ;;  %v10247_v27 = vld [vmem:[#allocation3 + $0xb0] sm:$0xff]   ;;  %v10251_v31 = vld [vmem:[#allocation3 + $0xb8] sm:$0xff]   ;;  %v10270_v46 = vld [vmem:[#allocation9 + $0x40] ss:$8 sps:$4 sm:$0xff]   ;;  %s8555_s15 = sshll.u32 %s979_s3, 4  ;;  %s8543_s1 = scalar_lea.sflag [#allocation5], %s978_s25  ;;  %s13197_s15 = int_to_ptr.vmem [resolvable:$true] %s8555_s15 }
 0x28a   : > { %9785 = vmatpush3.bf16.msra.mxu1 %v10231_v11  ;;  %9764 = vmatprep.subr.bf16.mxu0 %v10232_v12  ;;  %v10252_v32 = vld [vmem:[%s984_s8] ss:$16 sps:$4 sm:$0xff]   ;;  %v10254_v33 = vld [vmem:[%s984_s8 + $0x4] ss:$16 sps:$4 sm:$0xff]   ;;  %v10255_v34 = vld [vmem:[%s984_s8 + $0x8] ss:$16 sps:$4 sm:$0xff]   ;;  %p12113_p13 = scmp.lt.s32.totalorder %s13197_s15, %s12111_s28 }
 0x28b   : > { %9786 = vmatprep.subr.bf16.mxu1 %v10233_v13  ;;  %v10257_v35 = vld [vmem:[%s984_s8 + $0xc] ss:$16 sps:$4 sm:$0xff]   ;;  %1298 = vmatprep.mubr.bf16.mxu0 %v10254_v33  ;;  %v10260_v38 = vld [vmem:[#allocation9 + $0x4] ss:$8 sps:$4 sm:$0xff]   ;;  %v10263_v39 = vld [vmem:[#allocation9 + $0x14] ss:$8 sps:$4 sm:$0xff]  }
 0x28c   : > { %1339 = vmatprep.mubr.bf16.mxu1 %v10257_v35  ;;  %v1368_v36 = vld [vmem:[#allocation27] sm:$0xff]  ;;  %v10266_v41 = vld [vmem:[#allocation9 + $0x24] ss:$8 sps:$4 sm:$0xff]   ;;  %v10276_v50 = vld [vmem:[#allocation9 + $0x60] ss:$8 sps:$4 sm:$0xff]   ;;  %s12106_s24 = scalar_lea.vmem %s13197_s15, 16 }
 0x28d   : > { %9765 = vmatpush3.bf16.msra.mxu0 %v10234_v14  ;;  %v10261_v40 = vld [vmem:[#allocation9 + $0x10] ss:$8 sps:$4 sm:$0xff]   ;;  %v10269_v43 = vld [vmem:[#allocation9 + $0x34] ss:$8 sps:$4 sm:$0xff]   ;;  %v10272_v45 = vld [vmem:[#allocation9 + $0x44] ss:$8 sps:$4 sm:$0xff]   ;;  %p12107_p4 = scmp.ne.s32.totalorder %s13197_s15, %s12106_s24  ;;  %p12114_p1 = scmp.lt.s32.totalorder %s12112_s2, %s12106_s24 }
 0x28e   : > { %9787 = vmatpush3.bf16.msra.mxu1 %v10235_v15  ;;  %9766 = vmatprep.subr.bf16.mxu0 %v10236_v16  ;;  %v10267_v44 = vld [vmem:[#allocation9 + $0x30] ss:$8 sps:$4 sm:$0xff]   ;;  %v10275_v47 = vld [vmem:[#allocation9 + $0x54] ss:$8 sps:$4 sm:$0xff]   ;;  %v10278_v49 = vld [vmem:[#allocation9 + $0x64] ss:$8 sps:$4 sm:$0xff]  }
 0x28f   : > { %9788 = vmatprep.subr.bf16.mxu1 %v10237_v17  ;;  %v10273_v48 = vld [vmem:[#allocation9 + $0x50] ss:$8 sps:$4 sm:$0xff]   ;;  %v10281_v51 = vld [vmem:[#allocation9 + $0x74] ss:$8 sps:$4 sm:$0xff]   ;;  %v10284_v53 = vld [vmem:[#allocation9 + $0x84] ss:$8 sps:$4 sm:$0xff]   ;;  %p12115_p0 = por %p12114_p1, %p12113_p13 }
 0x290   : > { %v10279_v52 = vld [vmem:[#allocation9 + $0x70] ss:$8 sps:$4 sm:$0xff]   ;;  %v10282_v54 = vld [vmem:[#allocation9 + $0x80] ss:$8 sps:$4 sm:$0xff]   ;;  %v10287_v55 = vld [vmem:[#allocation9 + $0x94] ss:$8 sps:$4 sm:$0xff]  }
 0x291   : > { %9767 = vmatpush3.bf16.msra.mxu0 %v10238_v18  ;;  %v10285_v56 = vld [vmem:[#allocation9 + $0x90] ss:$8 sps:$4 sm:$0xff]   ;;  %v10290_v57 = vld [vmem:[#allocation9 + $0xa4] ss:$8 sps:$4 sm:$0xff]   ;;  %v10288_v58 = vld [vmem:[#allocation9 + $0xa0] ss:$8 sps:$4 sm:$0xff]  }
 0x292   : > { %9789 = vmatpush3.bf16.msra.mxu1 %v10239_v19  ;;  %9768 = vmatprep.subr.bf16.mxu0 %v10240_v20  ;;  %v10293_v59 = vld [vmem:[#allocation9 + $0xb4] ss:$8 sps:$4 sm:$0xff]   ;;  %v10291_v60 = vld [vmem:[#allocation9 + $0xb0] ss:$8 sps:$4 sm:$0xff]   ;;  %v10296_v61 = vld [vmem:[#allocation9 + $0xc4] ss:$8 sps:$4 sm:$0xff]  }
 0x293   : > { %9790 = vmatprep.subr.bf16.mxu1 %v10241_v21  ;;  %v10294_v62 = vld [vmem:[#allocation9 + $0xc0] ss:$8 sps:$4 sm:$0xff]   ;;  %v10299_v63 = vld [vmem:[#allocation9 + $0xd4] ss:$8 sps:$4 sm:$0xff]   ;;  %v10297_v0 = vld [vmem:[#allocation9 + $0xd0] ss:$8 sps:$4 sm:$0xff]  }
 0x294   : > { %v10302_v1 = vld [vmem:[#allocation9 + $0xe4] ss:$8 sps:$4 sm:$0xff]   ;;  %v10300_v2 = vld [vmem:[#allocation9 + $0xe0] ss:$8 sps:$4 sm:$0xff]   ;;  %v10305_v3 = vld [vmem:[#allocation9 + $0xf4] ss:$8 sps:$4 sm:$0xff]  }
 0x295   : > { %9769 = vmatpush3.bf16.msra.mxu0 %v10242_v22  ;;  %v10303_v4 = vld [vmem:[#allocation9 + $0xf0] ss:$8 sps:$4 sm:$0xff]   ;;  %v8896_v10 = vld [vmem:[#allocation6] ss:$0 sm:$0xff]  ;;  %v8897_v15 = vld [vmem:[#allocation8] ss:$0 sm:$0xff] }
 0x296   : > { %9791 = vmatpush3.bf16.msra.mxu1 %v10243_v23  ;;  %9770 = vmatprep.subr.bf16.mxu0 %v10244_v24 }
 0x297   : > { %9792 = vmatprep.subr.bf16.mxu1 %v10245_v25 }
 0x299   : > { %9771 = vmatpush3.bf16.msra.mxu0 %v10246_v26 }
 0x29a   : > { %9793 = vmatpush3.bf16.msra.mxu1 %v10247_v27  ;;  %9772 = vmatprep.subr.bf16.mxu0 %v10248_v28  ;;  %v1369_v28 = vld [vmem:[#allocation27 + $0x8] sm:$0xff] }
 0x29b   : > { %9794 = vmatprep.subr.bf16.mxu1 %v10249_v29  ;;  %v1452_v29 = vld [vmem:[#allocation29] sm:$0xff] }
 0x29d   : > { %9773 = vmatpush3.bf16.msra.mxu0 %v10250_v30  ;;  %v1453_v30 = vld [vmem:[#allocation29 + $0x8] sm:$0xff] }
 0x29e   : > { %9795 = vmatpush3.bf16.msra.mxu1 %v10251_v31  ;;  %1826 = vmatprep.subr.bf16.mxu0 %v10260_v38  ;;  %v10308_v31 = vld [vmem:[#allocation9 + $0x104] ss:$8 sps:$4 sm:$0xff]   ;;  %v10309_v38 = vld [vmem:[#allocation9 + $0x110] ss:$8 sps:$4 sm:$0xff]  }
 0x2a0   : > { %1299 = vmatmul.mubr.bf16.vlgmr.msra.gmra.mrb[0].mxu0 %v10252_v32 }
 0x2a1   : > { %1340 = vmatmul.mubr.bf16.vlgmr.msra.gmra.mrb[0].mxu1 %v10255_v34  ;;  %1827 = vmatpush1.bf16.msra.mxu0 %v10258_v37  ;;  %v10306_v34 = vld [vmem:[#allocation9 + $0x100] ss:$8 sps:$4 sm:$0xff]  }
 0x2a2   : > { %9858 = vmatprep.mubr.msk.f32.mxu1 %vm1370_vm0, %v1368_v36  ;;  %1828 = vmatprep.subr.bf16.mxu0 %v10263_v39  ;;  %v10311_v36 = vld [vmem:[#allocation9 + $0x114] ss:$8 sps:$4 sm:$0xff]  }
 0x2a5   : > { %1829 = vmatpush1.bf16.msra.mxu0 %v10261_v40  ;;  %v12241_v40 = vmov 0  }
 0x2a6   : > { %1830 = vmatprep.subr.bf16.mxu0 %v10266_v41  ;;  %v10314_v41 = vld [vmem:[#allocation9 + $0x124] ss:$8 sps:$4 sm:$0xff]  }
 0x2a9   : > { %1831 = vmatpush1.bf16.msra.mxu0 %v10264_v42 }
 0x2aa   : > { %1832 = vmatprep.subr.bf16.mxu0 %v10269_v43  ;;  %v10312_v43 = vld [vmem:[#allocation9 + $0x120] ss:$8 sps:$4 sm:$0xff]  }
 0x2ad   : > { %1833 = vmatpush1.bf16.msra.mxu0 %v10267_v44  ;;  %v10317_v44 = vld [vmem:[#allocation9 + $0x134] ss:$8 sps:$4 sm:$0xff]  }
 0x2ae   : > { %1834 = vmatprep.subr.bf16.mxu0 %v10272_v45  ;;  %v10315_v45 = vld [vmem:[#allocation9 + $0x130] ss:$8 sps:$4 sm:$0xff]  }
 0x2b1   : > { %1835 = vmatpush1.bf16.msra.mxu0 %v10270_v46  ;;  %v10320_v46 = vld [vmem:[#allocation9 + $0x144] ss:$8 sps:$4 sm:$0xff]  }
 0x2b2   : > { %1836 = vmatprep.subr.bf16.mxu0 %v10275_v47  ;;  %v10318_v47 = vld [vmem:[#allocation9 + $0x140] ss:$8 sps:$4 sm:$0xff]  }
 0x2b5   : > { %1837 = vmatpush1.bf16.msra.mxu0 %v10273_v48  ;;  %v10323_v48 = vld [vmem:[#allocation9 + $0x154] ss:$8 sps:$4 sm:$0xff]  }
 0x2b6   : > { %1838 = vmatprep.subr.bf16.mxu0 %v10278_v49  ;;  %v10321_v49 = vld [vmem:[#allocation9 + $0x150] ss:$8 sps:$4 sm:$0xff]  }
 0x2b9   : > { %1839 = vmatpush1.bf16.msra.mxu0 %v10276_v50  ;;  %v10326_v50 = vld [vmem:[#allocation9 + $0x164] ss:$8 sps:$4 sm:$0xff]  }
 0x2ba   : > { %1840 = vmatprep.subr.bf16.mxu0 %v10281_v51  ;;  %v10324_v51 = vld [vmem:[#allocation9 + $0x160] ss:$8 sps:$4 sm:$0xff]  }
 0x2bd   : > { %1841 = vmatpush1.bf16.msra.mxu0 %v10279_v52  ;;  %v10329_v52 = vld [vmem:[#allocation9 + $0x174] ss:$8 sps:$4 sm:$0xff]  }
 0x2be   : > { %1842 = vmatprep.subr.bf16.mxu0 %v10284_v53  ;;  %v10327_v53 = vld [vmem:[#allocation9 + $0x170] ss:$8 sps:$4 sm:$0xff]  }
 0x2c1   : > { %1843 = vmatpush1.bf16.msra.mxu0 %v10282_v54  ;;  %v12242_v54 = vmov 0.0  }
 0x2c2   : > { %1844 = vmatprep.subr.bf16.mxu0 %v10287_v55  ;;  %v1914_v55 = vlaneseq }
 0x2c5   : > { %1845 = vmatpush1.bf16.msra.mxu0 %v10285_v56  ;;  %v12915_v56 = vshrl.u32 %v1914_v55, 7 }
 0x2c6   : > { %1846 = vmatprep.subr.bf16.mxu0 %v10290_v57 }
 0x2c7   : > { %v12918_v57 = vsub.s32 0, %v12915_v56 }
 0x2c9   : > { %1847 = vmatpush1.bf16.msra.mxu0 %v10288_v58  ;;  %v1912_v58 = vld [vmem:[#allocation11] sm:$0x3] }
 0x2ca   : > { %1848 = vmatprep.subr.bf16.mxu0 %v10293_v59  ;;  %v12921_v59 = vsub.s32 1, %v12915_v56 }
 0x2cd   : > { %1849 = vmatpush1.bf16.msra.mxu0 %v10291_v60  ;;  %v1928_v60 = vld [vmem:[#allocation12] sm:$0x3] }
 0x2ce   : > { %1850 = vmatprep.subr.bf16.mxu0 %v10296_v61  ;;  %v1917_v61 = vrot.slane %v1912_v58, %v12918_v57 }
 0x2d1   : > { %1851 = vmatpush1.bf16.msra.mxu0 %v10294_v62  ;;  %v1921_v62 = vrot.slane %v1912_v58, %v12921_v59 }
 0x2d2   : > { %1852 = vmatprep.subr.bf16.mxu0 %v10299_v63  ;;  %v1933_v63 = vrot.slane %v1928_v60, %v12918_v57 }
 0x2d5   : > { %1853 = vmatpush1.bf16.msra.mxu0 %v10297_v0 }
 0x2d6   : > { %1854 = vmatprep.subr.bf16.mxu0 %v10302_v1  ;;  %v1937_v1 = vrot.slane %v1928_v60, %v12921_v59 }
 0x2d9   : > { %1855 = vmatpush1.bf16.msra.mxu0 %v10300_v2 }
 0x2da   : > { %1856 = vmatprep.subr.bf16.mxu0 %v10305_v3 }
 0x2dd   : > { %1857 = vmatpush1.bf16.msra.mxu0 %v10303_v4 }
 0x2de   : > { %1869 = vmatprep.subr.bf16.mxu0 %v10308_v31  ;;  %v10347_v31 = vld [vmem:[#allocation14 + $0xa4] ss:$16 sps:$4 sm:$0xff]  }
 0x373   : > { %v9774_v5 = vpop.f32.mrb[0].mxu0 }
 0x374   : > { %v9796_v6 = vpop.f32.mrb[0].mxu1  ;;  %v9775_v7 = vpop.f32.mrb[1].mxu0 }
 0x375   : > { %v9776_v8 = vadd.f32 %v9775_v7, %v9774_v5  ;;  %v9797_v9 = vpop.f32.mrb[1].mxu1  ;;  %v9777_v11 = vpop.f32.mrb[2].mxu0 }
 0x376   : > { %v9798_v12 = vadd.f32 %v9797_v9, %v9796_v6  ;;  %v9799_v13 = vpop.f32.mrb[2].mxu1  ;;  %v9778_v14 = vpop.f32.mrb[3].mxu0 }
 0x377   : > { %v9779_v16 = vadd.f32 %v9778_v14, %v9777_v11  ;;  %v9800_v17 = vpop.f32.mrb[3].mxu1 }
 0x378   : > { %v1342_v18 = vadd.f32 %v9798_v12, %v9776_v8  ;;  %v9801_v19 = vadd.f32 %v9800_v17, %v9799_v13 }
 0x37a   : > { %v1355_v20 = vmul.f32 %v8896_v10, %v1342_v18  ;;  %v1345_v21 = vadd.f32 %v9801_v19, %v9779_v16  ;;  %v1948_v19 = vld [vmem:[#allocation33] sm:$0xff] }
 0x37c   : > { %v1364_v22 = vadd.f32 %v8897_v15, %v1355_v20  ;;  %v1356_v23 = vmul.f32 %v8896_v10, %v1345_v21  ;;  %v2023_v20 = vld [vmem:[#allocation35] sm:$0xff] }
 0x37d   : > { %v10330_v21 = vld [vmem:[#allocation14] ss:$16 sps:$4 sm:$0xff]  }
 0x37e   : > { %v1365_v24 = vadd.f32 %v8897_v15, %v1356_v23  ;;  %v1366_v25 = vmax.f32 %v1364_v22, 0.0  ;;  %v10332_v22 = vld [vmem:[#allocation14 + $0x4] ss:$16 sps:$4 sm:$0xff]  }
 0x37f   : > { %v10335_v23 = vld [vmem:[#allocation14 + $0x24] ss:$16 sps:$4 sm:$0xff]  }
 0x380   : > { %v1367_v26 = vmax.f32 %v1365_v24, 0.0  ;;  %v10333_v24 = vld [vmem:[#allocation14 + $0x20] ss:$16 sps:$4 sm:$0xff]  }
 0x382   : > { %v9868_v27 = vpack.c.bf16 %v1367_v26, %v1366_v25  ;;  %v10338_v25 = vld [vmem:[#allocation14 + $0x44] ss:$16 sps:$4 sm:$0xff]   ;;  %v10336_v26 = vld [vmem:[#allocation14 + $0x40] ss:$16 sps:$4 sm:$0xff]  }
 0x384   : > { %9869 = vmatprep.subr.bf16.mxu1 %v9868_v27  ;;  %1858 = vmatprep.mubr.bf16.mxu0 %v9868_v27 }
 0x385   : > { %9871 = vmatpush3.bf16.msra.mxu1 %v9868_v27 }
 0x386   : > { %9873 = vmatprep.subr.bf16.mxu1 %v9868_v27 }
 0x388   : > { %9859 = vmatmul.mubr.msk.f32.vlgmr.msra.gmra.mrb[4].mxu1 %vm1370_vm0, %v1369_v28  ;;  %v10339_v28 = vld [vmem:[#allocation14 + $0x60] ss:$16 sps:$4 sm:$0xff]  }
 0x389   : > { %9875 = vmatpush3.bf16.msra.mxu1 %v9868_v27  ;;  %9865 = vmatprep.mubr.msk.f32.mxu1 %vm1370_vm0, %v1452_v29  ;;  %v10341_v27 = vld [vmem:[#allocation14 + $0x64] ss:$16 sps:$4 sm:$0xff]  }
 0x38a   : > { %v10344_v29 = vld [vmem:[#allocation14 + $0x84] ss:$16 sps:$4 sm:$0xff]  }
 0x38c   : > { %9866 = vmatmul.mubr.msk.f32.vlgmr.msra.gmra.mrb[6].mxu1 %vm1370_vm0, %v1453_v30  ;;  %v10342_v30 = vld [vmem:[#allocation14 + $0x80] ss:$16 sps:$4 sm:$0xff]  }
 0x38d   : > { %2016 = vmatprep.mubr.f32.mxu1 %v12242_v54 }
 0x45b   : > { %v9860_v32 = vpop.f32.mrb[4].mxu1 }
 0x45c   : > { %v1443_v33 = vpop.f32.mrb[5].mxu1 }
 0x45d   : > { %v1535_v35 = vpack.c.bf16 %v9860_v32, %v1443_v33  ;;  %v10345_v32 = vld [vmem:[#allocation14 + $0xa0] ss:$16 sps:$4 sm:$0xff]   ;;  %v10350_v33 = vld [vmem:[#allocation14 + $0xc4] ss:$16 sps:$4 sm:$0xff]  }
 0x45f   : > { %1859 = vmatmul.mubr.bf16.vlgmr.msra.gmra.mrb[4].mxu0 %v1535_v35  ;;  %v9867_v37 = vpop.f32.mrb[6].mxu1  ;;  %v10353_v35 = vld [vmem:[#allocation14 + $0xe4] ss:$16 sps:$4 sm:$0xff]  }
 0x460   : > { %1870 = vmatpush1.bf16.msra.mxu0 %v10306_v34  ;;  %v1526_v39 = vpop.f32.mrb[7].mxu1  ;;  %1901 = vmatprep.mubr.bf16.mxu0 %v12241_v40  ;;  %v10348_v34 = vld [vmem:[#allocation14 + $0xc0] ss:$16 sps:$4 sm:$0xff]  }
 0x461   : > { %1871 = vmatprep.subr.bf16.mxu0 %v10311_v36  ;;  %v1537_v42 = vpack.c.bf16 %v9867_v37, %v1526_v39  ;;  %v10351_v36 = vld [vmem:[#allocation14 + $0xe0] ss:$16 sps:$4 sm:$0xff]   ;;  %v10356_v37 = vld [vmem:[#allocation14 + $0x104] ss:$16 sps:$4 sm:$0xff]  }
 0x462   : > { %v10359_v39 = vld [vmem:[#allocation14 + $0x124] ss:$16 sps:$4 sm:$0xff]   ;;  %v10357_v40 = vld [vmem:[#allocation14 + $0x120] ss:$16 sps:$4 sm:$0xff]  }
 0x464   : > { %1872 = vmatpush1.bf16.msra.mxu0 %v10309_v38  ;;  %v10354_v38 = vld [vmem:[#allocation14 + $0x100] ss:$16 sps:$4 sm:$0xff]  }
 0x465   : > { %1873 = vmatprep.subr.bf16.mxu0 %v10314_v41  ;;  %v10362_v41 = vld [vmem:[#allocation14 + $0x144] ss:$16 sps:$4 sm:$0xff]  }
 0x468   : > { %1874 = vmatpush1.bf16.msra.mxu0 %v10312_v43  ;;  %v10365_v43 = vld [vmem:[#allocation14 + $0x164] ss:$16 sps:$4 sm:$0xff]  }
 0x469   : > { %1875 = vmatprep.subr.bf16.mxu0 %v10317_v44  ;;  %v10363_v44 = vld [vmem:[#allocation14 + $0x160] ss:$16 sps:$4 sm:$0xff]  }
 0x46c   : > { %1876 = vmatpush1.bf16.msra.mxu0 %v10315_v45  ;;  %v10368_v45 = vld [vmem:[#allocation14 + $0x184] ss:$16 sps:$4 sm:$0xff]  }
 0x46d   : > { %1877 = vmatprep.subr.bf16.mxu0 %v10320_v46  ;;  %v10366_v46 = vld [vmem:[#allocation14 + $0x180] ss:$16 sps:$4 sm:$0xff]  }
 0x470   : > { %1878 = vmatpush1.bf16.msra.mxu0 %v10318_v47  ;;  %v10371_v47 = vld [vmem:[#allocation14 + $0x1a4] ss:$16 sps:$4 sm:$0xff]  }
 0x471   : > { %1879 = vmatprep.subr.bf16.mxu0 %v10323_v48  ;;  %v10369_v48 = vld [vmem:[#allocation14 + $0x1a0] ss:$16 sps:$4 sm:$0xff]  }
 0x474   : > { %1880 = vmatpush1.bf16.msra.mxu0 %v10321_v49  ;;  %v10374_v49 = vld [vmem:[#allocation14 + $0x1c4] ss:$16 sps:$4 sm:$0xff]  }
 0x475   : > { %1881 = vmatprep.subr.bf16.mxu0 %v10326_v50  ;;  %v10372_v50 = vld [vmem:[#allocation14 + $0x1c0] ss:$16 sps:$4 sm:$0xff]  }
 0x478   : > { %1882 = vmatpush1.bf16.msra.mxu0 %v10324_v51 }
 0x479   : > { %1883 = vmatprep.subr.bf16.mxu0 %v10329_v52 }
 0x47c   : > { %1884 = vmatpush1.bf16.msra.mxu0 %v10327_v53 }
 0x47d   : > { %3409 = vmatprep.subr.bf16.mxu0 %v10332_v22  ;;  %v10399_v22 = vld [vmem:[#allocation14 + $0x2e0] ss:$16 sps:$4 sm:$0xff]  }
 0x47f   : > { %1902 = vmatmul.mubr.bf16.vlgmr.msra.gmra.mrb[4].mxu0 %v1537_v42  ;;  %v10360_v42 = vld [vmem:[#allocation14 + $0x140] ss:$16 sps:$4 sm:$0xff]  }
 0x480   : > { %3410 = vmatpush1.bf16.msra.mxu0 %v10330_v21  ;;  %v10401_v21 = vld [vmem:[#allocation14 + $0x2e4] ss:$16 sps:$4 sm:$0xff]  }
 0x481   : > { %3411 = vmatprep.subr.bf16.mxu0 %v10335_v23  ;;  %v10404_v23 = vld [vmem:[#allocation14 + $0x304] ss:$16 sps:$4 sm:$0xff]  }
 0x484   : > { %3412 = vmatpush1.bf16.msra.mxu0 %v10333_v24  ;;  %v10402_v24 = vld [vmem:[#allocation14 + $0x300] ss:$16 sps:$4 sm:$0xff]  }
 0x485   : > { %3413 = vmatprep.subr.bf16.mxu0 %v10338_v25  ;;  %v10407_v25 = vld [vmem:[#allocation14 + $0x324] ss:$16 sps:$4 sm:$0xff]  }
 0x488   : > { %3414 = vmatpush1.bf16.msra.mxu0 %v10336_v26  ;;  %v10405_v26 = vld [vmem:[#allocation14 + $0x320] ss:$16 sps:$4 sm:$0xff]  }
 0x489   : > { %3415 = vmatprep.subr.bf16.mxu0 %v10341_v27  ;;  %v10410_v27 = vld [vmem:[#allocation14 + $0x344] ss:$16 sps:$4 sm:$0xff]  }
 0x48c   : > { %3416 = vmatpush1.bf16.msra.mxu0 %v10339_v28  ;;  %v10408_v28 = vld [vmem:[#allocation14 + $0x340] ss:$16 sps:$4 sm:$0xff]  }
 0x48d   : > { %3417 = vmatprep.subr.bf16.mxu0 %v10344_v29  ;;  %v10413_v29 = vld [vmem:[#allocation14 + $0x364] ss:$16 sps:$4 sm:$0xff]  }
 0x490   : > { %3418 = vmatpush1.bf16.msra.mxu0 %v10342_v30  ;;  %v10411_v30 = vld [vmem:[#allocation14 + $0x360] ss:$16 sps:$4 sm:$0xff]  }
 0x491   : > { %3419 = vmatprep.subr.bf16.mxu0 %v10347_v31  ;;  %v10416_v31 = vld [vmem:[#allocation14 + $0x384] ss:$16 sps:$4 sm:$0xff]  }
 0x494   : > { %3420 = vmatpush1.bf16.msra.mxu0 %v10345_v32  ;;  %v10414_v32 = vld [vmem:[#allocation14 + $0x380] ss:$16 sps:$4 sm:$0xff]  }
 0x495   : > { %3421 = vmatprep.subr.bf16.mxu0 %v10350_v33  ;;  %v10419_v33 = vld [vmem:[#allocation14 + $0x3a4] ss:$16 sps:$4 sm:$0xff]  }
 0x498   : > { %3422 = vmatpush1.bf16.msra.mxu0 %v10348_v34  ;;  %v10417_v34 = vld [vmem:[#allocation14 + $0x3a0] ss:$16 sps:$4 sm:$0xff]  }
 0x499   : > { %3423 = vmatprep.subr.bf16.mxu0 %v10353_v35  ;;  %v10422_v35 = vld [vmem:[#allocation14 + $0x3c4] ss:$16 sps:$4 sm:$0xff]  }
 0x49c   : > { %3424 = vmatpush1.bf16.msra.mxu0 %v10351_v36  ;;  %v10420_v36 = vld [vmem:[#allocation14 + $0x3c0] ss:$16 sps:$4 sm:$0xff]  }
 0x49d   : > { %3425 = vmatprep.subr.bf16.mxu0 %v10356_v37  ;;  %v10425_v37 = vld [vmem:[#allocation14 + $0x3e4] ss:$16 sps:$4 sm:$0xff]  }
 0x4a0   : > { %3426 = vmatpush1.bf16.msra.mxu0 %v10354_v38  ;;  %v10423_v38 = vld [vmem:[#allocation14 + $0x3e0] ss:$16 sps:$4 sm:$0xff]  }
 0x4a1   : > { %3427 = vmatprep.subr.bf16.mxu0 %v10359_v39  ;;  %v10428_v39 = vld [vmem:[#allocation14 + $0x404] ss:$16 sps:$4 sm:$0xff]  }
 0x4a4   : > { %3428 = vmatpush1.bf16.msra.mxu0 %v10357_v40  ;;  %v10426_v40 = vld [vmem:[#allocation14 + $0x400] ss:$16 sps:$4 sm:$0xff]  }
 0x4a5   : > { %3429 = vmatprep.subr.bf16.mxu0 %v10362_v41 }
 0x4a8   : > { %3430 = vmatpush1.bf16.msra.mxu0 %v10360_v42 }
 0x4a9   : > { %3431 = vmatprep.subr.bf16.mxu0 %v10365_v43  ;;  %v10431_v43 = vld [vmem:[#allocation14 + $0x424] ss:$16 sps:$4 sm:$0xff]  }
 0x4ac   : > { %3432 = vmatpush1.bf16.msra.mxu0 %v10363_v44  ;;  %v10429_v44 = vld [vmem:[#allocation14 + $0x420] ss:$16 sps:$4 sm:$0xff]  }
 0x4ad   : > { %3433 = vmatprep.subr.bf16.mxu0 %v10368_v45  ;;  %v10434_v45 = vld [vmem:[#allocation14 + $0x444] ss:$16 sps:$4 sm:$0xff]  }
 0x4b0   : > { %3434 = vmatpush1.bf16.msra.mxu0 %v10366_v46  ;;  %v10432_v46 = vld [vmem:[#allocation14 + $0x440] ss:$16 sps:$4 sm:$0xff]  }
 0x4b1   : > { %3435 = vmatprep.subr.bf16.mxu0 %v10371_v47  ;;  %v10437_v47 = vld [vmem:[#allocation14 + $0x464] ss:$16 sps:$4 sm:$0xff]  }
 0x4b4   : > { %3436 = vmatpush1.bf16.msra.mxu0 %v10369_v48  ;;  %v10435_v48 = vld [vmem:[#allocation14 + $0x460] ss:$16 sps:$4 sm:$0xff]  }
 0x4b5   : > { %3437 = vmatprep.subr.bf16.mxu0 %v10374_v49  ;;  %v10440_v49 = vld [vmem:[#allocation14 + $0x484] ss:$16 sps:$4 sm:$0xff]  }
 0x4b8   : > { %3438 = vmatpush1.bf16.msra.mxu0 %v10372_v50  ;;  %v10438_v50 = vld [vmem:[#allocation14 + $0x480] ss:$16 sps:$4 sm:$0xff]  }
 0x552   : > { %v1903_v0 = vpop.f32.mrb[4].mxu0 }
 0x553   : > { %v1924_v2 = vmul.f32 %v1917_v61, %v1903_v0  ;;  %v1905_v3 = vpop.f32.mrb[5].mxu0  ;;  %v10375_v0 = vld [vmem:[#allocation14 + $0x1e0] ss:$16 sps:$4 sm:$0xff]  }
 0x554   : > { %v1925_v4 = vmul.f32 %v1921_v62, %v1905_v3  ;;  %v1907_v5 = vpop.f32.mrb[6].mxu0 }
 0x555   : > { %v1940_v6 = vadd.f32 %v1933_v63, %v1924_v2  ;;  %v1926_v7 = vmul.f32 %v1917_v61, %v1907_v5  ;;  %v1909_v8 = vpop.f32.mrb[7].mxu0  ;;  %v2100_v61 = vld [vmem:[#allocation30] sm:$0xff] }
 0x556   : > { %v1941_v9 = vadd.f32 %v1937_v1, %v1925_v4  ;;  %v1927_v10 = vmul.f32 %v1921_v62, %v1909_v8  ;;  %v2176_v62 = vld [vmem:[#allocation32] sm:$0xff] }
 0x557   : > { %v1942_v11 = vadd.f32 %v1933_v63, %v1926_v7  ;;  %v1944_v13 = vmax.f32 %v1940_v6, 0.0  ;;  %v10377_v63 = vld [vmem:[#allocation14 + $0x1e4] ss:$16 sps:$4 sm:$0xff]   ;;  %v10378_v5 = vld [vmem:[#allocation14 + $0x200] ss:$16 sps:$4 sm:$0xff]  }
 0x558   : > { %v1943_v12 = vadd.f32 %v1937_v1, %v1927_v10  ;;  %v1945_v15 = vmax.f32 %v1941_v9, 0.0  ;;  %3439 = vmatprep.subr.bf16.mxu0 %v10377_v63  ;;  %v10380_v1 = vld [vmem:[#allocation14 + $0x204] ss:$16 sps:$4 sm:$0xff]   ;;  %v10381_v10 = vld [vmem:[#allocation14 + $0x220] ss:$16 sps:$4 sm:$0xff]  }
 0x559   : > { %v1946_v14 = vmax.f32 %v1942_v11, 0.0  ;;  %3440 = vmatpush1.bf16.msra.mxu0 %v10375_v0  ;;  %v10383_v7 = vld [vmem:[#allocation14 + $0x224] ss:$16 sps:$4 sm:$0xff]   ;;  %v10453_v0 = vld [vmem:[#allocation14 + $0x520] ss:$16 sps:$4 sm:$0xff]  }
 0x55a   : > { %v1947_v16 = vmax.f32 %v1943_v12, 0.0  ;;  %3450 = vmatprep.subr.bf16.mxu0 %v10380_v1  ;;  %v10386_v11 = vld [vmem:[#allocation14 + $0x244] ss:$16 sps:$4 sm:$0xff]   ;;  %v10384_v12 = vld [vmem:[#allocation14 + $0x240] ss:$16 sps:$4 sm:$0xff]  }
 0x55b   : > { %v9878_v17 = vpack.c.bf16 %v1946_v14, %v1944_v13  ;;  %v10389_v13 = vld [vmem:[#allocation14 + $0x264] ss:$16 sps:$4 sm:$0xff]   ;;  %v10387_v14 = vld [vmem:[#allocation14 + $0x260] ss:$16 sps:$4 sm:$0xff]  }
 0x55c   : > { %v9876_v18 = vpack.c.bf16 %v1947_v16, %v1945_v15  ;;  %v10392_v15 = vld [vmem:[#allocation14 + $0x284] ss:$16 sps:$4 sm:$0xff]   ;;  %v10390_v16 = vld [vmem:[#allocation14 + $0x280] ss:$16 sps:$4 sm:$0xff]  }
 0x55d   : > { %v10455_v63 = vld [vmem:[#allocation14 + $0x524] ss:$16 sps:$4 sm:$0xff]  }
 0x55e   : > { %9877 = vmatprep.subr.bf16.mxu1 %v9876_v18  ;;  %v10458_v1 = vld [vmem:[#allocation14 + $0x544] ss:$16 sps:$4 sm:$0xff]  }
 0x55f   : > { %9879 = vmatpush1.bf16.msra.mxu1 %v9878_v17 }
 0x560   : > { %9881 = vmatprep.subr.bf16.mxu1 %v9876_v18  ;;  %v10393_v18 = vld [vmem:[#allocation14 + $0x2a0] ss:$16 sps:$4 sm:$0xff]  }
 0x562   : > { %8950 = vmatmul.mubr.msk.f32.vlgmr.msra.gmra.mrb[8].mxu1 %vm1370_vm0, %v1948_v19  ;;  %v10398_v19 = vld [vmem:[#allocation14 + $0x2c4] ss:$16 sps:$4 sm:$0xff]  }
 0x563   : > { %9883 = vmatpush1.bf16.msra.mxu1 %v9878_v17  ;;  %2091 = vmatprep.mubr.f32.mxu1 %v12242_v54  ;;  %v10395_v17 = vld [vmem:[#allocation14 + $0x2a4] ss:$16 sps:$4 sm:$0xff]  }
 0x566   : > { %8951 = vmatmul.mubr.msk.f32.vlgmr.msra.gmra.mrb[10].mxu1 %vm1370_vm0, %v2023_v20  ;;  %v10396_v20 = vld [vmem:[#allocation14 + $0x2c0] ss:$16 sps:$4 sm:$0xff]  }
 0x567   : > { %2169 = vmatprep.mubr.f32.mxu1 %v12242_v54 }
 0x635   : > { %v2018_v51 = vpop.f32.mrb[8].mxu1 }
 0x636   : > { %v2020_v52 = vpop.f32.mrb[9].mxu1 }
 0x639   : > { %v2093_v53 = vpop.f32.mrb[10].mxu1 }
 0x63a   : > { %v12931_v55 = vmax.f32 %v2018_v51, %v2093_v53  ;;  %v2095_v58 = vpop.f32.mrb[11].mxu1  ;;  %v10443_v51 = vld [vmem:[#allocation14 + $0x4a4] ss:$16 sps:$4 sm:$0xff]  }
 0x63b   : > { %v2099_v60 = vmax.f32 %v2020_v52, %v2095_v58  ;;  %v10441_v52 = vld [vmem:[#allocation14 + $0x4a0] ss:$16 sps:$4 sm:$0xff]   ;;  %v10446_v53 = vld [vmem:[#allocation14 + $0x4c4] ss:$16 sps:$4 sm:$0xff]  }
 0x63c   : > { %v12955_v42 = vpack.c.bf16 %v12931_v55, %v12931_v55  ;;  %v10449_v58 = vld [vmem:[#allocation14 + $0x4e4] ss:$16 sps:$4 sm:$0xff]  }
 0x63d   : > { %2105 = vmatprep.subr.mxu1 %v2099_v60  ;;  %v12941_v8 = vpack.c.bf16 %v2099_v60, %v2099_v60 }
 0x63e   : > { %2106 = vmatpush1.msra.mxu1 %v12931_v55 }
 0x63f   : > { %8952 = vmatmul.mubr.msk.f32.vlgmr.msra.gmra.mrb[12].mxu1 %vm2101_vm1, %v2100_v61  ;;  %2180 = vmatprep.subr.mxu1 %v2099_v60  ;;  %v10447_v60 = vld [vmem:[#allocation14 + $0x4e0] ss:$16 sps:$4 sm:$0xff]   ;;  %v10452_v61 = vld [vmem:[#allocation14 + $0x504] ss:$16 sps:$4 sm:$0xff]  }
 0x640   : > { %2181 = vmatpush1.msra.mxu1 %v12931_v55  ;;  %2244 = vmatprep.mubr.f32.mxu1 %v12242_v54  ;;  %v10444_v55 = vld [vmem:[#allocation14 + $0x4c0] ss:$16 sps:$4 sm:$0xff]  }
 0x643   : > { %8953 = vmatmul.mubr.msk.f32.vlgmr.msra.gmra.mrb[14].mxu1 %vm2101_vm1, %v2176_v62  ;;  %v10450_v62 = vld [vmem:[#allocation14 + $0x500] ss:$16 sps:$4 sm:$0xff]  }
 0x712   : > { %v2171_v2 = vpop.f32.mrb[12].mxu1 }
 0x713   : > { %v2173_v3 = vpop.f32.mrb[13].mxu1  ;;  %v12938_v6 = vpack.c.bf16 %v2171_v2, %v2171_v2  ;;  %v10456_v2 = vld [vmem:[#allocation14 + $0x540] ss:$16 sps:$4 sm:$0xff]  }
 0x714   : > { %v12936_v4 = vpack.c.bf16 %v2173_v3, %v2173_v3  ;;  %v10461_v3 = vld [vmem:[#allocation14 + $0x564] ss:$16 sps:$4 sm:$0xff]  }
 0x716   : > { %3441 = vmatprep.mubr.bf16.mxu0 %v12936_v4  ;;  %v12943_v54 = vpop.f32.mrb[14].mxu1 }
 0x717   : > { %3442 = vmatmul.mubr.bf16.vlgmr.msra.gmra.mrb[8].mxu0 %v12938_v6  ;;  %v12946_v9 = vpop.f32.mrb[15].mxu1 }
 0x718   : > { %3451 = vmatpush1.bf16.msra.mxu0 %v10378_v5  ;;  %3482 = vmatprep.mubr.bf16.mxu0 %v12941_v8  ;;  %v12951_v41 = vpack.c.bf16 %v12946_v9, %v12946_v9  ;;  %v10459_v5 = vld [vmem:[#allocation14 + $0x560] ss:$16 sps:$4 sm:$0xff]  }
 0x719   : > { %3452 = vmatprep.subr.bf16.mxu0 %v10383_v7  ;;  %v10464_v7 = vld [vmem:[#allocation14 + $0x584] ss:$16 sps:$4 sm:$0xff]   ;;  %v10462_v9 = vld [vmem:[#allocation14 + $0x580] ss:$16 sps:$4 sm:$0xff]  }
 0x71c   : > { %3453 = vmatpush1.bf16.msra.mxu0 %v10381_v10  ;;  %v10467_v10 = vld [vmem:[#allocation14 + $0x5a4] ss:$16 sps:$4 sm:$0xff]  }
 0x71d   : > { %3454 = vmatprep.subr.bf16.mxu0 %v10386_v11  ;;  %v10465_v11 = vld [vmem:[#allocation14 + $0x5a0] ss:$16 sps:$4 sm:$0xff]  }
 0x720   : > { %3455 = vmatpush1.bf16.msra.mxu0 %v10384_v12  ;;  %v10470_v12 = vld [vmem:[#allocation14 + $0x5c4] ss:$16 sps:$4 sm:$0xff]  }
 0x721   : > { %3456 = vmatprep.subr.bf16.mxu0 %v10389_v13  ;;  %v10468_v13 = vld [vmem:[#allocation14 + $0x5c0] ss:$16 sps:$4 sm:$0xff]  }
 0x724   : > { %3457 = vmatpush1.bf16.msra.mxu0 %v10387_v14  ;;  %v10473_v14 = vld [vmem:[#allocation14 + $0x5e4] ss:$16 sps:$4 sm:$0xff]  }
 0x725   : > { %3458 = vmatprep.subr.bf16.mxu0 %v10392_v15  ;;  %v10471_v15 = vld [vmem:[#allocation14 + $0x5e0] ss:$16 sps:$4 sm:$0xff]  }
 0x728   : > { %3459 = vmatpush1.bf16.msra.mxu0 %v10390_v16  ;;  %v10476_v16 = vld [vmem:[#allocation14 + $0xc] ss:$16 sps:$4 sm:$0xff]  }
 0x729   : > { %3460 = vmatprep.subr.bf16.mxu0 %v10395_v17  ;;  %v12961_v17 = vpack.c.bf16 %v12943_v54, %v12943_v54  ;;  %v10488_v54 = vld [vmem:[#allocation14 + $0x8c] ss:$16 sps:$4 sm:$0xff]  }
 0x72c   : > { %3461 = vmatpush1.bf16.msra.mxu0 %v10393_v18  ;;  %v10474_v18 = vld [vmem:[#allocation14 + $0x8] ss:$16 sps:$4 sm:$0xff]  }
 0x72d   : > { %3462 = vmatprep.subr.bf16.mxu0 %v10398_v19  ;;  %v10479_v19 = vld [vmem:[#allocation14 + $0x2c] ss:$16 sps:$4 sm:$0xff]  }
 0x730   : > { %3463 = vmatpush1.bf16.msra.mxu0 %v10396_v20  ;;  %v10477_v20 = vld [vmem:[#allocation14 + $0x28] ss:$16 sps:$4 sm:$0xff]  }
 0x731   : > { %3464 = vmatprep.subr.bf16.mxu0 %v10401_v21  ;;  %v10482_v21 = vld [vmem:[#allocation14 + $0x4c] ss:$16 sps:$4 sm:$0xff]  }
 0x734   : > { %3465 = vmatpush1.bf16.msra.mxu0 %v10399_v22  ;;  %v10480_v22 = vld [vmem:[#allocation14 + $0x48] ss:$16 sps:$4 sm:$0xff]  }
 0x735   : > { %3466 = vmatprep.subr.bf16.mxu0 %v10404_v23  ;;  %v10485_v23 = vld [vmem:[#allocation14 + $0x6c] ss:$16 sps:$4 sm:$0xff]  }
 0x738   : > { %3467 = vmatpush1.bf16.msra.mxu0 %v10402_v24  ;;  %v10483_v24 = vld [vmem:[#allocation14 + $0x68] ss:$16 sps:$4 sm:$0xff]  }
 0x739   : > { %3468 = vmatprep.subr.bf16.mxu0 %v10407_v25  ;;  %v10486_v25 = vld [vmem:[#allocation14 + $0x88] ss:$16 sps:$4 sm:$0xff]  }
 0x73c   : > { %3469 = vmatpush1.bf16.msra.mxu0 %v10405_v26  ;;  %v10491_v26 = vld [vmem:[#allocation14 + $0xac] ss:$16 sps:$4 sm:$0xff]  }
 0x73d   : > { %3470 = vmatprep.subr.bf16.mxu0 %v10410_v27  ;;  %v10489_v27 = vld [vmem:[#allocation14 + $0xa8] ss:$16 sps:$4 sm:$0xff]  }
 0x740   : > { %3471 = vmatpush1.bf16.msra.mxu0 %v10408_v28  ;;  %v10494_v28 = vld [vmem:[#allocation14 + $0xcc] ss:$16 sps:$4 sm:$0xff]  }
 0x741   : > { %3472 = vmatprep.subr.bf16.mxu0 %v10413_v29  ;;  %v10497_v29 = vld [vmem:[#allocation14 + $0xec] ss:$16 sps:$4 sm:$0xff]  }
 0x744   : > { %3473 = vmatpush1.bf16.msra.mxu0 %v10411_v30  ;;  %v10495_v30 = vld [vmem:[#allocation14 + $0xe8] ss:$16 sps:$4 sm:$0xff]  }
 0x745   : > { %3474 = vmatprep.subr.bf16.mxu0 %v10416_v31  ;;  %v10500_v31 = vld [vmem:[#allocation14 + $0x10c] ss:$16 sps:$4 sm:$0xff]  }
 0x748   : > { %3475 = vmatpush1.bf16.msra.mxu0 %v10414_v32  ;;  %v10498_v32 = vld [vmem:[#allocation14 + $0x108] ss:$16 sps:$4 sm:$0xff]  }
 0x749   : > { %3476 = vmatprep.subr.bf16.mxu0 %v10419_v33  ;;  %v10503_v33 = vld [vmem:[#allocation14 + $0x12c] ss:$16 sps:$4 sm:$0xff]  }
 0x74c   : > { %3477 = vmatpush1.bf16.msra.mxu0 %v10417_v34  ;;  %v10501_v34 = vld [vmem:[#allocation14 + $0x128] ss:$16 sps:$4 sm:$0xff]  }
 0x74d   : > { %3478 = vmatprep.subr.bf16.mxu0 %v10422_v35  ;;  %v10506_v35 = vld [vmem:[#allocation14 + $0x14c] ss:$16 sps:$4 sm:$0xff]  }
 0x750   : > { %3479 = vmatpush1.bf16.msra.mxu0 %v10420_v36  ;;  %v10504_v36 = vld [vmem:[#allocation14 + $0x148] ss:$16 sps:$4 sm:$0xff]  }
 0x751   : > { %3480 = vmatprep.subr.bf16.mxu0 %v10425_v37  ;;  %v10509_v37 = vld [vmem:[#allocation14 + $0x16c] ss:$16 sps:$4 sm:$0xff]  }
 0x754   : > { %3481 = vmatpush1.bf16.msra.mxu0 %v10423_v38  ;;  %v10507_v38 = vld [vmem:[#allocation14 + $0x168] ss:$16 sps:$4 sm:$0xff]  }
 0x755   : > { %3491 = vmatprep.subr.bf16.mxu0 %v10428_v39  ;;  %v10512_v39 = vld [vmem:[#allocation14 + $0x18c] ss:$16 sps:$4 sm:$0xff]  }
 0x757   : > { %3483 = vmatmul.mubr.bf16.vlgmr.msra.gmra.mrb[8].mxu0 %v12955_v42 }
 0x758   : > { %3492 = vmatpush1.bf16.msra.mxu0 %v10426_v40  ;;  %3523 = vmatprep.mubr.bf16.mxu0 %v12951_v41  ;;  %v10510_v40 = vld [vmem:[#allocation14 + $0x188] ss:$16 sps:$4 sm:$0xff]  }
 0x759   : > { %3493 = vmatprep.subr.bf16.mxu0 %v10431_v43  ;;  %v10515_v43 = vld [vmem:[#allocation14 + $0x1ac] ss:$16 sps:$4 sm:$0xff]  }
 0x75c   : > { %3494 = vmatpush1.bf16.msra.mxu0 %v10429_v44  ;;  %v10513_v44 = vld [vmem:[#allocation14 + $0x1a8] ss:$16 sps:$4 sm:$0xff]  }
 0x75d   : > { %3495 = vmatprep.subr.bf16.mxu0 %v10434_v45  ;;  %v10518_v45 = vld [vmem:[#allocation14 + $0x1cc] ss:$16 sps:$4 sm:$0xff]  }
 0x760   : > { %3496 = vmatpush1.bf16.msra.mxu0 %v10432_v46  ;;  %v10516_v46 = vld [vmem:[#allocation14 + $0x1c8] ss:$16 sps:$4 sm:$0xff]  }
 0x761   : > { %3497 = vmatprep.subr.bf16.mxu0 %v10437_v47  ;;  %v10521_v47 = vld [vmem:[#allocation14 + $0x1ec] ss:$16 sps:$4 sm:$0xff]  }
 0x764   : > { %3498 = vmatpush1.bf16.msra.mxu0 %v10435_v48  ;;  %v10519_v48 = vld [vmem:[#allocation14 + $0x1e8] ss:$16 sps:$4 sm:$0xff]  }
 0x765   : > { %3499 = vmatprep.subr.bf16.mxu0 %v10440_v49  ;;  %v10524_v49 = vld [vmem:[#allocation14 + $0x20c] ss:$16 sps:$4 sm:$0xff]  }
 0x768   : > { %3500 = vmatpush1.bf16.msra.mxu0 %v10438_v50  ;;  %v10522_v50 = vld [vmem:[#allocation14 + $0x208] ss:$16 sps:$4 sm:$0xff]  }
 0x769   : > { %3501 = vmatprep.subr.bf16.mxu0 %v10443_v51  ;;  %v10527_v51 = vld [vmem:[#allocation14 + $0x22c] ss:$16 sps:$4 sm:$0xff]  }
 0x76c   : > { %3502 = vmatpush1.bf16.msra.mxu0 %v10441_v52  ;;  %v10525_v52 = vld [vmem:[#allocation14 + $0x228] ss:$16 sps:$4 sm:$0xff]  }
 0x76d   : > { %3503 = vmatprep.subr.bf16.mxu0 %v10446_v53  ;;  %v10530_v53 = vld [vmem:[#allocation14 + $0x24c] ss:$16 sps:$4 sm:$0xff]  }
 0x770   : > { %3504 = vmatpush1.bf16.msra.mxu0 %v10444_v55  ;;  %v10528_v55 = vld [vmem:[#allocation14 + $0x248] ss:$16 sps:$4 sm:$0xff]  }
 0x771   : > { %3505 = vmatprep.subr.bf16.mxu0 %v10449_v58  ;;  %v10533_v58 = vld [vmem:[#allocation14 + $0x26c] ss:$16 sps:$4 sm:$0xff]  }
 0x774   : > { %3506 = vmatpush1.bf16.msra.mxu0 %v10447_v60  ;;  %v10531_v60 = vld [vmem:[#allocation14 + $0x268] ss:$16 sps:$4 sm:$0xff]  }
 0x775   : > { %3507 = vmatprep.subr.bf16.mxu0 %v10452_v61  ;;  %v10536_v61 = vld [vmem:[#allocation14 + $0x28c] ss:$16 sps:$4 sm:$0xff]  }
 0x778   : > { %3508 = vmatpush1.bf16.msra.mxu0 %v10450_v62  ;;  %v10534_v62 = vld [vmem:[#allocation14 + $0x288] ss:$16 sps:$4 sm:$0xff]  }
 0x779   : > { %3509 = vmatprep.subr.bf16.mxu0 %v10455_v63  ;;  %v10539_v63 = vld [vmem:[#allocation14 + $0x2ac] ss:$16 sps:$4 sm:$0xff]  }
 0x77c   : > { %3510 = vmatpush1.bf16.msra.mxu0 %v10453_v0  ;;  %v10542_v0 = vld [vmem:[#allocation14 + $0x2cc] ss:$16 sps:$4 sm:$0xff]  }
 0x77d   : > { %3511 = vmatprep.subr.bf16.mxu0 %v10458_v1  ;;  %v10545_v1 = vld [vmem:[#allocation14 + $0x2ec] ss:$16 sps:$4 sm:$0xff]  }
 0x780   : > { %3512 = vmatpush1.bf16.msra.mxu0 %v10456_v2  ;;  %v10543_v2 = vld [vmem:[#allocation14 + $0x2e8] ss:$16 sps:$4 sm:$0xff]  }
 0x781   : > { %3513 = vmatprep.subr.bf16.mxu0 %v10461_v3  ;;  %v10548_v3 = vld [vmem:[#allocation14 + $0x30c] ss:$16 sps:$4 sm:$0xff]  }
 0x784   : > { %3514 = vmatpush1.bf16.msra.mxu0 %v10459_v5  ;;  %v10621_v5 = vld [vmem:[#allocation18 + $0x100] ss:$8 sps:$4 sm:$0xff]  }
 0x785   : > { %3515 = vmatprep.subr.bf16.mxu0 %v10464_v7  ;;  %v10623_v7 = vld [vmem:[#allocation18 + $0x104] ss:$8 sps:$4 sm:$0xff]  }
 0x786   : > { %4659 = vmatprep.subr.bf16.mxu1 %v10623_v7  ;;  %v10608_v7 = vld [vmem:[#allocation14 + $0x58c] ss:$16 sps:$4 sm:$0xff]  }
 0x787   : > { %4660 = vmatpush1.bf16.msra.mxu1 %v10621_v5  ;;  %v10603_v5 = vld [vmem:[#allocation14 + $0x568] ss:$16 sps:$4 sm:$0xff]  }
 0x788   : > { %3516 = vmatpush1.bf16.msra.mxu0 %v10462_v9  ;;  %v10546_v9 = vld [vmem:[#allocation14 + $0x308] ss:$16 sps:$4 sm:$0xff]  }
 0x789   : > { %3517 = vmatprep.subr.bf16.mxu0 %v10467_v10  ;;  %v10629_v10 = vld [vmem:[#allocation18 + $0x114] ss:$8 sps:$4 sm:$0xff]  }
 0x78a   : > { %4661 = vmatprep.subr.bf16.mxu1 %v10629_v10  ;;  %v10611_v10 = vld [vmem:[#allocation14 + $0x5ac] ss:$16 sps:$4 sm:$0xff]  }
 0x78c   : > { %3518 = vmatpush1.bf16.msra.mxu0 %v10465_v11  ;;  %v10551_v11 = vld [vmem:[#allocation14 + $0x32c] ss:$16 sps:$4 sm:$0xff]  }
 0x78d   : > { %3519 = vmatprep.subr.bf16.mxu0 %v10470_v12  ;;  %v10627_v12 = vld [vmem:[#allocation18 + $0x110] ss:$8 sps:$4 sm:$0xff]  }
 0x78e   : > { %4662 = vmatpush1.bf16.msra.mxu1 %v10627_v12  ;;  %v10614_v12 = vld [vmem:[#allocation14 + $0x5cc] ss:$16 sps:$4 sm:$0xff]  }
 0x790   : > { %3520 = vmatpush1.bf16.msra.mxu0 %v10468_v13  ;;  %v10635_v13 = vld [vmem:[#allocation18 + $0x124] ss:$8 sps:$4 sm:$0xff]  }
 0x791   : > { %3521 = vmatprep.subr.bf16.mxu0 %v10473_v14  ;;  %v10549_v14 = vld [vmem:[#allocation14 + $0x328] ss:$16 sps:$4 sm:$0xff]   ;;  %4663 = vmatprep.subr.bf16.mxu1 %v10635_v13 }
 0x792   : > { %v10612_v13 = vld [vmem:[#allocation14 + $0x5c8] ss:$16 sps:$4 sm:$0xff]  }
 0x794   : > { %3522 = vmatpush1.bf16.msra.mxu0 %v10471_v15  ;;  %v10554_v15 = vld [vmem:[#allocation14 + $0x34c] ss:$16 sps:$4 sm:$0xff]  }
 0x795   : > { %3532 = vmatprep.subr.bf16.mxu0 %v10476_v16  ;;  %v10633_v16 = vld [vmem:[#allocation18 + $0x120] ss:$8 sps:$4 sm:$0xff]  }
 0x796   : > { %4664 = vmatpush1.bf16.msra.mxu1 %v10633_v16  ;;  %v10620_v16 = vld [vmem:[#allocation18 + $0x204] ss:$8 sps:$4 sm:$0xff]  }
 0x797   : > { %3524 = vmatmul.mubr.bf16.vlgmr.msra.gmra.mrb[8].mxu0 %v12961_v17 }
 0x798   : > { %3533 = vmatpush1.bf16.msra.mxu0 %v10474_v18  ;;  %3564 = vmatprep.mubr.bf16.mxu0 %v12936_v4  ;;  %v10492_v4 = vld [vmem:[#allocation14 + $0xc8] ss:$16 sps:$4 sm:$0xff]   ;;  %v10641_v18 = vld [vmem:[#allocation18 + $0x134] ss:$8 sps:$4 sm:$0xff]  }
 0x799   : > { %3534 = vmatprep.subr.bf16.mxu0 %v10479_v19  ;;  %v10552_v19 = vld [vmem:[#allocation14 + $0x348] ss:$16 sps:$4 sm:$0xff]   ;;  %4665 = vmatprep.subr.bf16.mxu1 %v10641_v18 }
 0x79a   : > { %v10618_v18 = vld [vmem:[#allocation18 + $0x200] ss:$8 sps:$4 sm:$0xff]  }
 0x79c   : > { %3535 = vmatpush1.bf16.msra.mxu0 %v10477_v20  ;;  %v10557_v20 = vld [vmem:[#allocation14 + $0x36c] ss:$16 sps:$4 sm:$0xff]  }
 0x79d   : > { %3536 = vmatprep.subr.bf16.mxu0 %v10482_v21  ;;  %v10639_v21 = vld [vmem:[#allocation18 + $0x130] ss:$8 sps:$4 sm:$0xff]  }
 0x79e   : > { %4666 = vmatpush1.bf16.msra.mxu1 %v10639_v21  ;;  %v10632_v21 = vld [vmem:[#allocation18 + $0x224] ss:$8 sps:$4 sm:$0xff]  }
 0x7a0   : > { %3537 = vmatpush1.bf16.msra.mxu0 %v10480_v22  ;;  %v10647_v22 = vld [vmem:[#allocation18 + $0x144] ss:$8 sps:$4 sm:$0xff]  }
 0x7a1   : > { %3538 = vmatprep.subr.bf16.mxu0 %v10485_v23  ;;  %v10555_v23 = vld [vmem:[#allocation14 + $0x368] ss:$16 sps:$4 sm:$0xff]   ;;  %4667 = vmatprep.subr.bf16.mxu1 %v10647_v22 }
 0x7a2   : > { %v10630_v22 = vld [vmem:[#allocation18 + $0x220] ss:$8 sps:$4 sm:$0xff]  }
 0x7a4   : > { %3539 = vmatpush1.bf16.msra.mxu0 %v10483_v24  ;;  %v10560_v24 = vld [vmem:[#allocation14 + $0x38c] ss:$16 sps:$4 sm:$0xff]  }
 0x7a5   : > { %3540 = vmatprep.subr.bf16.mxu0 %v10488_v54  ;;  %v10645_v54 = vld [vmem:[#allocation18 + $0x140] ss:$8 sps:$4 sm:$0xff]  }
 0x7a6   : > { %4668 = vmatpush1.bf16.msra.mxu1 %v10645_v54  ;;  %v10644_v54 = vld [vmem:[#allocation18 + $0x244] ss:$8 sps:$4 sm:$0xff]  }
 0x7a8   : > { %3541 = vmatpush1.bf16.msra.mxu0 %v10486_v25  ;;  %v10653_v25 = vld [vmem:[#allocation18 + $0x154] ss:$8 sps:$4 sm:$0xff]  }
 0x7a9   : > { %3542 = vmatprep.subr.bf16.mxu0 %v10491_v26  ;;  %v10558_v26 = vld [vmem:[#allocation14 + $0x388] ss:$16 sps:$4 sm:$0xff]   ;;  %4669 = vmatprep.subr.bf16.mxu1 %v10653_v25  ;;  %v12970_v25 = vld [vmem:[#allocation15] sm:$0xf] }
 0x7ac   : > { %3543 = vmatpush1.bf16.msra.mxu0 %v10489_v27  ;;  %v10563_v27 = vld [vmem:[#allocation14 + $0x3ac] ss:$16 sps:$4 sm:$0xff]  }
 0x7ad   : > { %3544 = vmatprep.subr.bf16.mxu0 %v10494_v28  ;;  %v10651_v28 = vld [vmem:[#allocation18 + $0x150] ss:$8 sps:$4 sm:$0xff]  }
 0x7ae   : > { %4670 = vmatpush1.bf16.msra.mxu1 %v10651_v28  ;;  %v12972_v28 = vld [vmem:[#allocation17] sm:$0xf] }
 0x7b0   : > { %3545 = vmatpush1.bf16.msra.mxu0 %v10492_v4  ;;  %v10659_v4 = vld [vmem:[#allocation18 + $0x164] ss:$8 sps:$4 sm:$0xff]  }
 0x7b1   : > { %3546 = vmatprep.subr.bf16.mxu0 %v10497_v29  ;;  %v10561_v29 = vld [vmem:[#allocation14 + $0x3a8] ss:$16 sps:$4 sm:$0xff]   ;;  %4671 = vmatprep.subr.bf16.mxu1 %v10659_v4  ;;  %v3664_v4 = vrot.slane %v12970_v25, %v12921_v59 }
 0x7b4   : > { %3547 = vmatpush1.bf16.msra.mxu0 %v10495_v30  ;;  %v10566_v30 = vld [vmem:[#allocation14 + $0x3cc] ss:$16 sps:$4 sm:$0xff]  }
 0x7b5   : > { %3548 = vmatprep.subr.bf16.mxu0 %v10500_v31  ;;  %v10657_v31 = vld [vmem:[#allocation18 + $0x160] ss:$8 sps:$4 sm:$0xff]  }
 0x7b6   : > { %4672 = vmatpush1.bf16.msra.mxu1 %v10657_v31  ;;  %v10656_v31 = vld [vmem:[#allocation18 + $0x264] ss:$8 sps:$4 sm:$0xff]  }
 0x7b8   : > { %3549 = vmatpush1.bf16.msra.mxu0 %v10498_v32  ;;  %v10665_v32 = vld [vmem:[#allocation18 + $0x174] ss:$8 sps:$4 sm:$0xff]  }
 0x7b9   : > { %3550 = vmatprep.subr.bf16.mxu0 %v10503_v33  ;;  %v10564_v33 = vld [vmem:[#allocation14 + $0x3c8] ss:$16 sps:$4 sm:$0xff]   ;;  %4673 = vmatprep.subr.bf16.mxu1 %v10665_v32 }
 0x7bc   : > { %3551 = vmatpush1.bf16.msra.mxu0 %v10501_v34  ;;  %v10569_v34 = vld [vmem:[#allocation14 + $0x3ec] ss:$16 sps:$4 sm:$0xff]  }
 0x7bd   : > { %3552 = vmatprep.subr.bf16.mxu0 %v10506_v35  ;;  %v10663_v35 = vld [vmem:[#allocation18 + $0x170] ss:$8 sps:$4 sm:$0xff]  }
 0x7be   : > { %4674 = vmatpush1.bf16.msra.mxu1 %v10663_v35 }
 0x7c0   : > { %3553 = vmatpush1.bf16.msra.mxu0 %v10504_v36  ;;  %v10671_v36 = vld [vmem:[#allocation18 + $0x184] ss:$8 sps:$4 sm:$0xff]  }
 0x7c1   : > { %3554 = vmatprep.subr.bf16.mxu0 %v10509_v37  ;;  %v10567_v37 = vld [vmem:[#allocation14 + $0x3e8] ss:$16 sps:$4 sm:$0xff]   ;;  %4675 = vmatprep.subr.bf16.mxu1 %v10671_v36 }
 0x7c4   : > { %3555 = vmatpush1.bf16.msra.mxu0 %v10507_v38  ;;  %v10572_v38 = vld [vmem:[#allocation14 + $0x40c] ss:$16 sps:$4 sm:$0xff]  }
 0x7c5   : > { %3556 = vmatprep.subr.bf16.mxu0 %v10512_v39  ;;  %v10669_v39 = vld [vmem:[#allocation18 + $0x180] ss:$8 sps:$4 sm:$0xff]  }
 0x7c6   : > { %4676 = vmatpush1.bf16.msra.mxu1 %v10669_v39 }
 0x7c8   : > { %3557 = vmatpush1.bf16.msra.mxu0 %v10510_v40  ;;  %v10677_v40 = vld [vmem:[#allocation18 + $0x194] ss:$8 sps:$4 sm:$0xff]  }
 0x7c9   : > { %3558 = vmatprep.subr.bf16.mxu0 %v10515_v43  ;;  %v10570_v43 = vld [vmem:[#allocation14 + $0x408] ss:$16 sps:$4 sm:$0xff]   ;;  %4677 = vmatprep.subr.bf16.mxu1 %v10677_v40 }
 0x7cc   : > { %3559 = vmatpush1.bf16.msra.mxu0 %v10513_v44  ;;  %v10575_v44 = vld [vmem:[#allocation14 + $0x42c] ss:$16 sps:$4 sm:$0xff]  }
 0x7cd   : > { %3560 = vmatprep.subr.bf16.mxu0 %v10518_v45  ;;  %v10675_v45 = vld [vmem:[#allocation18 + $0x190] ss:$8 sps:$4 sm:$0xff]  }
 0x7ce   : > { %4678 = vmatpush1.bf16.msra.mxu1 %v10675_v45 }
 0x7d0   : > { %3561 = vmatpush1.bf16.msra.mxu0 %v10516_v46  ;;  %v10683_v46 = vld [vmem:[#allocation18 + $0x1a4] ss:$8 sps:$4 sm:$0xff]  }
 0x7d1   : > { %3562 = vmatprep.subr.bf16.mxu0 %v10521_v47  ;;  %v10573_v47 = vld [vmem:[#allocation14 + $0x428] ss:$16 sps:$4 sm:$0xff]   ;;  %4679 = vmatprep.subr.bf16.mxu1 %v10683_v46 }
 0x7d4   : > { %3563 = vmatpush1.bf16.msra.mxu0 %v10519_v48  ;;  %v10578_v48 = vld [vmem:[#allocation14 + $0x44c] ss:$16 sps:$4 sm:$0xff]  }
 0x7d5   : > { %3573 = vmatprep.subr.bf16.mxu0 %v10524_v49  ;;  %v10681_v49 = vld [vmem:[#allocation18 + $0x1a0] ss:$8 sps:$4 sm:$0xff]  }
 0x7d6   : > { %4680 = vmatpush1.bf16.msra.mxu1 %v10681_v49  ;;  %v10666_v49 = vld [vmem:[#allocation18 + $0x280] ss:$8 sps:$4 sm:$0xff]  }
 0x7d7   : > { %3565 = vmatmul.mubr.bf16.vlgmr.msra.gmra.mrb[12].mxu0 %v12938_v6  ;;  %v10537_v6 = vld [vmem:[#allocation14 + $0x2a8] ss:$16 sps:$4 sm:$0xff]  }
 0x7d8   : > { %3574 = vmatpush1.bf16.msra.mxu0 %v10522_v50  ;;  %3605 = vmatprep.mubr.bf16.mxu0 %v12941_v8  ;;  %v10540_v8 = vld [vmem:[#allocation14 + $0x2c8] ss:$16 sps:$4 sm:$0xff]  }
 0x7d9   : > { %3575 = vmatprep.subr.bf16.mxu0 %v10527_v51  ;;  %v10576_v50 = vld [vmem:[#allocation14 + $0x448] ss:$16 sps:$4 sm:$0xff]   ;;  %v10581_v51 = vld [vmem:[#allocation14 + $0x46c] ss:$16 sps:$4 sm:$0xff]  }
 0x7dc   : > { %3576 = vmatpush1.bf16.msra.mxu0 %v10525_v52  ;;  %v10579_v52 = vld [vmem:[#allocation14 + $0x468] ss:$16 sps:$4 sm:$0xff]  }
 0x7dd   : > { %3577 = vmatprep.subr.bf16.mxu0 %v10530_v53  ;;  %v10582_v53 = vld [vmem:[#allocation14 + $0x488] ss:$16 sps:$4 sm:$0xff]  }
 0x7e0   : > { %3578 = vmatpush1.bf16.msra.mxu0 %v10528_v55  ;;  %v10587_v55 = vld [vmem:[#allocation14 + $0x4ac] ss:$16 sps:$4 sm:$0xff]  }
 0x7e1   : > { %3579 = vmatprep.subr.bf16.mxu0 %v10533_v58  ;;  %v10590_v58 = vld [vmem:[#allocation14 + $0x4cc] ss:$16 sps:$4 sm:$0xff]  }
 0x7e4   : > { %3580 = vmatpush1.bf16.msra.mxu0 %v10531_v60  ;;  %v10588_v60 = vld [vmem:[#allocation14 + $0x4c8] ss:$16 sps:$4 sm:$0xff]  }
 0x7e5   : > { %3581 = vmatprep.subr.bf16.mxu0 %v10536_v61  ;;  %v10593_v61 = vld [vmem:[#allocation14 + $0x4ec] ss:$16 sps:$4 sm:$0xff]  }
 0x7e8   : > { %3582 = vmatpush1.bf16.msra.mxu0 %v10534_v62  ;;  %v10591_v62 = vld [vmem:[#allocation14 + $0x4e8] ss:$16 sps:$4 sm:$0xff]  }
 0x7e9   : > { %3583 = vmatprep.subr.bf16.mxu0 %v10539_v63  ;;  %v10596_v63 = vld [vmem:[#allocation14 + $0x50c] ss:$16 sps:$4 sm:$0xff]  }
 0x7ec   : > { %3584 = vmatpush1.bf16.msra.mxu0 %v10537_v6  ;;  %v10594_v6 = vld [vmem:[#allocation14 + $0x508] ss:$16 sps:$4 sm:$0xff]  }
 0x7ed   : > { %3585 = vmatprep.subr.bf16.mxu0 %v10542_v0  ;;  %v10599_v0 = vld [vmem:[#allocation14 + $0x52c] ss:$16 sps:$4 sm:$0xff]  }
 0x7f0   : > { %3586 = vmatpush1.bf16.msra.mxu0 %v10540_v8  ;;  %v10597_v8 = vld [vmem:[#allocation14 + $0x528] ss:$16 sps:$4 sm:$0xff]  }
 0x7f1   : > { %3587 = vmatprep.subr.bf16.mxu0 %v10545_v1  ;;  %v10602_v1 = vld [vmem:[#allocation14 + $0x54c] ss:$16 sps:$4 sm:$0xff]  }
 0x7f4   : > { %3588 = vmatpush1.bf16.msra.mxu0 %v10543_v2  ;;  %v10600_v2 = vld [vmem:[#allocation14 + $0x548] ss:$16 sps:$4 sm:$0xff]  }
 0x7f5   : > { %3589 = vmatprep.subr.bf16.mxu0 %v10548_v3  ;;  %v10605_v3 = vld [vmem:[#allocation14 + $0x56c] ss:$16 sps:$4 sm:$0xff]  }
 0x7f8   : > { %3590 = vmatpush1.bf16.msra.mxu0 %v10546_v9  ;;  %v10606_v9 = vld [vmem:[#allocation14 + $0x588] ss:$16 sps:$4 sm:$0xff]  }
 0x7f9   : > { %3591 = vmatprep.subr.bf16.mxu0 %v10551_v11  ;;  %v10609_v11 = vld [vmem:[#allocation14 + $0x5a8] ss:$16 sps:$4 sm:$0xff]  }
 0x7fc   : > { %3592 = vmatpush1.bf16.msra.mxu0 %v10549_v14  ;;  %v10617_v14 = vld [vmem:[#allocation14 + $0x5ec] ss:$16 sps:$4 sm:$0xff]  }
 0x7fd   : > { %3593 = vmatprep.subr.bf16.mxu0 %v10554_v15  ;;  %v10615_v15 = vld [vmem:[#allocation14 + $0x5e8] ss:$16 sps:$4 sm:$0xff]  }
 0x800   : > { %3594 = vmatpush1.bf16.msra.mxu0 %v10552_v19  ;;  %v10626_v19 = vld [vmem:[#allocation18 + $0x214] ss:$8 sps:$4 sm:$0xff]  }
 0x801   : > { %3595 = vmatprep.subr.bf16.mxu0 %v10557_v20  ;;  %v10624_v20 = vld [vmem:[#allocation18 + $0x210] ss:$8 sps:$4 sm:$0xff]  }
 0x804   : > { %3596 = vmatpush1.bf16.msra.mxu0 %v10555_v23  ;;  %v10638_v23 = vld [vmem:[#allocation18 + $0x234] ss:$8 sps:$4 sm:$0xff]  }
 0x805   : > { %3597 = vmatprep.subr.bf16.mxu0 %v10560_v24  ;;  %v10636_v24 = vld [vmem:[#allocation18 + $0x230] ss:$8 sps:$4 sm:$0xff]  }
 0x808   : > { %3598 = vmatpush1.bf16.msra.mxu0 %v10558_v26  ;;  %v10642_v26 = vld [vmem:[#allocation18 + $0x240] ss:$8 sps:$4 sm:$0xff]  }
 0x809   : > { %3599 = vmatprep.subr.bf16.mxu0 %v10563_v27  ;;  %v10650_v27 = vld [vmem:[#allocation18 + $0x254] ss:$8 sps:$4 sm:$0xff]  }
 0x80c   : > { %3600 = vmatpush1.bf16.msra.mxu0 %v10561_v29  ;;  %v10648_v29 = vld [vmem:[#allocation18 + $0x250] ss:$8 sps:$4 sm:$0xff]  }
 0x80d   : > { %3601 = vmatprep.subr.bf16.mxu0 %v10566_v30  ;;  %v3686_v30 = vrot.slane %v12972_v28, %v12918_v57 }
 0x810   : > { %3602 = vmatpush1.bf16.msra.mxu0 %v10564_v33  ;;  %v3690_v33 = vrot.slane %v12972_v28, %v12921_v59 }
 0x811   : > { %3603 = vmatprep.subr.bf16.mxu0 %v10569_v34 }
 0x814   : > { %3604 = vmatpush1.bf16.msra.mxu0 %v10567_v37 }
 0x815   : > { %3614 = vmatprep.subr.bf16.mxu0 %v10572_v38  ;;  %v10654_v38 = vld [vmem:[#allocation18 + $0x260] ss:$8 sps:$4 sm:$0xff]  }
 0x817   : > { %3606 = vmatmul.mubr.bf16.vlgmr.msra.gmra.mrb[12].mxu0 %v12955_v42  ;;  %v10584_v42 = vld [vmem:[#allocation14 + $0x48c] ss:$16 sps:$4 sm:$0xff]  }
 0x818   : > { %3615 = vmatpush1.bf16.msra.mxu0 %v10570_v43  ;;  %3646 = vmatprep.mubr.bf16.mxu0 %v12951_v41  ;;  %v10585_v41 = vld [vmem:[#allocation14 + $0x4a8] ss:$16 sps:$4 sm:$0xff]   ;;  %v10662_v43 = vld [vmem:[#allocation18 + $0x274] ss:$8 sps:$4 sm:$0xff]  }
 0x819   : > { %3616 = vmatprep.subr.bf16.mxu0 %v10575_v44 }
 0x81c   : > { %3617 = vmatpush1.bf16.msra.mxu0 %v10573_v47  ;;  %v10660_v47 = vld [vmem:[#allocation18 + $0x270] ss:$8 sps:$4 sm:$0xff]  }
 0x81d   : > { %3618 = vmatprep.subr.bf16.mxu0 %v10578_v48  ;;  %v10668_v48 = vld [vmem:[#allocation18 + $0x284] ss:$8 sps:$4 sm:$0xff]  }
 0x820   : > { %3619 = vmatpush1.bf16.msra.mxu0 %v10576_v50  ;;  %v10674_v50 = vld [vmem:[#allocation18 + $0x294] ss:$8 sps:$4 sm:$0xff]  }
 0x821   : > { %3620 = vmatprep.subr.bf16.mxu0 %v10581_v51  ;;  %v10672_v51 = vld [vmem:[#allocation18 + $0x290] ss:$8 sps:$4 sm:$0xff]  }
 0x824   : > { %3621 = vmatpush1.bf16.msra.mxu0 %v10579_v52  ;;  %v10680_v52 = vld [vmem:[#allocation18 + $0x2a4] ss:$8 sps:$4 sm:$0xff]  }
 0x825   : > { %3622 = vmatprep.subr.bf16.mxu0 %v10584_v42  ;;  %v10678_v42 = vld [vmem:[#allocation18 + $0x2a0] ss:$8 sps:$4 sm:$0xff]  }
 0x828   : > { %3623 = vmatpush1.bf16.msra.mxu0 %v10582_v53  ;;  %v10686_v53 = vld [vmem:[#allocation18 + $0x2b4] ss:$8 sps:$4 sm:$0xff]  }
 0x829   : > { %3624 = vmatprep.subr.bf16.mxu0 %v10587_v55  ;;  %v10689_v55 = vld [vmem:[#allocation18 + $0x1b4] ss:$8 sps:$4 sm:$0xff]  }
 0x82a   : > { %4681 = vmatprep.subr.bf16.mxu1 %v10689_v55  ;;  %v10734_v55 = vld [vmem:[#allocation18 + $0x334] ss:$8 sps:$4 sm:$0xff]  }
 0x82c   : > { %3625 = vmatpush1.bf16.msra.mxu0 %v10585_v41  ;;  %v10684_v41 = vld [vmem:[#allocation18 + $0x2b0] ss:$8 sps:$4 sm:$0xff]  }
 0x82d   : > { %3626 = vmatprep.subr.bf16.mxu0 %v10590_v58  ;;  %v10687_v58 = vld [vmem:[#allocation18 + $0x1b0] ss:$8 sps:$4 sm:$0xff]  }
 0x82e   : > { %4682 = vmatpush1.bf16.msra.mxu1 %v10687_v58  ;;  %v10732_v58 = vld [vmem:[#allocation18 + $0x330] ss:$8 sps:$4 sm:$0xff]  }
 0x830   : > { %3627 = vmatpush1.bf16.msra.mxu0 %v10588_v60  ;;  %v10692_v60 = vld [vmem:[#allocation18 + $0x2c4] ss:$8 sps:$4 sm:$0xff]  }
 0x831   : > { %3628 = vmatprep.subr.bf16.mxu0 %v10593_v61  ;;  %v10695_v61 = vld [vmem:[#allocation18 + $0x1c4] ss:$8 sps:$4 sm:$0xff]  }
 0x832   : > { %4683 = vmatprep.subr.bf16.mxu1 %v10695_v61  ;;  %v10740_v61 = vld [vmem:[#allocation18 + $0x344] ss:$8 sps:$4 sm:$0xff]  }
 0x834   : > { %3629 = vmatpush1.bf16.msra.mxu0 %v10591_v62  ;;  %v10690_v62 = vld [vmem:[#allocation18 + $0x2c0] ss:$8 sps:$4 sm:$0xff]  }
 0x835   : > { %3630 = vmatprep.subr.bf16.mxu0 %v10596_v63  ;;  %v10693_v63 = vld [vmem:[#allocation18 + $0x1c0] ss:$8 sps:$4 sm:$0xff]  }
 0x836   : > { %4684 = vmatpush1.bf16.msra.mxu1 %v10693_v63  ;;  %v10738_v63 = vld [vmem:[#allocation18 + $0x340] ss:$8 sps:$4 sm:$0xff]  }
 0x838   : > { %3631 = vmatpush1.bf16.msra.mxu0 %v10594_v6  ;;  %v10698_v6 = vld [vmem:[#allocation18 + $0x2d4] ss:$8 sps:$4 sm:$0xff]  }
 0x839   : > { %3632 = vmatprep.subr.bf16.mxu0 %v10599_v0  ;;  %v10701_v0 = vld [vmem:[#allocation18 + $0x1d4] ss:$8 sps:$4 sm:$0xff]  }
 0x83a   : > { %4685 = vmatprep.subr.bf16.mxu1 %v10701_v0  ;;  %v10746_v0 = vld [vmem:[#allocation18 + $0x354] ss:$8 sps:$4 sm:$0xff]  }
 0x83c   : > { %3633 = vmatpush1.bf16.msra.mxu0 %v10597_v8  ;;  %v10696_v8 = vld [vmem:[#allocation18 + $0x2d0] ss:$8 sps:$4 sm:$0xff]  }
 0x83d   : > { %3634 = vmatprep.subr.bf16.mxu0 %v10602_v1  ;;  %v10699_v1 = vld [vmem:[#allocation18 + $0x1d0] ss:$8 sps:$4 sm:$0xff]  }
 0x83e   : > { %4686 = vmatpush1.bf16.msra.mxu1 %v10699_v1  ;;  %v10744_v1 = vld [vmem:[#allocation18 + $0x350] ss:$8 sps:$4 sm:$0xff]  }
 0x840   : > { %3635 = vmatpush1.bf16.msra.mxu0 %v10600_v2  ;;  %v10704_v2 = vld [vmem:[#allocation18 + $0x2e4] ss:$8 sps:$4 sm:$0xff]  }
 0x841   : > { %3636 = vmatprep.subr.bf16.mxu0 %v10605_v3  ;;  %v10702_v3 = vld [vmem:[#allocation18 + $0x2e0] ss:$8 sps:$4 sm:$0xff]  }
 0x844   : > { %3637 = vmatpush1.bf16.msra.mxu0 %v10603_v5  ;;  %v10705_v5 = vld [vmem:[#allocation18 + $0x1e0] ss:$8 sps:$4 sm:$0xff]  }
 0x845   : > { %3638 = vmatprep.subr.bf16.mxu0 %v10608_v7  ;;  %v10707_v7 = vld [vmem:[#allocation18 + $0x1e4] ss:$8 sps:$4 sm:$0xff]  }
 0x846   : > { %4687 = vmatprep.subr.bf16.mxu1 %v10707_v7  ;;  %v10750_v7 = vld [vmem:[#allocation18 + $0x360] ss:$8 sps:$4 sm:$0xff]  }
 0x847   : > { %4688 = vmatpush1.bf16.msra.mxu1 %v10705_v5  ;;  %v10755_v5 = vld [vmem:[#allocation18 + $0x464] ss:$8 sps:$4 sm:$0xff]  }
 0x848   : > { %3639 = vmatpush1.bf16.msra.mxu0 %v10606_v9  ;;  %v10710_v9 = vld [vmem:[#allocation18 + $0x2f4] ss:$8 sps:$4 sm:$0xff]  }
 0x849   : > { %3640 = vmatprep.subr.bf16.mxu0 %v10611_v10  ;;  %v10713_v10 = vld [vmem:[#allocation18 + $0x1f4] ss:$8 sps:$4 sm:$0xff]  }
 0x84a   : > { %4689 = vmatprep.subr.bf16.mxu1 %v10713_v10  ;;  %v10758_v10 = vld [vmem:[#allocation18 + $0x374] ss:$8 sps:$4 sm:$0xff]  }
 0x84c   : > { %3641 = vmatpush1.bf16.msra.mxu0 %v10609_v11  ;;  %v10708_v11 = vld [vmem:[#allocation18 + $0x2f0] ss:$8 sps:$4 sm:$0xff]  }
 0x84d   : > { %3642 = vmatprep.subr.bf16.mxu0 %v10614_v12  ;;  %v10711_v12 = vld [vmem:[#allocation18 + $0x1f0] ss:$8 sps:$4 sm:$0xff]  }
 0x84e   : > { %4690 = vmatpush1.bf16.msra.mxu1 %v10711_v12  ;;  %v10756_v12 = vld [vmem:[#allocation18 + $0x370] ss:$8 sps:$4 sm:$0xff]  }
 0x850   : > { %3643 = vmatpush1.bf16.msra.mxu0 %v10612_v13  ;;  %v10716_v13 = vld [vmem:[#allocation18 + $0x304] ss:$8 sps:$4 sm:$0xff]  }
 0x851   : > { %3644 = vmatprep.subr.bf16.mxu0 %v10617_v14  ;;  %v10719_v14 = vld [vmem:[#allocation18 + $0x404] ss:$8 sps:$4 sm:$0xff]  }
 0x852   : > { %5111 = vmatprep.subr.bf16.mxu1 %v10719_v14  ;;  %v10764_v14 = vld [vmem:[#allocation18 + $0x384] ss:$8 sps:$4 sm:$0xff]  }
 0x854   : > { %3645 = vmatpush1.bf16.msra.mxu0 %v10615_v15  ;;  %v12983_v15 = vsub.s32 2, %v12915_v56 }
 0x855   : > { %4216 = vmatprep.subr.bf16.mxu0 %v10620_v16  ;;  %v12986_v16 = vsub.s32 3, %v12915_v56 }
 0x857   : > { %3647 = vmatmul.mubr.bf16.vlgmr.msra.gmra.mrb[12].mxu0 %v12961_v17  ;;  %v3660_v17 = vrot.slane %v12970_v25, %v12918_v57 }
 0x858   : > { %4217 = vmatpush1.bf16.msra.mxu0 %v10618_v18  ;;  %v3668_v18 = vrot.slane %v12970_v25, %v12983_v15 }
 0x859   : > { %4218 = vmatprep.subr.bf16.mxu0 %v10626_v19  ;;  %v3672_v19 = vrot.slane %v12970_v25, %v12986_v16 }
 0x85c   : > { %4219 = vmatpush1.bf16.msra.mxu0 %v10624_v20  ;;  %v3694_v20 = vrot.slane %v12972_v28, %v12983_v15 }
 0x85d   : > { %4220 = vmatprep.subr.bf16.mxu0 %v10632_v21 }
 0x860   : > { %4221 = vmatpush1.bf16.msra.mxu0 %v10630_v22  ;;  %v3698_v22 = vrot.slane %v12972_v28, %v12986_v16 }
 0x861   : > { %4222 = vmatprep.subr.bf16.mxu0 %v10638_v23 }
 0x864   : > { %4223 = vmatpush1.bf16.msra.mxu0 %v10636_v24 }
 0x865   : > { %4224 = vmatprep.subr.bf16.mxu0 %v10644_v54 }
 0x868   : > { %4225 = vmatpush1.bf16.msra.mxu0 %v10642_v26 }
 0x869   : > { %4226 = vmatprep.subr.bf16.mxu0 %v10650_v27 }
 0x86a   : > { %v3525_v32 = vpop.f32.mrb[8].mxu0 }
 0x86b   : > { %v3677_v34 = vmul.f32 %v3660_v17, %v3525_v32  ;;  %v3527_v35 = vpop.f32.mrb[9].mxu0 }
 0x86c   : > { %v3678_v36 = vmul.f32 %v3664_v4, %v3527_v35  ;;  %v3529_v37 = vpop.f32.mrb[10].mxu0  ;;  %4227 = vmatpush1.bf16.msra.mxu0 %v10648_v29 }
 0x86d   : > { %v3703_v39 = vadd.f32 %v3686_v30, %v3677_v34  ;;  %v3530_v40 = vpop.f32.mrb[11].mxu0  ;;  %4228 = vmatprep.subr.bf16.mxu0 %v10656_v31 }
 0x86e   : > { %v3704_v44 = vadd.f32 %v3690_v33, %v3678_v36  ;;  %v10717_v40 = vld [vmem:[#allocation18 + $0x400] ss:$8 sps:$4 sm:$0xff]  }
 0x86f   : > { %v3707_v45 = vmax.f32 %v3703_v39, 0.0 }
 0x870   : > { %v3708_v46 = vmax.f32 %v3704_v44, 0.0  ;;  %4229 = vmatpush1.bf16.msra.mxu0 %v10654_v38  ;;  %v10714_v38 = vld [vmem:[#allocation18 + $0x300] ss:$8 sps:$4 sm:$0xff]  }
 0x871   : > { %3711 = vst [vmem:[#allocation2] sm:$0xff] %v3707_v45  ;;  %4230 = vmatprep.subr.bf16.mxu0 %v10662_v43  ;;  %v10722_v45 = vld [vmem:[#allocation18 + $0x314] ss:$8 sps:$4 sm:$0xff]  }
 0x872   : > { %3712 = vst [vmem:[#allocation2 + $0x8] sm:$0xff] %v3708_v46  ;;  %v10725_v46 = vld [vmem:[#allocation18 + $0x414] ss:$8 sps:$4 sm:$0xff]  }
 0x874   : > { %4231 = vmatpush1.bf16.msra.mxu0 %v10660_v47 }
 0x875   : > { %4232 = vmatprep.subr.bf16.mxu0 %v10668_v48 }
 0x878   : > { %4233 = vmatpush1.bf16.msra.mxu0 %v10666_v49  ;;  %v10720_v49 = vld [vmem:[#allocation18 + $0x310] ss:$8 sps:$4 sm:$0xff]  }
 0x879   : > { %4234 = vmatprep.subr.bf16.mxu0 %v10674_v50  ;;  %v10723_v50 = vld [vmem:[#allocation18 + $0x410] ss:$8 sps:$4 sm:$0xff]  }
 0x87c   : > { %4235 = vmatpush1.bf16.msra.mxu0 %v10672_v51  ;;  %v10728_v51 = vld [vmem:[#allocation18 + $0x324] ss:$8 sps:$4 sm:$0xff]  }
 0x87d   : > { %4236 = vmatprep.subr.bf16.mxu0 %v10680_v52  ;;  %v10731_v52 = vld [vmem:[#allocation18 + $0x424] ss:$8 sps:$4 sm:$0xff]  }
 0x880   : > { %4237 = vmatpush1.bf16.msra.mxu0 %v10678_v42  ;;  %v10726_v42 = vld [vmem:[#allocation18 + $0x320] ss:$8 sps:$4 sm:$0xff]  }
 0x881   : > { %4238 = vmatprep.subr.bf16.mxu0 %v10686_v53  ;;  %v10729_v53 = vld [vmem:[#allocation18 + $0x420] ss:$8 sps:$4 sm:$0xff]  }
 0x884   : > { %4239 = vmatpush1.bf16.msra.mxu0 %v10684_v41  ;;  %v10737_v41 = vld [vmem:[#allocation18 + $0x434] ss:$8 sps:$4 sm:$0xff]  }
 0x885   : > { %4240 = vmatprep.subr.bf16.mxu0 %v10692_v60  ;;  %v10735_v60 = vld [vmem:[#allocation18 + $0x430] ss:$8 sps:$4 sm:$0xff]  }
 0x888   : > { %4241 = vmatpush1.bf16.msra.mxu0 %v10690_v62  ;;  %v10743_v62 = vld [vmem:[#allocation18 + $0x444] ss:$8 sps:$4 sm:$0xff]  }
 0x889   : > { %4242 = vmatprep.subr.bf16.mxu0 %v10698_v6  ;;  %v10741_v6 = vld [vmem:[#allocation18 + $0x440] ss:$8 sps:$4 sm:$0xff]  }
 0x88c   : > { %4243 = vmatpush1.bf16.msra.mxu0 %v10696_v8  ;;  %v10749_v8 = vld [vmem:[#allocation18 + $0x454] ss:$8 sps:$4 sm:$0xff]  }
 0x88d   : > { %4244 = vmatprep.subr.bf16.mxu0 %v10704_v2  ;;  %v10747_v2 = vld [vmem:[#allocation18 + $0x450] ss:$8 sps:$4 sm:$0xff]  }
 0x890   : > { %4245 = vmatpush1.bf16.msra.mxu0 %v10702_v3  ;;  %v10752_v3 = vld [vmem:[#allocation18 + $0x364] ss:$8 sps:$4 sm:$0xff]  }
 0x891   : > { %4246 = vmatprep.subr.bf16.mxu0 %v10710_v9  ;;  %v10753_v9 = vld [vmem:[#allocation18 + $0x460] ss:$8 sps:$4 sm:$0xff]  }
 0x894   : > { %4247 = vmatpush1.bf16.msra.mxu0 %v10708_v11  ;;  %v10761_v11 = vld [vmem:[#allocation18 + $0x474] ss:$8 sps:$4 sm:$0xff]  }
 0x895   : > { %4257 = vmatprep.subr.bf16.mxu0 %v10716_v13  ;;  %v10759_v13 = vld [vmem:[#allocation18 + $0x470] ss:$8 sps:$4 sm:$0xff]  }
 0x92a   : > { %v3648_v21 = vpop.f32.mrb[12].mxu0 }
 0x92b   : > { %v3679_v23 = vmul.f32 %v3668_v18, %v3648_v21  ;;  %v3650_v24 = vpop.f32.mrb[13].mxu0  ;;  %v10767_v18 = vld [vmem:[#allocation18 + $0x484] ss:$8 sps:$4 sm:$0xff]   ;;  %v10770_v21 = vld [vmem:[#allocation18 + $0x394] ss:$8 sps:$4 sm:$0xff]  }
 0x92c   : > { %v3680_v54 = vmul.f32 %v3672_v19, %v3650_v24  ;;  %v3652_v26 = vpop.f32.mrb[14].mxu0  ;;  %v10762_v19 = vld [vmem:[#allocation18 + $0x380] ss:$8 sps:$4 sm:$0xff]   ;;  %v10771_v24 = vld [vmem:[#allocation18 + $0x490] ss:$8 sps:$4 sm:$0xff]  }
 0x92d   : > { %v3705_v27 = vadd.f32 %v3694_v20, %v3679_v23  ;;  %v3653_v56 = vpop.f32.mrb[15].mxu0  ;;  %v10765_v20 = vld [vmem:[#allocation18 + $0x480] ss:$8 sps:$4 sm:$0xff]   ;;  %v10768_v23 = vld [vmem:[#allocation18 + $0x390] ss:$8 sps:$4 sm:$0xff]  }
 0x92e   : > { %v3706_v17 = vadd.f32 %v3698_v22, %v3680_v54  ;;  %v10773_v22 = vld [vmem:[#allocation18 + $0x494] ss:$8 sps:$4 sm:$0xff]   ;;  %v10776_v54 = vld [vmem:[#allocation18 + $0x3a4] ss:$8 sps:$4 sm:$0xff]   ;;  %v10777_v56 = vld [vmem:[#allocation18 + $0x4a0] ss:$8 sps:$4 sm:$0xff]  }
 0x92f   : > { %v3709_v4 = vmax.f32 %v3705_v27, 0.0  ;;  %v10779_v26 = vld [vmem:[#allocation18 + $0x4a4] ss:$8 sps:$4 sm:$0xff]   ;;  %v10774_v27 = vld [vmem:[#allocation18 + $0x3a0] ss:$8 sps:$4 sm:$0xff]  }
 0x930   : > { %v3710_v29 = vmax.f32 %v3706_v17, 0.0  ;;  %v10782_v17 = vld [vmem:[#allocation18 + $0x3b4] ss:$8 sps:$4 sm:$0xff]  }
 0x931   : > { %3713 = vst [vmem:[#allocation2 + $0x10] sm:$0xff] %v3709_v4  ;;  %v10785_v4 = vld [vmem:[#allocation18 + $0x4b4] ss:$8 sps:$4 sm:$0xff]  }
 0x932   : > { %3714 = vst [vmem:[#allocation2 + $0x18] sm:$0xff] %v3710_v29  ;;  %v10780_v29 = vld [vmem:[#allocation18 + $0x3b0] ss:$8 sps:$4 sm:$0xff]  }
 0x939   : > { %v12996_v30 = vld [vmem:[#allocation2 + $0x1] ss:$8 sm:$0xf]  ;;  %v12998_v25 = vld [vmem:[#allocation2] ss:$8 sm:$0xf] }
 0x93a   : > { %v3815_v31 = vrot.slane %v12996_v30, %v12921_v59  ;;  %v3732_v28 = vrot.slane %v12998_v25, %v12986_v16  ;;  %v3811_v32 = vrot.slane %v12996_v30, %v12918_v57  ;;  %v3728_v33 = vrot.slane %v12998_v25, %v12983_v15  ;;  %v13008_v34 = vld [vmem:[#allocation2 + $0x2] ss:$8 sm:$0xf] }
 0x93b   : > { %v3823_v35 = vrot.slane %v12996_v30, %v12986_v16  ;;  %v4710_v36 = vrot.slane %v13008_v34, %v12921_v59 }
 0x93c   : > { %v3829_v37 = vpack.c.bf16 %v3815_v31, %v3815_v31  ;;  %v3740_v39 = vpack.c.bf16 %v3732_v28, %v3732_v28  ;;  %v3828_v43 = vpack.c.bf16 %v3811_v32, %v3811_v32  ;;  %v3739_v44 = vpack.c.bf16 %v3728_v33, %v3728_v33  ;;  %v10783_v31 = vld [vmem:[#allocation18 + $0x4b0] ss:$8 sps:$4 sm:$0xff]   ;;  %v10788_v28 = vld [vmem:[#allocation18 + $0x3c4] ss:$8 sps:$4 sm:$0xff]   ;;  %v10786_v33 = vld [vmem:[#allocation18 + $0x3c0] ss:$8 sps:$4 sm:$0xff]  }
 0x93d   : > { %v3831_v47 = vpack.c.bf16 %v3823_v35, %v3823_v35  ;;  %v4724_v48 = vpack.c.bf16 %v4710_v36, %v4710_v36  ;;  %v10791_v32 = vld [vmem:[#allocation18 + $0x4c4] ss:$8 sps:$4 sm:$0xff]   ;;  %v10789_v35 = vld [vmem:[#allocation18 + $0x4c0] ss:$8 sps:$4 sm:$0xff]   ;;  %v10794_v36 = vld [vmem:[#allocation18 + $0x3d4] ss:$8 sps:$4 sm:$0xff]  }
 0x93e   : > { %4248 = vmatprep.mubr.bf16.mxu0 %v3829_v37  ;;  %4691 = vmatprep.mubr.bf16.mxu1 %v3740_v39  ;;  %v10797_v37 = vld [vmem:[#allocation18 + $0x4d4] ss:$8 sps:$4 sm:$0xff]   ;;  %v10795_v39 = vld [vmem:[#allocation18 + $0x4d0] ss:$8 sps:$4 sm:$0xff]  }
 0x93f   : > { %4249 = vmatmul.mubr.bf16.vlgmr.msra.gmra.mrb[16].mxu0 %v3828_v43  ;;  %4692 = vmatmul.mubr.bf16.vlgmr.msra.gmra.mrb[16].mxu1 %v3739_v44  ;;  %v10803_v43 = vld [vmem:[#allocation18 + $0x4e4] ss:$8 sps:$4 sm:$0xff]   ;;  %v10798_v44 = vld [vmem:[#allocation18 + $0x3e0] ss:$8 sps:$4 sm:$0xff]  }
 0x940   : > { %4258 = vmatpush1.bf16.msra.mxu0 %v10714_v38  ;;  %5112 = vmatpush1.bf16.msra.mxu1 %v10717_v40  ;;  %v10792_v38 = vld [vmem:[#allocation18 + $0x3d0] ss:$8 sps:$4 sm:$0xff]   ;;  %v10800_v40 = vld [vmem:[#allocation18 + $0x3e4] ss:$8 sps:$4 sm:$0xff]  }
 0x941   : > { %4289 = vmatprep.mubr.bf16.mxu0 %v3831_v47  ;;  %5143 = vmatprep.mubr.bf16.mxu1 %v4724_v48  ;;  %v10809_v47 = vld [vmem:[#allocation18 + $0x4f4] ss:$8 sps:$4 sm:$0xff]   ;;  %v10804_v48 = vld [vmem:[#allocation18 + $0x3f0] ss:$8 sps:$4 sm:$0xff]  }
 0x942   : > { %4259 = vmatprep.subr.bf16.mxu0 %v10722_v45  ;;  %5113 = vmatprep.subr.bf16.mxu1 %v10725_v46  ;;  %v10801_v45 = vld [vmem:[#allocation18 + $0x4e0] ss:$8 sps:$4 sm:$0xff]   ;;  %v10806_v46 = vld [vmem:[#allocation18 + $0x3f4] ss:$8 sps:$4 sm:$0xff]  }
 0x944   : > { %4260 = vmatpush1.bf16.msra.mxu0 %v10720_v49  ;;  %5114 = vmatpush1.bf16.msra.mxu1 %v10723_v50  ;;  %v10807_v49 = vld [vmem:[#allocation18 + $0x4f0] ss:$8 sps:$4 sm:$0xff]   ;;  %v3819_v50 = vrot.slane %v12996_v30, %v12983_v15 }
 0x945   : > { %4261 = vmatprep.subr.bf16.mxu0 %v10728_v51  ;;  %5115 = vmatprep.subr.bf16.mxu1 %v10731_v52  ;;  %v10812_v51 = vld [vmem:[#allocation18 + $0x4] ss:$8 sps:$4 sm:$0xff]   ;;  %v4706_v52 = vrot.slane %v13008_v34, %v12918_v57 }
 0x948   : > { %4262 = vmatpush1.bf16.msra.mxu0 %v10726_v42  ;;  %5116 = vmatpush1.bf16.msra.mxu1 %v10729_v53  ;;  %v10815_v42 = vld [vmem:[#allocation18 + $0x504] ss:$8 sps:$4 sm:$0xff]   ;;  %v3724_v53 = vrot.slane %v12998_v25, %v12921_v59 }
 0x949   : > { %4263 = vmatprep.subr.bf16.mxu0 %v10734_v55  ;;  %5117 = vmatprep.subr.bf16.mxu1 %v10737_v41  ;;  %v4718_v55 = vrot.slane %v13008_v34, %v12986_v16  ;;  %v10810_v41 = vld [vmem:[#allocation18] ss:$8 sps:$4 sm:$0xff]  }
 0x94a   : > { %v3738_v30 = vpack.c.bf16 %v3724_v53, %v3724_v53  ;;  %v10888_v53 = vld [vmem:[#allocation18 + $0xd0] ss:$8 sps:$4 sm:$0xff]  }
 0x94c   : > { %4264 = vmatpush1.bf16.msra.mxu0 %v10732_v58  ;;  %5118 = vmatpush1.bf16.msra.mxu1 %v10735_v60  ;;  %v3830_v58 = vpack.c.bf16 %v3819_v50, %v3819_v50  ;;  %v4723_v60 = vpack.c.bf16 %v4706_v52, %v4706_v52  ;;  %v10882_v50 = vld [vmem:[#allocation18 + $0xc0] ss:$8 sps:$4 sm:$0xff]   ;;  %v10890_v52 = vld [vmem:[#allocation18 + $0xd4] ss:$8 sps:$4 sm:$0xff]  }
 0x94d   : > { %4265 = vmatprep.subr.bf16.mxu0 %v10740_v61  ;;  %5119 = vmatprep.subr.bf16.mxu1 %v10743_v62  ;;  %v10813_v61 = vld [vmem:[#allocation18 + $0x500] ss:$8 sps:$4 sm:$0xff]   ;;  %v10818_v62 = vld [vmem:[#allocation18 + $0x14] ss:$8 sps:$4 sm:$0xff]  }
 0x950   : > { %4266 = vmatpush1.bf16.msra.mxu0 %v10738_v63  ;;  %5120 = vmatpush1.bf16.msra.mxu1 %v10741_v6  ;;  %v10821_v63 = vld [vmem:[#allocation18 + $0x514] ss:$8 sps:$4 sm:$0xff]   ;;  %v4726_v6 = vpack.c.bf16 %v4718_v55, %v4718_v55  ;;  %v10891_v55 = vld [vmem:[#allocation18 + $0x5d0] ss:$8 sps:$4 sm:$0xff]  }
 0x951   : > { %4267 = vmatprep.subr.bf16.mxu0 %v10746_v0  ;;  %5121 = vmatprep.subr.bf16.mxu1 %v10749_v8  ;;  %v10816_v0 = vld [vmem:[#allocation18 + $0x10] ss:$8 sps:$4 sm:$0xff]  }
 0x952   : > { %v10819_v8 = vld [vmem:[#allocation18 + $0x510] ss:$8 sps:$4 sm:$0xff]  }
 0x954   : > { %4268 = vmatpush1.bf16.msra.mxu0 %v10744_v1  ;;  %5122 = vmatpush1.bf16.msra.mxu1 %v10747_v2  ;;  %v10824_v1 = vld [vmem:[#allocation18 + $0x24] ss:$8 sps:$4 sm:$0xff]  }
 0x955   : > { %4269 = vmatprep.subr.bf16.mxu0 %v10752_v3  ;;  %5123 = vmatprep.subr.bf16.mxu1 %v10755_v5  ;;  %v10827_v2 = vld [vmem:[#allocation18 + $0x524] ss:$8 sps:$4 sm:$0xff]   ;;  %v10822_v3 = vld [vmem:[#allocation18 + $0x20] ss:$8 sps:$4 sm:$0xff]  }
 0x956   : > { %v10825_v5 = vld [vmem:[#allocation18 + $0x520] ss:$8 sps:$4 sm:$0xff]  }
 0x958   : > { %4270 = vmatpush1.bf16.msra.mxu0 %v10750_v7  ;;  %5124 = vmatpush1.bf16.msra.mxu1 %v10753_v9  ;;  %v10830_v7 = vld [vmem:[#allocation18 + $0x34] ss:$8 sps:$4 sm:$0xff]  }
 0x959   : > { %4271 = vmatprep.subr.bf16.mxu0 %v10758_v10  ;;  %5125 = vmatprep.subr.bf16.mxu1 %v10761_v11  ;;  %v10833_v9 = vld [vmem:[#allocation18 + $0x534] ss:$8 sps:$4 sm:$0xff]   ;;  %v10828_v10 = vld [vmem:[#allocation18 + $0x30] ss:$8 sps:$4 sm:$0xff]  }
 0x95a   : > { %v10831_v11 = vld [vmem:[#allocation18 + $0x530] ss:$8 sps:$4 sm:$0xff]  }
 0x95c   : > { %4272 = vmatpush1.bf16.msra.mxu0 %v10756_v12  ;;  %5126 = vmatpush1.bf16.msra.mxu1 %v10759_v13  ;;  %v10836_v12 = vld [vmem:[#allocation18 + $0x44] ss:$8 sps:$4 sm:$0xff]  }
 0x95d   : > { %4273 = vmatprep.subr.bf16.mxu0 %v10764_v14  ;;  %5127 = vmatprep.subr.bf16.mxu1 %v10767_v18  ;;  %v10839_v13 = vld [vmem:[#allocation18 + $0x544] ss:$8 sps:$4 sm:$0xff]   ;;  %v10834_v14 = vld [vmem:[#allocation18 + $0x40] ss:$8 sps:$4 sm:$0xff]  }
 0x95e   : > { %v10837_v18 = vld [vmem:[#allocation18 + $0x540] ss:$8 sps:$4 sm:$0xff]  }
 0x960   : > { %4274 = vmatpush1.bf16.msra.mxu0 %v10762_v19  ;;  %5128 = vmatpush1.bf16.msra.mxu1 %v10765_v20  ;;  %v10842_v19 = vld [vmem:[#allocation18 + $0x54] ss:$8 sps:$4 sm:$0xff]  }
 0x961   : > { %4275 = vmatprep.subr.bf16.mxu0 %v10770_v21  ;;  %5129 = vmatprep.subr.bf16.mxu1 %v10773_v22  ;;  %v10845_v20 = vld [vmem:[#allocation18 + $0x554] ss:$8 sps:$4 sm:$0xff]   ;;  %v10840_v21 = vld [vmem:[#allocation18 + $0x50] ss:$8 sps:$4 sm:$0xff]  }
 0x962   : > { %v10843_v22 = vld [vmem:[#allocation18 + $0x550] ss:$8 sps:$4 sm:$0xff]  }
 0x964   : > { %4276 = vmatpush1.bf16.msra.mxu0 %v10768_v23  ;;  %5130 = vmatpush1.bf16.msra.mxu1 %v10771_v24  ;;  %v10848_v23 = vld [vmem:[#allocation18 + $0x64] ss:$8 sps:$4 sm:$0xff]  }
 0x965   : > { %4277 = vmatprep.subr.bf16.mxu0 %v10776_v54  ;;  %5131 = vmatprep.subr.bf16.mxu1 %v10779_v26  ;;  %v10851_v24 = vld [vmem:[#allocation18 + $0x564] ss:$8 sps:$4 sm:$0xff]   ;;  %v10846_v54 = vld [vmem:[#allocation18 + $0x60] ss:$8 sps:$4 sm:$0xff]  }
 0x966   : > { %v10849_v26 = vld [vmem:[#allocation18 + $0x560] ss:$8 sps:$4 sm:$0xff]  }
 0x968   : > { %4278 = vmatpush1.bf16.msra.mxu0 %v10774_v27  ;;  %5132 = vmatpush1.bf16.msra.mxu1 %v10777_v56  ;;  %v10854_v27 = vld [vmem:[#allocation18 + $0x74] ss:$8 sps:$4 sm:$0xff]  }
 0x969   : > { %4279 = vmatprep.subr.bf16.mxu0 %v10782_v17  ;;  %5133 = vmatprep.subr.bf16.mxu1 %v10785_v4  ;;  %v10857_v56 = vld [vmem:[#allocation18 + $0x574] ss:$8 sps:$4 sm:$0xff]   ;;  %v10852_v17 = vld [vmem:[#allocation18 + $0x70] ss:$8 sps:$4 sm:$0xff]  }
 0x96a   : > { %v10855_v4 = vld [vmem:[#allocation18 + $0x570] ss:$8 sps:$4 sm:$0xff]  }
 0x96c   : > { %4280 = vmatpush1.bf16.msra.mxu0 %v10780_v29  ;;  %5134 = vmatpush1.bf16.msra.mxu1 %v10783_v31  ;;  %v10860_v29 = vld [vmem:[#allocation18 + $0x84] ss:$8 sps:$4 sm:$0xff]  }
 0x96d   : > { %4281 = vmatprep.subr.bf16.mxu0 %v10788_v28  ;;  %5135 = vmatprep.subr.bf16.mxu1 %v10791_v32  ;;  %v10863_v31 = vld [vmem:[#allocation18 + $0x584] ss:$8 sps:$4 sm:$0xff]   ;;  %v10858_v28 = vld [vmem:[#allocation18 + $0x80] ss:$8 sps:$4 sm:$0xff]  }
 0x96e   : > { %v10861_v32 = vld [vmem:[#allocation18 + $0x580] ss:$8 sps:$4 sm:$0xff]  }
 0x970   : > { %4282 = vmatpush1.bf16.msra.mxu0 %v10786_v33  ;;  %5136 = vmatpush1.bf16.msra.mxu1 %v10789_v35  ;;  %v10866_v33 = vld [vmem:[#allocation18 + $0x94] ss:$8 sps:$4 sm:$0xff]  }
 0x971   : > { %4283 = vmatprep.subr.bf16.mxu0 %v10794_v36  ;;  %5137 = vmatprep.subr.bf16.mxu1 %v10797_v37  ;;  %v10869_v35 = vld [vmem:[#allocation18 + $0x594] ss:$8 sps:$4 sm:$0xff]   ;;  %v10864_v36 = vld [vmem:[#allocation18 + $0x90] ss:$8 sps:$4 sm:$0xff]  }
 0x972   : > { %v10867_v37 = vld [vmem:[#allocation18 + $0x590] ss:$8 sps:$4 sm:$0xff]  }
 0x974   : > { %4284 = vmatpush1.bf16.msra.mxu0 %v10792_v38  ;;  %5138 = vmatpush1.bf16.msra.mxu1 %v10795_v39  ;;  %v10872_v38 = vld [vmem:[#allocation18 + $0xa4] ss:$8 sps:$4 sm:$0xff]  }
 0x975   : > { %4285 = vmatprep.subr.bf16.mxu0 %v10800_v40  ;;  %5139 = vmatprep.subr.bf16.mxu1 %v10803_v43  ;;  %v10875_v39 = vld [vmem:[#allocation18 + $0x5a4] ss:$8 sps:$4 sm:$0xff]   ;;  %v10870_v40 = vld [vmem:[#allocation18 + $0xa0] ss:$8 sps:$4 sm:$0xff]  }
 0x976   : > { %v10873_v43 = vld [vmem:[#allocation18 + $0x5a0] ss:$8 sps:$4 sm:$0xff]  }
 0x978   : > { %4286 = vmatpush1.bf16.msra.mxu0 %v10798_v44  ;;  %5140 = vmatpush1.bf16.msra.mxu1 %v10801_v45  ;;  %v10878_v44 = vld [vmem:[#allocation18 + $0xb4] ss:$8 sps:$4 sm:$0xff]  }
 0x979   : > { %4287 = vmatprep.subr.bf16.mxu0 %v10806_v46  ;;  %5141 = vmatprep.subr.bf16.mxu1 %v10809_v47  ;;  %v10881_v45 = vld [vmem:[#allocation18 + $0x5b4] ss:$8 sps:$4 sm:$0xff]   ;;  %v10876_v46 = vld [vmem:[#allocation18 + $0xb0] ss:$8 sps:$4 sm:$0xff]  }
 0x97a   : > { %v10879_v47 = vld [vmem:[#allocation18 + $0x5b0] ss:$8 sps:$4 sm:$0xff]  }
 0x97c   : > { %4288 = vmatpush1.bf16.msra.mxu0 %v10804_v48  ;;  %5142 = vmatpush1.bf16.msra.mxu1 %v10807_v49  ;;  %v10884_v48 = vld [vmem:[#allocation18 + $0xc4] ss:$8 sps:$4 sm:$0xff]  }
 0x97d   : > { %4618 = vmatprep.subr.bf16.mxu0 %v10812_v51  ;;  %5152 = vmatprep.subr.bf16.mxu1 %v10815_v42  ;;  %v10887_v49 = vld [vmem:[#allocation18 + $0x5c4] ss:$8 sps:$4 sm:$0xff]   ;;  %v10885_v51 = vld [vmem:[#allocation18 + $0x5c0] ss:$8 sps:$4 sm:$0xff]   ;;  %v10893_v42 = vld [vmem:[#allocation18 + $0x5d4] ss:$8 sps:$4 sm:$0xff]  }
 0x97f   : > { %4290 = vmatmul.mubr.bf16.vlgmr.msra.gmra.mrb[16].mxu0 %v3830_v58  ;;  %5144 = vmatmul.mubr.bf16.vlgmr.msra.gmra.mrb[16].mxu1 %v4723_v60  ;;  %v10899_v58 = vld [vmem:[#allocation18 + $0x5e4] ss:$8 sps:$4 sm:$0xff]   ;;  %v10894_v60 = vld [vmem:[#allocation18 + $0xe0] ss:$8 sps:$4 sm:$0xff]  }
 0x980   : > { %4619 = vmatpush1.bf16.msra.mxu0 %v10810_v41  ;;  %4650 = vmatprep.mubr.bf16.mxu0 %v3738_v30  ;;  %v10896_v41 = vld [vmem:[#allocation18 + $0xe4] ss:$8 sps:$4 sm:$0xff]   ;;  %v10902_v30 = vld [vmem:[#allocation18 + $0xf4] ss:$8 sps:$4 sm:$0xff]  }
 0x981   : > { %5153 = vmatpush1.bf16.msra.mxu1 %v10813_v61  ;;  %5184 = vmatprep.mubr.bf16.mxu1 %v4726_v6  ;;  %v10897_v61 = vld [vmem:[#allocation18 + $0x5e0] ss:$8 sps:$4 sm:$0xff]  }
 0x982   : > { %4620 = vmatprep.subr.bf16.mxu0 %v10818_v62  ;;  %5154 = vmatprep.subr.bf16.mxu1 %v10821_v63  ;;  %v10905_v62 = vld [vmem:[#allocation18 + $0x5f4] ss:$8 sps:$4 sm:$0xff]   ;;  %v10900_v63 = vld [vmem:[#allocation18 + $0xf0] ss:$8 sps:$4 sm:$0xff]  }
 0x983   : > { %v13022_v6 = vld [vmem:[#allocation2 + $0x3] ss:$8 sm:$0xf] }
 0x984   : > { %4621 = vmatpush1.bf16.msra.mxu0 %v10816_v0  ;;  %v10903_v0 = vld [vmem:[#allocation18 + $0x5f0] ss:$8 sps:$4 sm:$0xff]  }
 0x985   : > { %5155 = vmatpush1.bf16.msra.mxu1 %v10819_v8  ;;  %4622 = vmatprep.subr.bf16.mxu0 %v10824_v1  ;;  %v3720_v8 = vrot.slane %v12998_v25, %v12918_v57  ;;  %v4714_v1 = vrot.slane %v13008_v34, %v12983_v15  ;;  %v10909_v25 = vld [vmem:[#allocation18 + $0x610] ss:$8 sps:$4 sm:$0xff]   ;;  %v10912_v34 = vld [vmem:[#allocation18 + $0x620] ss:$8 sps:$4 sm:$0xff]  }
 0x986   : > { %5156 = vmatprep.subr.bf16.mxu1 %v10827_v2  ;;  %v10908_v2 = vld [vmem:[#allocation18 + $0x604] ss:$8 sps:$4 sm:$0xff]  }
 0x988   : > { %4623 = vmatpush1.bf16.msra.mxu0 %v10822_v3  ;;  %v5205_v3 = vrot.slane %v13022_v6, %v12921_v59 }
 0x989   : > { %5157 = vmatpush1.bf16.msra.mxu1 %v10825_v5  ;;  %4624 = vmatprep.subr.bf16.mxu0 %v10830_v7  ;;  %v3737_v5 = vpack.c.bf16 %v3720_v8, %v3720_v8  ;;  %v10906_v7 = vld [vmem:[#allocation18 + $0x600] ss:$8 sps:$4 sm:$0xff]  }
 0x98a   : > { %5158 = vmatprep.subr.bf16.mxu1 %v10833_v9  ;;  %v4725_v9 = vpack.c.bf16 %v4714_v1, %v4714_v1  ;;  %v10978_v8 = vld [vmem:[#allocation18 + $0x780] ss:$8 sps:$4 sm:$0xff]   ;;  %v10983_v1 = vld [vmem:[#allocation18 + $0x794] ss:$8 sps:$4 sm:$0xff]  }
 0x98c   : > { %4625 = vmatpush1.bf16.msra.mxu0 %v10828_v10  ;;  %v10911_v10 = vld [vmem:[#allocation18 + $0x614] ss:$8 sps:$4 sm:$0xff]  }
 0x98d   : > { %5159 = vmatpush1.bf16.msra.mxu1 %v10831_v11  ;;  %4626 = vmatprep.subr.bf16.mxu0 %v10836_v12  ;;  %v5219_v11 = vpack.c.bf16 %v5205_v3, %v5205_v3  ;;  %v10914_v12 = vld [vmem:[#allocation18 + $0x624] ss:$8 sps:$4 sm:$0xff]  }
 0x98e   : > { %5160 = vmatprep.subr.bf16.mxu1 %v10839_v13  ;;  %v10917_v13 = vld [vmem:[#allocation18 + $0x634] ss:$8 sps:$4 sm:$0xff]   ;;  %v10986_v3 = vld [vmem:[#allocation18 + $0x7a4] ss:$8 sps:$4 sm:$0xff]  }
 0x990   : > { %4627 = vmatpush1.bf16.msra.mxu0 %v10834_v14  ;;  %v10915_v14 = vld [vmem:[#allocation18 + $0x630] ss:$8 sps:$4 sm:$0xff]  }
 0x991   : > { %5161 = vmatpush1.bf16.msra.mxu1 %v10837_v18  ;;  %4628 = vmatprep.subr.bf16.mxu0 %v10842_v19  ;;  %v10920_v18 = vld [vmem:[#allocation18 + $0x644] ss:$8 sps:$4 sm:$0xff]   ;;  %v10918_v19 = vld [vmem:[#allocation18 + $0x640] ss:$8 sps:$4 sm:$0xff]  }
 0x992   : > { %5162 = vmatprep.subr.bf16.mxu1 %v10845_v20  ;;  %v10923_v20 = vld [vmem:[#allocation18 + $0x654] ss:$8 sps:$4 sm:$0xff]  }
 0x994   : > { %4629 = vmatpush1.bf16.msra.mxu0 %v10840_v21  ;;  %v10921_v21 = vld [vmem:[#allocation18 + $0x650] ss:$8 sps:$4 sm:$0xff]  }
 0x995   : > { %5163 = vmatpush1.bf16.msra.mxu1 %v10843_v22  ;;  %4630 = vmatprep.subr.bf16.mxu0 %v10848_v23  ;;  %v10926_v22 = vld [vmem:[#allocation18 + $0x664] ss:$8 sps:$4 sm:$0xff]   ;;  %v10924_v23 = vld [vmem:[#allocation18 + $0x660] ss:$8 sps:$4 sm:$0xff]  }
 0x996   : > { %5164 = vmatprep.subr.bf16.mxu1 %v10851_v24  ;;  %v10929_v24 = vld [vmem:[#allocation18 + $0x674] ss:$8 sps:$4 sm:$0xff]  }
 0x998   : > { %4631 = vmatpush1.bf16.msra.mxu0 %v10846_v54  ;;  %v10927_v54 = vld [vmem:[#allocation18 + $0x670] ss:$8 sps:$4 sm:$0xff]  }
 0x999   : > { %5165 = vmatpush1.bf16.msra.mxu1 %v10849_v26  ;;  %4632 = vmatprep.subr.bf16.mxu0 %v10854_v27  ;;  %v10932_v26 = vld [vmem:[#allocation18 + $0x684] ss:$8 sps:$4 sm:$0xff]   ;;  %v10930_v27 = vld [vmem:[#allocation18 + $0x680] ss:$8 sps:$4 sm:$0xff]  }
 0x99a   : > { %5166 = vmatprep.subr.bf16.mxu1 %v10857_v56  ;;  %v10935_v56 = vld [vmem:[#allocation18 + $0x694] ss:$8 sps:$4 sm:$0xff]  }
 0x99c   : > { %4633 = vmatpush1.bf16.msra.mxu0 %v10852_v17  ;;  %v10933_v17 = vld [vmem:[#allocation18 + $0x690] ss:$8 sps:$4 sm:$0xff]  }
 0x99d   : > { %5167 = vmatpush1.bf16.msra.mxu1 %v10855_v4  ;;  %4634 = vmatprep.subr.bf16.mxu0 %v10860_v29  ;;  %v10938_v4 = vld [vmem:[#allocation18 + $0x6a4] ss:$8 sps:$4 sm:$0xff]   ;;  %v10936_v29 = vld [vmem:[#allocation18 + $0x6a0] ss:$8 sps:$4 sm:$0xff]  }
 0x99e   : > { %5168 = vmatprep.subr.bf16.mxu1 %v10863_v31  ;;  %v10941_v31 = vld [vmem:[#allocation18 + $0x6b4] ss:$8 sps:$4 sm:$0xff]  }
 0x9a0   : > { %4635 = vmatpush1.bf16.msra.mxu0 %v10858_v28  ;;  %v10939_v28 = vld [vmem:[#allocation18 + $0x6b0] ss:$8 sps:$4 sm:$0xff]  }
 0x9a1   : > { %5169 = vmatpush1.bf16.msra.mxu1 %v10861_v32  ;;  %4636 = vmatprep.subr.bf16.mxu0 %v10866_v33  ;;  %v10944_v32 = vld [vmem:[#allocation18 + $0x6c4] ss:$8 sps:$4 sm:$0xff]   ;;  %v10942_v33 = vld [vmem:[#allocation18 + $0x6c0] ss:$8 sps:$4 sm:$0xff]  }
 0x9a2   : > { %5170 = vmatprep.subr.bf16.mxu1 %v10869_v35  ;;  %v10947_v35 = vld [vmem:[#allocation18 + $0x6d4] ss:$8 sps:$4 sm:$0xff]  }
 0x9a4   : > { %4637 = vmatpush1.bf16.msra.mxu0 %v10864_v36  ;;  %v10945_v36 = vld [vmem:[#allocation18 + $0x6d0] ss:$8 sps:$4 sm:$0xff]  }
 0x9a5   : > { %5171 = vmatpush1.bf16.msra.mxu1 %v10867_v37  ;;  %4638 = vmatprep.subr.bf16.mxu0 %v10872_v38  ;;  %v10950_v37 = vld [vmem:[#allocation18 + $0x6e4] ss:$8 sps:$4 sm:$0xff]   ;;  %v10948_v38 = vld [vmem:[#allocation18 + $0x6e0] ss:$8 sps:$4 sm:$0xff]  }
 0x9a6   : > { %5172 = vmatprep.subr.bf16.mxu1 %v10875_v39  ;;  %v10953_v39 = vld [vmem:[#allocation18 + $0x6f4] ss:$8 sps:$4 sm:$0xff]  }
 0x9a8   : > { %4639 = vmatpush1.bf16.msra.mxu0 %v10870_v40  ;;  %v10951_v40 = vld [vmem:[#allocation18 + $0x6f0] ss:$8 sps:$4 sm:$0xff]  }
 0x9a9   : > { %5173 = vmatpush1.bf16.msra.mxu1 %v10873_v43  ;;  %4640 = vmatprep.subr.bf16.mxu0 %v10878_v44  ;;  %v5201_v43 = vrot.slane %v13022_v6, %v12918_v57  ;;  %v10956_v44 = vld [vmem:[#allocation18 + $0x704] ss:$8 sps:$4 sm:$0xff]  }
 0x9aa   : > { %5174 = vmatprep.subr.bf16.mxu1 %v10881_v45  ;;  %v5213_v45 = vrot.slane %v13022_v6, %v12986_v16 }
 0x9ac   : > { %4641 = vmatpush1.bf16.msra.mxu0 %v10876_v46  ;;  %v10954_v46 = vld [vmem:[#allocation18 + $0x700] ss:$8 sps:$4 sm:$0xff]  }
 0x9ad   : > { %5175 = vmatpush1.bf16.msra.mxu1 %v10879_v47  ;;  %4642 = vmatprep.subr.bf16.mxu0 %v10884_v48  ;;  %v5218_v47 = vpack.c.bf16 %v5201_v43, %v5201_v43  ;;  %v10959_v48 = vld [vmem:[#allocation18 + $0x714] ss:$8 sps:$4 sm:$0xff]   ;;  %v11029_v43 = vld [vmem:[#allocation18 + $0x890] ss:$8 sps:$4 sm:$0xff]  }
 0x9ae   : > { %5176 = vmatprep.subr.bf16.mxu1 %v10887_v49  ;;  %v5221_v49 = vpack.c.bf16 %v5213_v45, %v5213_v45  ;;  %v11032_v45 = vld [vmem:[#allocation18 + $0x8a0] ss:$8 sps:$4 sm:$0xff]  }
 0x9b0   : > { %4643 = vmatpush1.bf16.msra.mxu0 %v10882_v50  ;;  %v10957_v50 = vld [vmem:[#allocation18 + $0x710] ss:$8 sps:$4 sm:$0xff]  }
 0x9b1   : > { %5177 = vmatpush1.bf16.msra.mxu1 %v10885_v51  ;;  %4644 = vmatprep.subr.bf16.mxu0 %v10890_v52  ;;  %v10962_v51 = vld [vmem:[#allocation18 + $0x724] ss:$8 sps:$4 sm:$0xff]   ;;  %v10960_v52 = vld [vmem:[#allocation18 + $0x720] ss:$8 sps:$4 sm:$0xff]  }
 0x9b2   : > { %5178 = vmatprep.subr.bf16.mxu1 %v10893_v42  ;;  %v10965_v42 = vld [vmem:[#allocation18 + $0x734] ss:$8 sps:$4 sm:$0xff]  }
 0x9b4   : > { %4645 = vmatpush1.bf16.msra.mxu0 %v10888_v53  ;;  %v10963_v53 = vld [vmem:[#allocation18 + $0x730] ss:$8 sps:$4 sm:$0xff]  }
 0x9b5   : > { %5179 = vmatpush1.bf16.msra.mxu1 %v10891_v55  ;;  %4646 = vmatprep.subr.bf16.mxu0 %v10896_v41  ;;  %v10968_v55 = vld [vmem:[#allocation18 + $0x744] ss:$8 sps:$4 sm:$0xff]   ;;  %v10966_v41 = vld [vmem:[#allocation18 + $0x740] ss:$8 sps:$4 sm:$0xff]  }
 0x9b6   : > { %5180 = vmatprep.subr.bf16.mxu1 %v10899_v58  ;;  %v10971_v58 = vld [vmem:[#allocation18 + $0x754] ss:$8 sps:$4 sm:$0xff]  }
 0x9b8   : > { %4647 = vmatpush1.bf16.msra.mxu0 %v10894_v60  ;;  %v10969_v60 = vld [vmem:[#allocation18 + $0x750] ss:$8 sps:$4 sm:$0xff]  }
 0x9b9   : > { %5181 = vmatpush1.bf16.msra.mxu1 %v10897_v61  ;;  %4648 = vmatprep.subr.bf16.mxu0 %v10902_v30  ;;  %v10974_v61 = vld [vmem:[#allocation18 + $0x764] ss:$8 sps:$4 sm:$0xff]   ;;  %v10972_v30 = vld [vmem:[#allocation18 + $0x760] ss:$8 sps:$4 sm:$0xff]  }
 0x9ba   : > { %5182 = vmatprep.subr.bf16.mxu1 %v10905_v62  ;;  %v10977_v62 = vld [vmem:[#allocation18 + $0x774] ss:$8 sps:$4 sm:$0xff]  }
 0x9bc   : > { %4649 = vmatpush1.bf16.msra.mxu0 %v10900_v63  ;;  %v10975_v63 = vld [vmem:[#allocation18 + $0x770] ss:$8 sps:$4 sm:$0xff]  }
 0x9bd   : > { %5183 = vmatpush1.bf16.msra.mxu1 %v10903_v0  ;;  %v10980_v0 = vld [vmem:[#allocation18 + $0x784] ss:$8 sps:$4 sm:$0xff]  }
 0x9be   : > { %5606 = vmatprep.subr.bf16.mxu1 %v10908_v2  ;;  %v10981_v2 = vld [vmem:[#allocation18 + $0x790] ss:$8 sps:$4 sm:$0xff]  }
 0x9bf   : > { %4651 = vmatmul.mubr.bf16.vlgmr.msra.gmra.mrb[16].mxu0 %v3737_v5  ;;  %v10984_v5 = vld [vmem:[#allocation18 + $0x7a0] ss:$8 sps:$4 sm:$0xff]  }
 0x9c0   : > { %5185 = vmatmul.mubr.bf16.vlgmr.msra.gmra.mrb[16].mxu1 %v4725_v9  ;;  %v10987_v9 = vld [vmem:[#allocation18 + $0x7b0] ss:$8 sps:$4 sm:$0xff]  }
 0x9c1   : > { %5607 = vmatpush1.bf16.msra.mxu1 %v10906_v7  ;;  %5638 = vmatprep.mubr.bf16.mxu1 %v5219_v11  ;;  %v10989_v7 = vld [vmem:[#allocation18 + $0x7b4] ss:$8 sps:$4 sm:$0xff]   ;;  %v10990_v11 = vld [vmem:[#allocation18 + $0x7c0] ss:$8 sps:$4 sm:$0xff]  }
 0x9c2   : > { %5608 = vmatprep.subr.bf16.mxu1 %v10911_v10  ;;  %v10992_v10 = vld [vmem:[#allocation18 + $0x7c4] ss:$8 sps:$4 sm:$0xff]  }
 0x9c5   : > { %5609 = vmatpush1.bf16.msra.mxu1 %v10909_v25  ;;  %v10995_v25 = vld [vmem:[#allocation18 + $0x7d4] ss:$8 sps:$4 sm:$0xff]  }
 0x9c6   : > { %5610 = vmatprep.subr.bf16.mxu1 %v10914_v12  ;;  %v10993_v12 = vld [vmem:[#allocation18 + $0x7d0] ss:$8 sps:$4 sm:$0xff]  }
 0x9c9   : > { %5611 = vmatpush1.bf16.msra.mxu1 %v10912_v34  ;;  %v10998_v34 = vld [vmem:[#allocation18 + $0x7e4] ss:$8 sps:$4 sm:$0xff]  }
 0x9ca   : > { %5612 = vmatprep.subr.bf16.mxu1 %v10917_v13  ;;  %v10996_v13 = vld [vmem:[#allocation18 + $0x7e0] ss:$8 sps:$4 sm:$0xff]  }
 0x9cd   : > { %5613 = vmatpush1.bf16.msra.mxu1 %v10915_v14  ;;  %v11001_v14 = vld [vmem:[#allocation18 + $0x7f4] ss:$8 sps:$4 sm:$0xff]  }
 0x9ce   : > { %5614 = vmatprep.subr.bf16.mxu1 %v10920_v18  ;;  %v13034_v18 = vld [vmem:[#allocation2 + $0x4] ss:$8 sm:$0xf] }
 0x9d1   : > { %5615 = vmatpush1.bf16.msra.mxu1 %v10918_v19  ;;  %v10999_v19 = vld [vmem:[#allocation18 + $0x7f0] ss:$8 sps:$4 sm:$0xff]  }
 0x9d2   : > { %5616 = vmatprep.subr.bf16.mxu1 %v10923_v20  ;;  %v5209_v20 = vrot.slane %v13022_v6, %v12983_v15  ;;  %v11013_v6 = vld [vmem:[#allocation18 + $0x834] ss:$8 sps:$4 sm:$0xff]  }
 0x9d5   : > { %5617 = vmatpush1.bf16.msra.mxu1 %v10921_v21  ;;  %v11004_v21 = vld [vmem:[#allocation18 + $0x804] ss:$8 sps:$4 sm:$0xff]  }
 0x9d6   : > { %5618 = vmatprep.subr.bf16.mxu1 %v10926_v22  ;;  %v5700_v22 = vrot.slane %v13034_v18, %v12921_v59 }
 0x9d9   : > { %5619 = vmatpush1.bf16.msra.mxu1 %v10924_v23  ;;  %v11002_v23 = vld [vmem:[#allocation18 + $0x800] ss:$8 sps:$4 sm:$0xff]  }
 0x9da   : > { %5620 = vmatprep.subr.bf16.mxu1 %v10929_v24  ;;  %v5220_v24 = vpack.c.bf16 %v5209_v20, %v5209_v20  ;;  %v11071_v20 = vld [vmem:[#allocation18 + $0x970] ss:$8 sps:$4 sm:$0xff]  }
 0x9dd   : > { %5621 = vmatpush1.bf16.msra.mxu1 %v10927_v54  ;;  %v11007_v54 = vld [vmem:[#allocation18 + $0x814] ss:$8 sps:$4 sm:$0xff]  }
 0x9de   : > { %5622 = vmatprep.subr.bf16.mxu1 %v10932_v26  ;;  %v5714_v26 = vpack.c.bf16 %v5700_v22, %v5700_v22  ;;  %v11074_v22 = vld [vmem:[#allocation18 + $0x980] ss:$8 sps:$4 sm:$0xff]  }
 0x9e1   : > { %5623 = vmatpush1.bf16.msra.mxu1 %v10930_v27  ;;  %v11005_v27 = vld [vmem:[#allocation18 + $0x810] ss:$8 sps:$4 sm:$0xff]  }
 0x9e2   : > { %5624 = vmatprep.subr.bf16.mxu1 %v10935_v56  ;;  %v11010_v56 = vld [vmem:[#allocation18 + $0x824] ss:$8 sps:$4 sm:$0xff]  }
 0x9e5   : > { %5625 = vmatpush1.bf16.msra.mxu1 %v10933_v17  ;;  %v11008_v17 = vld [vmem:[#allocation18 + $0x820] ss:$8 sps:$4 sm:$0xff]  }
 0x9e6   : > { %5626 = vmatprep.subr.bf16.mxu1 %v10938_v4  ;;  %v11011_v4 = vld [vmem:[#allocation18 + $0x830] ss:$8 sps:$4 sm:$0xff]  }
 0x9e9   : > { %5627 = vmatpush1.bf16.msra.mxu1 %v10936_v29  ;;  %v11016_v29 = vld [vmem:[#allocation18 + $0x844] ss:$8 sps:$4 sm:$0xff]  }
 0x9ea   : > { %5628 = vmatprep.subr.bf16.mxu1 %v10941_v31  ;;  %v11014_v31 = vld [vmem:[#allocation18 + $0x840] ss:$8 sps:$4 sm:$0xff]  }
 0x9ed   : > { %5629 = vmatpush1.bf16.msra.mxu1 %v10939_v28  ;;  %v11019_v28 = vld [vmem:[#allocation18 + $0x854] ss:$8 sps:$4 sm:$0xff]  }
 0x9ee   : > { %5630 = vmatprep.subr.bf16.mxu1 %v10944_v32  ;;  %v11017_v32 = vld [vmem:[#allocation18 + $0x850] ss:$8 sps:$4 sm:$0xff]  }
 0x9f1   : > { %5631 = vmatpush1.bf16.msra.mxu1 %v10942_v33  ;;  %v11022_v33 = vld [vmem:[#allocation18 + $0x864] ss:$8 sps:$4 sm:$0xff]  }
 0x9f2   : > { %5632 = vmatprep.subr.bf16.mxu1 %v10947_v35  ;;  %v11020_v35 = vld [vmem:[#allocation18 + $0x860] ss:$8 sps:$4 sm:$0xff]  }
 0x9f5   : > { %5633 = vmatpush1.bf16.msra.mxu1 %v10945_v36  ;;  %v11025_v36 = vld [vmem:[#allocation18 + $0x874] ss:$8 sps:$4 sm:$0xff]  }
 0x9f6   : > { %5634 = vmatprep.subr.bf16.mxu1 %v10950_v37  ;;  %v11023_v37 = vld [vmem:[#allocation18 + $0x870] ss:$8 sps:$4 sm:$0xff]  }
 0x9f9   : > { %5635 = vmatpush1.bf16.msra.mxu1 %v10948_v38  ;;  %v11028_v38 = vld [vmem:[#allocation18 + $0x884] ss:$8 sps:$4 sm:$0xff]  }
 0x9fa   : > { %5636 = vmatprep.subr.bf16.mxu1 %v10953_v39  ;;  %v11026_v39 = vld [vmem:[#allocation18 + $0x880] ss:$8 sps:$4 sm:$0xff]  }
 0x9fd   : > { %5637 = vmatpush1.bf16.msra.mxu1 %v10951_v40  ;;  %v11031_v40 = vld [vmem:[#allocation18 + $0x894] ss:$8 sps:$4 sm:$0xff]  }
 0x9fe   : > { %5647 = vmatprep.subr.bf16.mxu1 %v10956_v44  ;;  %v11034_v44 = vld [vmem:[#allocation18 + $0x8a4] ss:$8 sps:$4 sm:$0xff]  }
 0xa00   : > { %5639 = vmatmul.mubr.bf16.vlgmr.msra.gmra.mrb[16].mxu1 %v5218_v47  ;;  %v11035_v47 = vld [vmem:[#allocation18 + $0x8b0] ss:$8 sps:$4 sm:$0xff]  }
 0xa01   : > { %5648 = vmatpush1.bf16.msra.mxu1 %v10954_v46  ;;  %5679 = vmatprep.mubr.bf16.mxu1 %v5221_v49  ;;  %v11037_v46 = vld [vmem:[#allocation18 + $0x8b4] ss:$8 sps:$4 sm:$0xff]   ;;  %v11038_v49 = vld [vmem:[#allocation18 + $0x8c0] ss:$8 sps:$4 sm:$0xff]  }
 0xa02   : > { %5649 = vmatprep.subr.bf16.mxu1 %v10959_v48  ;;  %v11040_v48 = vld [vmem:[#allocation18 + $0x8c4] ss:$8 sps:$4 sm:$0xff]  }
 0xa05   : > { %5650 = vmatpush1.bf16.msra.mxu1 %v10957_v50  ;;  %v11043_v50 = vld [vmem:[#allocation18 + $0x8d4] ss:$8 sps:$4 sm:$0xff]  }
 0xa06   : > { %5651 = vmatprep.subr.bf16.mxu1 %v10962_v51  ;;  %v11041_v51 = vld [vmem:[#allocation18 + $0x8d0] ss:$8 sps:$4 sm:$0xff]  }
 0xa09   : > { %5652 = vmatpush1.bf16.msra.mxu1 %v10960_v52  ;;  %v11046_v52 = vld [vmem:[#allocation18 + $0x8e4] ss:$8 sps:$4 sm:$0xff]  }
 0xa0a   : > { %5653 = vmatprep.subr.bf16.mxu1 %v10965_v42  ;;  %v11044_v42 = vld [vmem:[#allocation18 + $0x8e0] ss:$8 sps:$4 sm:$0xff]  }
 0xa0d   : > { %5654 = vmatpush1.bf16.msra.mxu1 %v10963_v53  ;;  %v11049_v53 = vld [vmem:[#allocation18 + $0x8f4] ss:$8 sps:$4 sm:$0xff]  }
 0xa0e   : > { %5655 = vmatprep.subr.bf16.mxu1 %v10968_v55  ;;  %v11047_v55 = vld [vmem:[#allocation18 + $0x8f0] ss:$8 sps:$4 sm:$0xff]  }
 0xa11   : > { %5656 = vmatpush1.bf16.msra.mxu1 %v10966_v41  ;;  %v5696_v41 = vrot.slane %v13034_v18, %v12918_v57 }
 0xa12   : > { %5657 = vmatprep.subr.bf16.mxu1 %v10971_v58  ;;  %v11052_v58 = vld [vmem:[#allocation18 + $0x904] ss:$8 sps:$4 sm:$0xff]  }
 0xa15   : > { %5658 = vmatpush1.bf16.msra.mxu1 %v10969_v60  ;;  %v5708_v60 = vrot.slane %v13034_v18, %v12986_v16 }
 0xa16   : > { %5659 = vmatprep.subr.bf16.mxu1 %v10974_v61  ;;  %v11050_v61 = vld [vmem:[#allocation18 + $0x900] ss:$8 sps:$4 sm:$0xff]  }
 0xa19   : > { %5660 = vmatpush1.bf16.msra.mxu1 %v10972_v30  ;;  %v5713_v30 = vpack.c.bf16 %v5696_v41, %v5696_v41  ;;  %v11119_v41 = vld [vmem:[#allocation18 + $0xa70] ss:$8 sps:$4 sm:$0xff]  }
 0xa1a   : > { %5661 = vmatprep.subr.bf16.mxu1 %v10977_v62  ;;  %v11055_v62 = vld [vmem:[#allocation18 + $0x914] ss:$8 sps:$4 sm:$0xff]  }
 0xa1d   : > { %5662 = vmatpush1.bf16.msra.mxu1 %v10975_v63  ;;  %v5716_v63 = vpack.c.bf16 %v5708_v60, %v5708_v60  ;;  %v11122_v60 = vld [vmem:[#allocation18 + $0xa80] ss:$8 sps:$4 sm:$0xff]  }
 0xa1e   : > { %5663 = vmatprep.subr.bf16.mxu1 %v10980_v0  ;;  %v11053_v0 = vld [vmem:[#allocation18 + $0x910] ss:$8 sps:$4 sm:$0xff]  }
 0xa21   : > { %5664 = vmatpush1.bf16.msra.mxu1 %v10978_v8  ;;  %v11058_v8 = vld [vmem:[#allocation18 + $0x924] ss:$8 sps:$4 sm:$0xff]  }
 0xa22   : > { %5665 = vmatprep.subr.bf16.mxu1 %v10983_v1  ;;  %v11056_v1 = vld [vmem:[#allocation18 + $0x920] ss:$8 sps:$4 sm:$0xff]  }
 0xa25   : > { %5666 = vmatpush1.bf16.msra.mxu1 %v10981_v2  ;;  %v11061_v2 = vld [vmem:[#allocation18 + $0x934] ss:$8 sps:$4 sm:$0xff]  }
 0xa26   : > { %5667 = vmatprep.subr.bf16.mxu1 %v10986_v3  ;;  %v11059_v3 = vld [vmem:[#allocation18 + $0x930] ss:$8 sps:$4 sm:$0xff]  }
 0xa29   : > { %5668 = vmatpush1.bf16.msra.mxu1 %v10984_v5  ;;  %v11064_v5 = vld [vmem:[#allocation18 + $0x944] ss:$8 sps:$4 sm:$0xff]  }
 0xa2a   : > { %5669 = vmatprep.subr.bf16.mxu1 %v10989_v7  ;;  %v11062_v7 = vld [vmem:[#allocation18 + $0x940] ss:$8 sps:$4 sm:$0xff]  }
 0xa2d   : > { %5670 = vmatpush1.bf16.msra.mxu1 %v10987_v9  ;;  %v11067_v9 = vld [vmem:[#allocation18 + $0x954] ss:$8 sps:$4 sm:$0xff]  }
 0xa2e   : > { %5671 = vmatprep.subr.bf16.mxu1 %v10992_v10  ;;  %v11065_v10 = vld [vmem:[#allocation18 + $0x950] ss:$8 sps:$4 sm:$0xff]  }
 0xa31   : > { %5672 = vmatpush1.bf16.msra.mxu1 %v10990_v11 }
 0xa32   : > { %5673 = vmatprep.subr.bf16.mxu1 %v10995_v25  ;;  %v11070_v25 = vld [vmem:[#allocation18 + $0x964] ss:$8 sps:$4 sm:$0xff]  }
 0xa35   : > { %5674 = vmatpush1.bf16.msra.mxu1 %v10993_v12 }
 0xa36   : > { %5675 = vmatprep.subr.bf16.mxu1 %v10998_v34 }
 0xa39   : > { %5676 = vmatpush1.bf16.msra.mxu1 %v10996_v13 }
 0xa3a   : > { %5677 = vmatprep.subr.bf16.mxu1 %v11001_v14  ;;  %v11068_v14 = vld [vmem:[#allocation18 + $0x960] ss:$8 sps:$4 sm:$0xff]  }
 0xa3d   : > { %5678 = vmatpush1.bf16.msra.mxu1 %v10999_v19  ;;  %v11073_v19 = vld [vmem:[#allocation18 + $0x974] ss:$8 sps:$4 sm:$0xff]  }
 0xa3e   : > { %6101 = vmatprep.subr.bf16.mxu1 %v11004_v21  ;;  %v11076_v21 = vld [vmem:[#allocation18 + $0x984] ss:$8 sps:$4 sm:$0xff]  }
 0xa40   : > { %5680 = vmatmul.mubr.bf16.vlgmr.msra.gmra.mrb[16].mxu1 %v5220_v24  ;;  %v11077_v24 = vld [vmem:[#allocation18 + $0x990] ss:$8 sps:$4 sm:$0xff]  }
 0xa41   : > { %6102 = vmatpush1.bf16.msra.mxu1 %v11002_v23  ;;  %6133 = vmatprep.mubr.bf16.mxu1 %v5714_v26  ;;  %v11079_v23 = vld [vmem:[#allocation18 + $0x994] ss:$8 sps:$4 sm:$0xff]   ;;  %v11080_v26 = vld [vmem:[#allocation18 + $0x9a0] ss:$8 sps:$4 sm:$0xff]  }
 0xa42   : > { %6103 = vmatprep.subr.bf16.mxu1 %v11007_v54  ;;  %v11082_v54 = vld [vmem:[#allocation18 + $0x9a4] ss:$8 sps:$4 sm:$0xff]  }
 0xa45   : > { %6104 = vmatpush1.bf16.msra.mxu1 %v11005_v27  ;;  %v11085_v27 = vld [vmem:[#allocation18 + $0x9b4] ss:$8 sps:$4 sm:$0xff]  }
 0xa46   : > { %6105 = vmatprep.subr.bf16.mxu1 %v11010_v56  ;;  %v11083_v56 = vld [vmem:[#allocation18 + $0x9b0] ss:$8 sps:$4 sm:$0xff]  }
 0xa49   : > { %6106 = vmatpush1.bf16.msra.mxu1 %v11008_v17  ;;  %v11088_v17 = vld [vmem:[#allocation18 + $0x9c4] ss:$8 sps:$4 sm:$0xff]  }
 0xa4a   : > { %6107 = vmatprep.subr.bf16.mxu1 %v11013_v6  ;;  %v11086_v6 = vld [vmem:[#allocation18 + $0x9c0] ss:$8 sps:$4 sm:$0xff]  }
 0xa4d   : > { %6108 = vmatpush1.bf16.msra.mxu1 %v11011_v4  ;;  %v11091_v4 = vld [vmem:[#allocation18 + $0x9d4] ss:$8 sps:$4 sm:$0xff]  }
 0xa4e   : > { %6109 = vmatprep.subr.bf16.mxu1 %v11016_v29  ;;  %v11089_v29 = vld [vmem:[#allocation18 + $0x9d0] ss:$8 sps:$4 sm:$0xff]  }
 0xa51   : > { %6110 = vmatpush1.bf16.msra.mxu1 %v11014_v31  ;;  %v11094_v31 = vld [vmem:[#allocation18 + $0x9e4] ss:$8 sps:$4 sm:$0xff]  }
 0xa52   : > { %6111 = vmatprep.subr.bf16.mxu1 %v11019_v28  ;;  %v11092_v28 = vld [vmem:[#allocation18 + $0x9e0] ss:$8 sps:$4 sm:$0xff]  }
 0xa55   : > { %6112 = vmatpush1.bf16.msra.mxu1 %v11017_v32  ;;  %v11097_v32 = vld [vmem:[#allocation18 + $0x9f4] ss:$8 sps:$4 sm:$0xff]  }
 0xa56   : > { %6113 = vmatprep.subr.bf16.mxu1 %v11022_v33  ;;  %v13048_v33 = vld [vmem:[#allocation2 + $0x5] ss:$8 sm:$0xf] }
 0xa59   : > { %6114 = vmatpush1.bf16.msra.mxu1 %v11020_v35  ;;  %v11095_v35 = vld [vmem:[#allocation18 + $0x9f0] ss:$8 sps:$4 sm:$0xff]  }
 0xa5a   : > { %6115 = vmatprep.subr.bf16.mxu1 %v11025_v36  ;;  %v5704_v36 = vrot.slane %v13034_v18, %v12983_v15  ;;  %v11109_v18 = vld [vmem:[#allocation18 + $0xa34] ss:$8 sps:$4 sm:$0xff]  }
 0xa5d   : > { %6116 = vmatpush1.bf16.msra.mxu1 %v11023_v37  ;;  %v11100_v37 = vld [vmem:[#allocation18 + $0xa04] ss:$8 sps:$4 sm:$0xff]  }
 0xa5e   : > { %6117 = vmatprep.subr.bf16.mxu1 %v11028_v38  ;;  %v6195_v38 = vrot.slane %v13048_v33, %v12921_v59 }
 0xa61   : > { %6118 = vmatpush1.bf16.msra.mxu1 %v11026_v39  ;;  %v11098_v39 = vld [vmem:[#allocation18 + $0xa00] ss:$8 sps:$4 sm:$0xff]  }
 0xa62   : > { %6119 = vmatprep.subr.bf16.mxu1 %v11031_v40  ;;  %v5715_v40 = vpack.c.bf16 %v5704_v36, %v5704_v36  ;;  %v11170_v36 = vld [vmem:[#allocation18 + $0xb80] ss:$8 sps:$4 sm:$0xff]  }
 0xa65   : > { %6120 = vmatpush1.bf16.msra.mxu1 %v11029_v43  ;;  %v11103_v43 = vld [vmem:[#allocation18 + $0xa14] ss:$8 sps:$4 sm:$0xff]  }
 0xa66   : > { %6121 = vmatprep.subr.bf16.mxu1 %v11034_v44  ;;  %v6209_v44 = vpack.c.bf16 %v6195_v38, %v6195_v38  ;;  %v11173_v38 = vld [vmem:[#allocation18 + $0xb90] ss:$8 sps:$4 sm:$0xff]  }
 0xa69   : > { %6122 = vmatpush1.bf16.msra.mxu1 %v11032_v45  ;;  %v11101_v45 = vld [vmem:[#allocation18 + $0xa10] ss:$8 sps:$4 sm:$0xff]  }
 0xa6a   : > { %6123 = vmatprep.subr.bf16.mxu1 %v11037_v46  ;;  %v11106_v46 = vld [vmem:[#allocation18 + $0xa24] ss:$8 sps:$4 sm:$0xff]  }
 0xa6d   : > { %6124 = vmatpush1.bf16.msra.mxu1 %v11035_v47  ;;  %v11104_v47 = vld [vmem:[#allocation18 + $0xa20] ss:$8 sps:$4 sm:$0xff]  }
 0xa6e   : > { %6125 = vmatprep.subr.bf16.mxu1 %v11040_v48  ;;  %v11107_v48 = vld [vmem:[#allocation18 + $0xa30] ss:$8 sps:$4 sm:$0xff]  }
 0xa71   : > { %6126 = vmatpush1.bf16.msra.mxu1 %v11038_v49  ;;  %v11112_v49 = vld [vmem:[#allocation18 + $0xa44] ss:$8 sps:$4 sm:$0xff]  }
 0xa72   : > { %6127 = vmatprep.subr.bf16.mxu1 %v11043_v50  ;;  %v11110_v50 = vld [vmem:[#allocation18 + $0xa40] ss:$8 sps:$4 sm:$0xff]  }
 0xa75   : > { %6128 = vmatpush1.bf16.msra.mxu1 %v11041_v51  ;;  %v11115_v51 = vld [vmem:[#allocation18 + $0xa54] ss:$8 sps:$4 sm:$0xff]  }
 0xa76   : > { %6129 = vmatprep.subr.bf16.mxu1 %v11046_v52  ;;  %v11113_v52 = vld [vmem:[#allocation18 + $0xa50] ss:$8 sps:$4 sm:$0xff]  }
 0xa79   : > { %6130 = vmatpush1.bf16.msra.mxu1 %v11044_v42  ;;  %v11118_v42 = vld [vmem:[#allocation18 + $0xa64] ss:$8 sps:$4 sm:$0xff]  }
 0xa7a   : > { %6131 = vmatprep.subr.bf16.mxu1 %v11049_v53  ;;  %v11116_v53 = vld [vmem:[#allocation18 + $0xa60] ss:$8 sps:$4 sm:$0xff]  }
 0xa7d   : > { %6132 = vmatpush1.bf16.msra.mxu1 %v11047_v55  ;;  %v11121_v55 = vld [vmem:[#allocation18 + $0xa74] ss:$8 sps:$4 sm:$0xff]  }
 0xa7e   : > { %6142 = vmatprep.subr.bf16.mxu1 %v11052_v58  ;;  %v11124_v58 = vld [vmem:[#allocation18 + $0xa84] ss:$8 sps:$4 sm:$0xff]  }
 0xa80   : > { %6134 = vmatmul.mubr.bf16.vlgmr.msra.gmra.mrb[16].mxu1 %v5713_v30  ;;  %v11125_v30 = vld [vmem:[#allocation18 + $0xa90] ss:$8 sps:$4 sm:$0xff]  }
 0xa81   : > { %6143 = vmatpush1.bf16.msra.mxu1 %v11050_v61  ;;  %6174 = vmatprep.mubr.bf16.mxu1 %v5716_v63  ;;  %v11127_v61 = vld [vmem:[#allocation18 + $0xa94] ss:$8 sps:$4 sm:$0xff]   ;;  %v11128_v63 = vld [vmem:[#allocation18 + $0xaa0] ss:$8 sps:$4 sm:$0xff]  }
 0xa82   : > { %6144 = vmatprep.subr.bf16.mxu1 %v11055_v62  ;;  %v11130_v62 = vld [vmem:[#allocation18 + $0xaa4] ss:$8 sps:$4 sm:$0xff]  }
 0xa85   : > { %6145 = vmatpush1.bf16.msra.mxu1 %v11053_v0  ;;  %v11133_v0 = vld [vmem:[#allocation18 + $0xab4] ss:$8 sps:$4 sm:$0xff]  }
 0xa86   : > { %6146 = vmatprep.subr.bf16.mxu1 %v11058_v8  ;;  %v11131_v8 = vld [vmem:[#allocation18 + $0xab0] ss:$8 sps:$4 sm:$0xff]  }
 0xa89   : > { %6147 = vmatpush1.bf16.msra.mxu1 %v11056_v1  ;;  %v11136_v1 = vld [vmem:[#allocation18 + $0xac4] ss:$8 sps:$4 sm:$0xff]  }
 0xa8a   : > { %6148 = vmatprep.subr.bf16.mxu1 %v11061_v2  ;;  %v11134_v2 = vld [vmem:[#allocation18 + $0xac0] ss:$8 sps:$4 sm:$0xff]  }
 0xa8d   : > { %6149 = vmatpush1.bf16.msra.mxu1 %v11059_v3  ;;  %v11139_v3 = vld [vmem:[#allocation18 + $0xad4] ss:$8 sps:$4 sm:$0xff]  }
 0xa8e   : > { %6150 = vmatprep.subr.bf16.mxu1 %v11064_v5  ;;  %v11137_v5 = vld [vmem:[#allocation18 + $0xad0] ss:$8 sps:$4 sm:$0xff]  }
 0xa91   : > { %6151 = vmatpush1.bf16.msra.mxu1 %v11062_v7  ;;  %v11142_v7 = vld [vmem:[#allocation18 + $0xae4] ss:$8 sps:$4 sm:$0xff]  }
 0xa92   : > { %v13044_v11 = vpop.f32.mrb[16].mxu0  ;;  %6152 = vmatprep.subr.bf16.mxu1 %v11067_v9  ;;  %v11140_v9 = vld [vmem:[#allocation18 + $0xae0] ss:$8 sps:$4 sm:$0xff]  }
 0xa93   : > { %v13046_v12 = vpop.f32.mrb[17].mxu0 }
 0xa94   : > { %v4656_v34 = vpop.f32.mrb[18].mxu0 }
 0xa95   : > { %6153 = vmatpush1.bf16.msra.mxu1 %v11065_v10  ;;  %v4657_v13 = vpop.f32.mrb[19].mxu0  ;;  %v11145_v10 = vld [vmem:[#allocation18 + $0xaf4] ss:$8 sps:$4 sm:$0xff]   ;;  %v6191_v34 = vrot.slane %v13048_v33, %v12918_v57 }
 0xa96   : > { %6154 = vmatprep.subr.bf16.mxu1 %v11070_v25  ;;  %v11143_v25 = vld [vmem:[#allocation18 + $0xaf0] ss:$8 sps:$4 sm:$0xff]   ;;  %v11148_v13 = vld [vmem:[#allocation18 + $0xb04] ss:$8 sps:$4 sm:$0xff]  }
 0xa99   : > { %6155 = vmatpush1.bf16.msra.mxu1 %v11068_v14  ;;  %v6203_v14 = vrot.slane %v13048_v33, %v12986_v16 }
 0xa9a   : > { %6156 = vmatprep.subr.bf16.mxu1 %v11073_v19  ;;  %v11146_v19 = vld [vmem:[#allocation18 + $0xb00] ss:$8 sps:$4 sm:$0xff]  }
 0xa9d   : > { %6157 = vmatpush1.bf16.msra.mxu1 %v11071_v20  ;;  %v6208_v20 = vpack.c.bf16 %v6191_v34, %v6191_v34  ;;  %v11218_v34 = vld [vmem:[#allocation18 + $0xc80] ss:$8 sps:$4 sm:$0xff]  }
 0xa9e   : > { %6158 = vmatprep.subr.bf16.mxu1 %v11076_v21  ;;  %v11151_v21 = vld [vmem:[#allocation18 + $0xb14] ss:$8 sps:$4 sm:$0xff]  }
 0xaa1   : > { %6159 = vmatpush1.bf16.msra.mxu1 %v11074_v22  ;;  %v6211_v22 = vpack.c.bf16 %v6203_v14, %v6203_v14  ;;  %v11221_v14 = vld [vmem:[#allocation18 + $0xc90] ss:$8 sps:$4 sm:$0xff]  }
 0xaa2   : > { %6160 = vmatprep.subr.bf16.mxu1 %v11079_v23  ;;  %v11149_v23 = vld [vmem:[#allocation18 + $0xb10] ss:$8 sps:$4 sm:$0xff]  }
 0xaa5   : > { %6161 = vmatpush1.bf16.msra.mxu1 %v11077_v24  ;;  %v11154_v24 = vld [vmem:[#allocation18 + $0xb24] ss:$8 sps:$4 sm:$0xff]  }
 0xaa6   : > { %6162 = vmatprep.subr.bf16.mxu1 %v11082_v54  ;;  %v11152_v54 = vld [vmem:[#allocation18 + $0xb20] ss:$8 sps:$4 sm:$0xff]  }
 0xaa9   : > { %6163 = vmatpush1.bf16.msra.mxu1 %v11080_v26  ;;  %v11157_v26 = vld [vmem:[#allocation18 + $0xb34] ss:$8 sps:$4 sm:$0xff]  }
 0xaaa   : > { %6164 = vmatprep.subr.bf16.mxu1 %v11085_v27  ;;  %v11155_v27 = vld [vmem:[#allocation18 + $0xb30] ss:$8 sps:$4 sm:$0xff]  }
 0xaad   : > { %6165 = vmatpush1.bf16.msra.mxu1 %v11083_v56  ;;  %v11160_v56 = vld [vmem:[#allocation18 + $0xb44] ss:$8 sps:$4 sm:$0xff]  }
 0xaae   : > { %6166 = vmatprep.subr.bf16.mxu1 %v11088_v17  ;;  %v11158_v17 = vld [vmem:[#allocation18 + $0xb40] ss:$8 sps:$4 sm:$0xff]  }
 0xab1   : > { %6167 = vmatpush1.bf16.msra.mxu1 %v11086_v6  ;;  %v11163_v6 = vld [vmem:[#allocation18 + $0xb54] ss:$8 sps:$4 sm:$0xff]  }
 0xab2   : > { %6168 = vmatprep.subr.bf16.mxu1 %v11091_v4  ;;  %v11161_v4 = vld [vmem:[#allocation18 + $0xb50] ss:$8 sps:$4 sm:$0xff]  }
 0xab5   : > { %6169 = vmatpush1.bf16.msra.mxu1 %v11089_v29  ;;  %v11166_v29 = vld [vmem:[#allocation18 + $0xb64] ss:$8 sps:$4 sm:$0xff]  }
 0xab6   : > { %6170 = vmatprep.subr.bf16.mxu1 %v11094_v31  ;;  %v11164_v31 = vld [vmem:[#allocation18 + $0xb60] ss:$8 sps:$4 sm:$0xff]  }
 0xab9   : > { %6171 = vmatpush1.bf16.msra.mxu1 %v11092_v28  ;;  %v11169_v28 = vld [vmem:[#allocation18 + $0xb74] ss:$8 sps:$4 sm:$0xff]  }
 0xaba   : > { %6172 = vmatprep.subr.bf16.mxu1 %v11097_v32  ;;  %v11167_v32 = vld [vmem:[#allocation18 + $0xb70] ss:$8 sps:$4 sm:$0xff]  }
 0xabd   : > { %6173 = vmatpush1.bf16.msra.mxu1 %v11095_v35  ;;  %v11172_v35 = vld [vmem:[#allocation18 + $0xb84] ss:$8 sps:$4 sm:$0xff]  }
 0xabe   : > { %6596 = vmatprep.subr.bf16.mxu1 %v11100_v37  ;;  %v11175_v37 = vld [vmem:[#allocation18 + $0xb94] ss:$8 sps:$4 sm:$0xff]  }
 0xac0   : > { %6175 = vmatmul.mubr.bf16.vlgmr.msra.gmra.mrb[16].mxu1 %v5715_v40  ;;  %v11176_v40 = vld [vmem:[#allocation18 + $0xba0] ss:$8 sps:$4 sm:$0xff]  }
 0xac1   : > { %6597 = vmatpush1.bf16.msra.mxu1 %v11098_v39  ;;  %6628 = vmatprep.mubr.bf16.mxu1 %v6209_v44  ;;  %v11178_v39 = vld [vmem:[#allocation18 + $0xba4] ss:$8 sps:$4 sm:$0xff]   ;;  %v11179_v44 = vld [vmem:[#allocation18 + $0xbb0] ss:$8 sps:$4 sm:$0xff]  }
 0xac2   : > { %6598 = vmatprep.subr.bf16.mxu1 %v11103_v43  ;;  %v11181_v43 = vld [vmem:[#allocation18 + $0xbb4] ss:$8 sps:$4 sm:$0xff]  }
 0xac5   : > { %6599 = vmatpush1.bf16.msra.mxu1 %v11101_v45  ;;  %v11184_v45 = vld [vmem:[#allocation18 + $0xbc4] ss:$8 sps:$4 sm:$0xff]  }
 0xac6   : > { %6600 = vmatprep.subr.bf16.mxu1 %v11106_v46  ;;  %v11182_v46 = vld [vmem:[#allocation18 + $0xbc0] ss:$8 sps:$4 sm:$0xff]  }
 0xac9   : > { %6601 = vmatpush1.bf16.msra.mxu1 %v11104_v47  ;;  %v11187_v47 = vld [vmem:[#allocation18 + $0xbd4] ss:$8 sps:$4 sm:$0xff]  }
 0xaca   : > { %6602 = vmatprep.subr.bf16.mxu1 %v11109_v18  ;;  %v11185_v18 = vld [vmem:[#allocation18 + $0xbd0] ss:$8 sps:$4 sm:$0xff]  }
 0xacd   : > { %6603 = vmatpush1.bf16.msra.mxu1 %v11107_v48  ;;  %v11190_v48 = vld [vmem:[#allocation18 + $0xbe4] ss:$8 sps:$4 sm:$0xff]  }
 0xace   : > { %6604 = vmatprep.subr.bf16.mxu1 %v11112_v49  ;;  %v11188_v49 = vld [vmem:[#allocation18 + $0xbe0] ss:$8 sps:$4 sm:$0xff]  }
 0xad1   : > { %6605 = vmatpush1.bf16.msra.mxu1 %v11110_v50  ;;  %v11193_v50 = vld [vmem:[#allocation18 + $0xbf4] ss:$8 sps:$4 sm:$0xff]  }
 0xad2   : > { %6606 = vmatprep.subr.bf16.mxu1 %v11115_v51  ;;  %v13058_v51 = vld [vmem:[#allocation2 + $0x6] ss:$8 sm:$0xf] }
 0xad5   : > { %6607 = vmatpush1.bf16.msra.mxu1 %v11113_v52  ;;  %v11191_v52 = vld [vmem:[#allocation18 + $0xbf0] ss:$8 sps:$4 sm:$0xff]  }
 0xad6   : > { %6608 = vmatprep.subr.bf16.mxu1 %v11118_v42  ;;  %v6199_v42 = vrot.slane %v13048_v33, %v12983_v15  ;;  %v11205_v33 = vld [vmem:[#allocation18 + $0xc34] ss:$8 sps:$4 sm:$0xff]  }
 0xad9   : > { %6609 = vmatpush1.bf16.msra.mxu1 %v11116_v53  ;;  %v11196_v53 = vld [vmem:[#allocation18 + $0xc04] ss:$8 sps:$4 sm:$0xff]  }
 0xada   : > { %6610 = vmatprep.subr.bf16.mxu1 %v11121_v55  ;;  %v6690_v55 = vrot.slane %v13058_v51, %v12921_v59 }
 0xadd   : > { %6611 = vmatpush1.bf16.msra.mxu1 %v11119_v41  ;;  %v11194_v41 = vld [vmem:[#allocation18 + $0xc00] ss:$8 sps:$4 sm:$0xff]  }
 0xade   : > { %6612 = vmatprep.subr.bf16.mxu1 %v11124_v58  ;;  %v6210_v58 = vpack.c.bf16 %v6199_v42, %v6199_v42  ;;  %v11266_v42 = vld [vmem:[#allocation18 + $0xd80] ss:$8 sps:$4 sm:$0xff]  }
 0xae1   : > { %6613 = vmatpush1.bf16.msra.mxu1 %v11122_v60  ;;  %v11199_v60 = vld [vmem:[#allocation18 + $0xc14] ss:$8 sps:$4 sm:$0xff]  }
 0xae2   : > { %6614 = vmatprep.subr.bf16.mxu1 %v11127_v61  ;;  %v6704_v61 = vpack.c.bf16 %v6690_v55, %v6690_v55  ;;  %v11269_v55 = vld [vmem:[#allocation18 + $0xd90] ss:$8 sps:$4 sm:$0xff]  }
 0xae5   : > { %6615 = vmatpush1.bf16.msra.mxu1 %v11125_v30  ;;  %v11197_v30 = vld [vmem:[#allocation18 + $0xc10] ss:$8 sps:$4 sm:$0xff]  }
 0xae6   : > { %6616 = vmatprep.subr.bf16.mxu1 %v11130_v62  ;;  %v11202_v62 = vld [vmem:[#allocation18 + $0xc24] ss:$8 sps:$4 sm:$0xff]  }
 0xae9   : > { %6617 = vmatpush1.bf16.msra.mxu1 %v11128_v63  ;;  %v11200_v63 = vld [vmem:[#allocation18 + $0xc20] ss:$8 sps:$4 sm:$0xff]  }
 0xaea   : > { %6618 = vmatprep.subr.bf16.mxu1 %v11133_v0  ;;  %v11203_v0 = vld [vmem:[#allocation18 + $0xc30] ss:$8 sps:$4 sm:$0xff]  }
 0xaed   : > { %6619 = vmatpush1.bf16.msra.mxu1 %v11131_v8  ;;  %v11208_v8 = vld [vmem:[#allocation18 + $0xc44] ss:$8 sps:$4 sm:$0xff]  }
 0xaee   : > { %6620 = vmatprep.subr.bf16.mxu1 %v11136_v1  ;;  %v11206_v1 = vld [vmem:[#allocation18 + $0xc40] ss:$8 sps:$4 sm:$0xff]  }
 0xaf1   : > { %6621 = vmatpush1.bf16.msra.mxu1 %v11134_v2  ;;  %v11211_v2 = vld [vmem:[#allocation18 + $0xc54] ss:$8 sps:$4 sm:$0xff]  }
 0xaf2   : > { %6622 = vmatprep.subr.bf16.mxu1 %v11139_v3  ;;  %v11209_v3 = vld [vmem:[#allocation18 + $0xc50] ss:$8 sps:$4 sm:$0xff]  }
 0xaf5   : > { %6623 = vmatpush1.bf16.msra.mxu1 %v11137_v5  ;;  %v11214_v5 = vld [vmem:[#allocation18 + $0xc64] ss:$8 sps:$4 sm:$0xff]  }
 0xaf6   : > { %6624 = vmatprep.subr.bf16.mxu1 %v11142_v7  ;;  %v11212_v7 = vld [vmem:[#allocation18 + $0xc60] ss:$8 sps:$4 sm:$0xff]  }
 0xaf9   : > { %6625 = vmatpush1.bf16.msra.mxu1 %v11140_v9  ;;  %v11217_v9 = vld [vmem:[#allocation18 + $0xc74] ss:$8 sps:$4 sm:$0xff]  }
 0xafa   : > { %6626 = vmatprep.subr.bf16.mxu1 %v11145_v10  ;;  %v11215_v10 = vld [vmem:[#allocation18 + $0xc70] ss:$8 sps:$4 sm:$0xff]  }
 0xafd   : > { %6627 = vmatpush1.bf16.msra.mxu1 %v11143_v25  ;;  %v11220_v25 = vld [vmem:[#allocation18 + $0xc84] ss:$8 sps:$4 sm:$0xff]  }
 0xafe   : > { %6637 = vmatprep.subr.bf16.mxu1 %v11148_v13  ;;  %v11223_v13 = vld [vmem:[#allocation18 + $0xc94] ss:$8 sps:$4 sm:$0xff]  }
 0xb00   : > { %6629 = vmatmul.mubr.bf16.vlgmr.msra.gmra.mrb[16].mxu1 %v6208_v20  ;;  %v11224_v20 = vld [vmem:[#allocation18 + $0xca0] ss:$8 sps:$4 sm:$0xff]  }
 0xb01   : > { %6638 = vmatpush1.bf16.msra.mxu1 %v11146_v19  ;;  %6669 = vmatprep.mubr.bf16.mxu1 %v6211_v22  ;;  %v11226_v19 = vld [vmem:[#allocation18 + $0xca4] ss:$8 sps:$4 sm:$0xff]   ;;  %v11227_v22 = vld [vmem:[#allocation18 + $0xcb0] ss:$8 sps:$4 sm:$0xff]  }
 0xb02   : > { %6639 = vmatprep.subr.bf16.mxu1 %v11151_v21  ;;  %v11229_v21 = vld [vmem:[#allocation18 + $0xcb4] ss:$8 sps:$4 sm:$0xff]  }
 0xb05   : > { %6640 = vmatpush1.bf16.msra.mxu1 %v11149_v23  ;;  %v11232_v23 = vld [vmem:[#allocation18 + $0xcc4] ss:$8 sps:$4 sm:$0xff]  }
 0xb06   : > { %6641 = vmatprep.subr.bf16.mxu1 %v11154_v24  ;;  %v11230_v24 = vld [vmem:[#allocation18 + $0xcc0] ss:$8 sps:$4 sm:$0xff]  }
 0xb09   : > { %6642 = vmatpush1.bf16.msra.mxu1 %v11152_v54  ;;  %v11235_v54 = vld [vmem:[#allocation18 + $0xcd4] ss:$8 sps:$4 sm:$0xff]  }
 0xb0a   : > { %6643 = vmatprep.subr.bf16.mxu1 %v11157_v26  ;;  %v11233_v26 = vld [vmem:[#allocation18 + $0xcd0] ss:$8 sps:$4 sm:$0xff]  }
 0xb0d   : > { %6644 = vmatpush1.bf16.msra.mxu1 %v11155_v27  ;;  %v11238_v27 = vld [vmem:[#allocation18 + $0xce4] ss:$8 sps:$4 sm:$0xff]  }
 0xb0e   : > { %6645 = vmatprep.subr.bf16.mxu1 %v11160_v56  ;;  %v11236_v56 = vld [vmem:[#allocation18 + $0xce0] ss:$8 sps:$4 sm:$0xff]  }
 0xb11   : > { %6646 = vmatpush1.bf16.msra.mxu1 %v11158_v17  ;;  %v11241_v17 = vld [vmem:[#allocation18 + $0xcf4] ss:$8 sps:$4 sm:$0xff]  }
 0xb12   : > { %6647 = vmatprep.subr.bf16.mxu1 %v11163_v6  ;;  %v11239_v6 = vld [vmem:[#allocation18 + $0xcf0] ss:$8 sps:$4 sm:$0xff]  }
 0xb15   : > { %6648 = vmatpush1.bf16.msra.mxu1 %v11161_v4  ;;  %v6686_v4 = vrot.slane %v13058_v51, %v12918_v57 }
 0xb16   : > { %6649 = vmatprep.subr.bf16.mxu1 %v11166_v29  ;;  %v11244_v29 = vld [vmem:[#allocation18 + $0xd04] ss:$8 sps:$4 sm:$0xff]  }
 0xb19   : > { %6650 = vmatpush1.bf16.msra.mxu1 %v11164_v31  ;;  %v6698_v31 = vrot.slane %v13058_v51, %v12986_v16 }
 0xb1a   : > { %6651 = vmatprep.subr.bf16.mxu1 %v11169_v28  ;;  %v11242_v28 = vld [vmem:[#allocation18 + $0xd00] ss:$8 sps:$4 sm:$0xff]  }
 0xb1d   : > { %6652 = vmatpush1.bf16.msra.mxu1 %v11167_v32  ;;  %v6703_v32 = vpack.c.bf16 %v6686_v4, %v6686_v4  ;;  %v11400_v4 = vld [vmem:[#allocation23 + $0x84] ss:$16 sps:$4 sm:$0xff]  }
 0xb1e   : > { %6653 = vmatprep.subr.bf16.mxu1 %v11172_v35  ;;  %v11247_v35 = vld [vmem:[#allocation18 + $0xd14] ss:$8 sps:$4 sm:$0xff]  }
 0xb21   : > { %6654 = vmatpush1.bf16.msra.mxu1 %v11170_v36  ;;  %v6706_v36 = vpack.c.bf16 %v6698_v31, %v6698_v31  ;;  %v11307_v31 = vld [vmem:[#allocation18 + $0xe54] ss:$8 sps:$4 sm:$0xff]  }
 0xb22   : > { %6655 = vmatprep.subr.bf16.mxu1 %v11175_v37  ;;  %v11245_v37 = vld [vmem:[#allocation18 + $0xd10] ss:$8 sps:$4 sm:$0xff]  }
 0xb25   : > { %6656 = vmatpush1.bf16.msra.mxu1 %v11173_v38  ;;  %v11250_v38 = vld [vmem:[#allocation18 + $0xd24] ss:$8 sps:$4 sm:$0xff]  }
 0xb26   : > { %6657 = vmatprep.subr.bf16.mxu1 %v11178_v39  ;;  %v11248_v39 = vld [vmem:[#allocation18 + $0xd20] ss:$8 sps:$4 sm:$0xff]  }
 0xb29   : > { %6658 = vmatpush1.bf16.msra.mxu1 %v11176_v40  ;;  %v11253_v40 = vld [vmem:[#allocation18 + $0xd34] ss:$8 sps:$4 sm:$0xff]  }
 0xb2a   : > { %6659 = vmatprep.subr.bf16.mxu1 %v11181_v43  ;;  %v11251_v43 = vld [vmem:[#allocation18 + $0xd30] ss:$8 sps:$4 sm:$0xff]  }
 0xb2d   : > { %6660 = vmatpush1.bf16.msra.mxu1 %v11179_v44  ;;  %v11256_v44 = vld [vmem:[#allocation18 + $0xd44] ss:$8 sps:$4 sm:$0xff]  }
 0xb2e   : > { %6661 = vmatprep.subr.bf16.mxu1 %v11184_v45  ;;  %v11254_v45 = vld [vmem:[#allocation18 + $0xd40] ss:$8 sps:$4 sm:$0xff]  }
 0xb31   : > { %6662 = vmatpush1.bf16.msra.mxu1 %v11182_v46  ;;  %v11259_v46 = vld [vmem:[#allocation18 + $0xd54] ss:$8 sps:$4 sm:$0xff]  }
 0xb32   : > { %6663 = vmatprep.subr.bf16.mxu1 %v11187_v47  ;;  %v11257_v47 = vld [vmem:[#allocation18 + $0xd50] ss:$8 sps:$4 sm:$0xff]  }
 0xb35   : > { %6664 = vmatpush1.bf16.msra.mxu1 %v11185_v18  ;;  %v11262_v18 = vld [vmem:[#allocation18 + $0xd64] ss:$8 sps:$4 sm:$0xff]  }
 0xb36   : > { %6665 = vmatprep.subr.bf16.mxu1 %v11190_v48  ;;  %v11260_v48 = vld [vmem:[#allocation18 + $0xd60] ss:$8 sps:$4 sm:$0xff]  }
 0xb39   : > { %6666 = vmatpush1.bf16.msra.mxu1 %v11188_v49  ;;  %v11265_v49 = vld [vmem:[#allocation18 + $0xd74] ss:$8 sps:$4 sm:$0xff]  }
 0xb3a   : > { %6667 = vmatprep.subr.bf16.mxu1 %v11193_v50  ;;  %v11263_v50 = vld [vmem:[#allocation18 + $0xd70] ss:$8 sps:$4 sm:$0xff]  }
 0xb3d   : > { %6668 = vmatpush1.bf16.msra.mxu1 %v11191_v52  ;;  %v11268_v52 = vld [vmem:[#allocation18 + $0xd84] ss:$8 sps:$4 sm:$0xff]  }
 0xb3e   : > { %7091 = vmatprep.subr.bf16.mxu1 %v11196_v53  ;;  %v11271_v53 = vld [vmem:[#allocation18 + $0xd94] ss:$8 sps:$4 sm:$0xff]  }
 0xb40   : > { %6670 = vmatmul.mubr.bf16.vlgmr.msra.gmra.mrb[16].mxu1 %v6210_v58  ;;  %v11272_v58 = vld [vmem:[#allocation18 + $0xda0] ss:$8 sps:$4 sm:$0xff]  }
 0xb41   : > { %7092 = vmatpush1.bf16.msra.mxu1 %v11194_v41  ;;  %7123 = vmatprep.mubr.bf16.mxu1 %v6704_v61  ;;  %v11274_v41 = vld [vmem:[#allocation18 + $0xda4] ss:$8 sps:$4 sm:$0xff]   ;;  %v11275_v61 = vld [vmem:[#allocation18 + $0xdb0] ss:$8 sps:$4 sm:$0xff]  }
 0xb42   : > { %7093 = vmatprep.subr.bf16.mxu1 %v11199_v60  ;;  %v11277_v60 = vld [vmem:[#allocation18 + $0xdb4] ss:$8 sps:$4 sm:$0xff]  }
 0xb45   : > { %7094 = vmatpush1.bf16.msra.mxu1 %v11197_v30  ;;  %v11280_v30 = vld [vmem:[#allocation18 + $0xdc4] ss:$8 sps:$4 sm:$0xff]  }
 0xb46   : > { %7095 = vmatprep.subr.bf16.mxu1 %v11202_v62  ;;  %v11278_v62 = vld [vmem:[#allocation18 + $0xdc0] ss:$8 sps:$4 sm:$0xff]  }
 0xb49   : > { %7096 = vmatpush1.bf16.msra.mxu1 %v11200_v63  ;;  %v11283_v63 = vld [vmem:[#allocation18 + $0xdd4] ss:$8 sps:$4 sm:$0xff]  }
 0xb4a   : > { %7097 = vmatprep.subr.bf16.mxu1 %v11205_v33  ;;  %v11281_v33 = vld [vmem:[#allocation18 + $0xdd0] ss:$8 sps:$4 sm:$0xff]  }
 0xb4d   : > { %7098 = vmatpush1.bf16.msra.mxu1 %v11203_v0  ;;  %v11286_v0 = vld [vmem:[#allocation18 + $0xde4] ss:$8 sps:$4 sm:$0xff]  }
 0xb4e   : > { %7099 = vmatprep.subr.bf16.mxu1 %v11208_v8  ;;  %v11284_v8 = vld [vmem:[#allocation18 + $0xde0] ss:$8 sps:$4 sm:$0xff]  }
 0xb51   : > { %7100 = vmatpush1.bf16.msra.mxu1 %v11206_v1  ;;  %v11289_v1 = vld [vmem:[#allocation18 + $0xdf4] ss:$8 sps:$4 sm:$0xff]  }
 0xb52   : > { %7101 = vmatprep.subr.bf16.mxu1 %v11211_v2  ;;  %v13068_v2 = vld [vmem:[#allocation2 + $0x7] ss:$8 sm:$0xf] }
 0xb55   : > { %7102 = vmatpush1.bf16.msra.mxu1 %v11209_v3  ;;  %v11287_v3 = vld [vmem:[#allocation18 + $0xdf0] ss:$8 sps:$4 sm:$0xff]  }
 0xb56   : > { %7103 = vmatprep.subr.bf16.mxu1 %v11214_v5  ;;  %v6694_v5 = vrot.slane %v13058_v51, %v12983_v15  ;;  %v11389_v51 = vld [vmem:[#allocation23 + $0x20] ss:$16 sps:$4 sm:$0xff]  }
 0xb59   : > { %7104 = vmatpush1.bf16.msra.mxu1 %v11212_v7  ;;  %v11292_v7 = vld [vmem:[#allocation18 + $0xe04] ss:$8 sps:$4 sm:$0xff]  }
 0xb5a   : > { %7105 = vmatprep.subr.bf16.mxu1 %v11217_v9  ;;  %v7185_v9 = vrot.slane %v13068_v2, %v12921_v59 }
 0xb5d   : > { %7106 = vmatpush1.bf16.msra.mxu1 %v11215_v10  ;;  %v11290_v10 = vld [vmem:[#allocation18 + $0xe00] ss:$8 sps:$4 sm:$0xff]  }
 0xb5e   : > { %7107 = vmatprep.subr.bf16.mxu1 %v11220_v25  ;;  %v6705_v25 = vpack.c.bf16 %v6694_v5, %v6694_v5  ;;  %v11329_v5 = vld [vmem:[#allocation18 + $0xed0] ss:$8 sps:$4 sm:$0xff]  }
 0xb61   : > { %7108 = vmatpush1.bf16.msra.mxu1 %v11218_v34  ;;  %v11295_v34 = vld [vmem:[#allocation18 + $0xe14] ss:$8 sps:$4 sm:$0xff]  }
 0xb62   : > { %7109 = vmatprep.subr.bf16.mxu1 %v11223_v13  ;;  %v7199_v13 = vpack.c.bf16 %v7185_v9, %v7185_v9  ;;  %v11332_v9 = vld [vmem:[#allocation18 + $0xee0] ss:$8 sps:$4 sm:$0xff]  }
 0xb65   : > { %7110 = vmatpush1.bf16.msra.mxu1 %v11221_v14  ;;  %v11386_v14 = vld [vmem:[#allocation23] ss:$16 sps:$4 sm:$0xff]  }
 0xb66   : > { %7111 = vmatprep.subr.bf16.mxu1 %v11226_v19  ;;  %v11388_v19 = vld [vmem:[#allocation23 + $0x4] ss:$16 sps:$4 sm:$0xff]  }
 0xb67   : > { %8108 = vmatprep.subr.bf16.mxu0 %v11388_v19  ;;  %v11338_v19 = vld [vmem:[#allocation18 + $0xf00] ss:$8 sps:$4 sm:$0xff]  }
 0xb68   : > { %8109 = vmatpush1.bf16.msra.mxu0 %v11386_v14  ;;  %v7193_v14 = vrot.slane %v13068_v2, %v12986_v16 }
 0xb69   : > { %7112 = vmatpush1.bf16.msra.mxu1 %v11224_v20  ;;  %v11293_v20 = vld [vmem:[#allocation18 + $0xe10] ss:$8 sps:$4 sm:$0xff]  }
 0xb6a   : > { %7113 = vmatprep.subr.bf16.mxu1 %v11229_v21  ;;  %v11391_v21 = vld [vmem:[#allocation23 + $0x24] ss:$16 sps:$4 sm:$0xff]  }
 0xb6b   : > { %8110 = vmatprep.subr.bf16.mxu0 %v11391_v21  ;;  %v11343_v21 = vld [vmem:[#allocation18 + $0xf14] ss:$8 sps:$4 sm:$0xff]  }
 0xb6c   : > { %8111 = vmatpush1.bf16.msra.mxu0 %v11389_v51  ;;  %v11341_v51 = vld [vmem:[#allocation18 + $0xf10] ss:$8 sps:$4 sm:$0xff]  }
 0xb6d   : > { %7114 = vmatpush1.bf16.msra.mxu1 %v11227_v22  ;;  %v11298_v22 = vld [vmem:[#allocation18 + $0xe24] ss:$8 sps:$4 sm:$0xff]  }
 0xb6e   : > { %7115 = vmatprep.subr.bf16.mxu1 %v11232_v23  ;;  %v11394_v23 = vld [vmem:[#allocation23 + $0x44] ss:$16 sps:$4 sm:$0xff]  }
 0xb6f   : > { %8112 = vmatprep.subr.bf16.mxu0 %v11394_v23  ;;  %v11346_v23 = vld [vmem:[#allocation18 + $0xf24] ss:$8 sps:$4 sm:$0xff]  }
 0xb71   : > { %7116 = vmatpush1.bf16.msra.mxu1 %v11230_v24  ;;  %v11296_v24 = vld [vmem:[#allocation18 + $0xe20] ss:$8 sps:$4 sm:$0xff]  }
 0xb72   : > { %7117 = vmatprep.subr.bf16.mxu1 %v11235_v54  ;;  %v11301_v54 = vld [vmem:[#allocation18 + $0xe34] ss:$8 sps:$4 sm:$0xff]  }
 0xb75   : > { %7118 = vmatpush1.bf16.msra.mxu1 %v11233_v26  ;;  %v11392_v26 = vld [vmem:[#allocation23 + $0x40] ss:$16 sps:$4 sm:$0xff]  }
 0xb76   : > { %7119 = vmatprep.subr.bf16.mxu1 %v11238_v27  ;;  %v11397_v27 = vld [vmem:[#allocation23 + $0x64] ss:$16 sps:$4 sm:$0xff]   ;;  %8113 = vmatpush1.bf16.msra.mxu0 %v11392_v26 }
 0xb77   : > { %8114 = vmatprep.subr.bf16.mxu0 %v11397_v27  ;;  %v11347_v26 = vld [vmem:[#allocation18 + $0xf30] ss:$8 sps:$4 sm:$0xff]   ;;  %v11352_v27 = vld [vmem:[#allocation18 + $0xf44] ss:$8 sps:$4 sm:$0xff]  }
 0xb79   : > { %7120 = vmatpush1.bf16.msra.mxu1 %v11236_v56  ;;  %v11299_v56 = vld [vmem:[#allocation18 + $0xe30] ss:$8 sps:$4 sm:$0xff]  }
 0xb7a   : > { %7121 = vmatprep.subr.bf16.mxu1 %v11241_v17  ;;  %v11304_v17 = vld [vmem:[#allocation18 + $0xe44] ss:$8 sps:$4 sm:$0xff]  }
 0xb7d   : > { %7122 = vmatpush1.bf16.msra.mxu1 %v11239_v6  ;;  %v11395_v6 = vld [vmem:[#allocation23 + $0x60] ss:$16 sps:$4 sm:$0xff]  }
 0xb7e   : > { %7132 = vmatprep.subr.bf16.mxu1 %v11244_v29  ;;  %v11302_v29 = vld [vmem:[#allocation18 + $0xe40] ss:$8 sps:$4 sm:$0xff]   ;;  %8115 = vmatpush1.bf16.msra.mxu0 %v11395_v6  ;;  %v11353_v6 = vld [vmem:[#allocation18 + $0xf50] ss:$8 sps:$4 sm:$0xff]  }
 0xb7f   : > { %8116 = vmatprep.subr.bf16.mxu0 %v11400_v4  ;;  %v11358_v4 = vld [vmem:[#allocation18 + $0xf64] ss:$8 sps:$4 sm:$0xff]  }
 0xb80   : > { %7124 = vmatmul.mubr.bf16.vlgmr.msra.gmra.mrb[16].mxu1 %v6703_v32  ;;  %v11403_v32 = vld [vmem:[#allocation23 + $0xa4] ss:$16 sps:$4 sm:$0xff]  }
 0xb81   : > { %7133 = vmatpush1.bf16.msra.mxu1 %v11242_v28  ;;  %7164 = vmatprep.mubr.bf16.mxu1 %v6706_v36  ;;  %v11398_v28 = vld [vmem:[#allocation23 + $0x80] ss:$16 sps:$4 sm:$0xff]  }
 0xb82   : > { %7134 = vmatprep.subr.bf16.mxu1 %v11247_v35  ;;  %v11305_v35 = vld [vmem:[#allocation18 + $0xe50] ss:$8 sps:$4 sm:$0xff]   ;;  %v11310_v36 = vld [vmem:[#allocation18 + $0xe64] ss:$8 sps:$4 sm:$0xff]   ;;  %8117 = vmatpush1.bf16.msra.mxu0 %v11398_v28 }
 0xb83   : > { %8118 = vmatprep.subr.bf16.mxu0 %v11403_v32  ;;  %v11359_v28 = vld [vmem:[#allocation18 + $0xf70] ss:$8 sps:$4 sm:$0xff]   ;;  %v11364_v32 = vld [vmem:[#allocation18 + $0xf84] ss:$8 sps:$4 sm:$0xff]  }
 0xb85   : > { %7135 = vmatpush1.bf16.msra.mxu1 %v11245_v37  ;;  %v11401_v37 = vld [vmem:[#allocation23 + $0xa0] ss:$16 sps:$4 sm:$0xff]  }
 0xb86   : > { %7136 = vmatprep.subr.bf16.mxu1 %v11250_v38  ;;  %v11406_v38 = vld [vmem:[#allocation23 + $0xc4] ss:$16 sps:$4 sm:$0xff]   ;;  %8119 = vmatpush1.bf16.msra.mxu0 %v11401_v37 }
 0xb87   : > { %8120 = vmatprep.subr.bf16.mxu0 %v11406_v38  ;;  %v11365_v37 = vld [vmem:[#allocation18 + $0xf90] ss:$8 sps:$4 sm:$0xff]   ;;  %v11370_v38 = vld [vmem:[#allocation18 + $0xfa4] ss:$8 sps:$4 sm:$0xff]  }
 0xb89   : > { %7137 = vmatpush1.bf16.msra.mxu1 %v11248_v39  ;;  %v11308_v39 = vld [vmem:[#allocation18 + $0xe60] ss:$8 sps:$4 sm:$0xff]  }
 0xb8a   : > { %7138 = vmatprep.subr.bf16.mxu1 %v11253_v40  ;;  %v11313_v40 = vld [vmem:[#allocation18 + $0xe74] ss:$8 sps:$4 sm:$0xff]  }
 0xb8d   : > { %7139 = vmatpush1.bf16.msra.mxu1 %v11251_v43  ;;  %v11404_v43 = vld [vmem:[#allocation23 + $0xc0] ss:$16 sps:$4 sm:$0xff]  }
 0xb8e   : > { %7140 = vmatprep.subr.bf16.mxu1 %v11256_v44  ;;  %v11409_v44 = vld [vmem:[#allocation23 + $0xe4] ss:$16 sps:$4 sm:$0xff]   ;;  %8121 = vmatpush1.bf16.msra.mxu0 %v11404_v43 }
 0xb8f   : > { %8122 = vmatprep.subr.bf16.mxu0 %v11409_v44  ;;  %v11371_v43 = vld [vmem:[#allocation18 + $0xfb0] ss:$8 sps:$4 sm:$0xff]   ;;  %v11376_v44 = vld [vmem:[#allocation18 + $0xfc4] ss:$8 sps:$4 sm:$0xff]  }
 0xb91   : > { %7141 = vmatpush1.bf16.msra.mxu1 %v11254_v45  ;;  %v11311_v45 = vld [vmem:[#allocation18 + $0xe70] ss:$8 sps:$4 sm:$0xff]  }
 0xb92   : > { %7142 = vmatprep.subr.bf16.mxu1 %v11259_v46  ;;  %v11316_v46 = vld [vmem:[#allocation18 + $0xe84] ss:$8 sps:$4 sm:$0xff]  }
 0xb95   : > { %7143 = vmatpush1.bf16.msra.mxu1 %v11257_v47  ;;  %v11407_v47 = vld [vmem:[#allocation23 + $0xe0] ss:$16 sps:$4 sm:$0xff]  }
 0xb96   : > { %7144 = vmatprep.subr.bf16.mxu1 %v11262_v18  ;;  %v11412_v18 = vld [vmem:[#allocation23 + $0x104] ss:$16 sps:$4 sm:$0xff]   ;;  %8123 = vmatpush1.bf16.msra.mxu0 %v11407_v47 }
 0xb97   : > { %8124 = vmatprep.subr.bf16.mxu0 %v11412_v18  ;;  %v11377_v47 = vld [vmem:[#allocation18 + $0xfd0] ss:$8 sps:$4 sm:$0xff]   ;;  %v11382_v18 = vld [vmem:[#allocation18 + $0xfe4] ss:$8 sps:$4 sm:$0xff]  }
 0xb99   : > { %7145 = vmatpush1.bf16.msra.mxu1 %v11260_v48  ;;  %v11314_v48 = vld [vmem:[#allocation18 + $0xe80] ss:$8 sps:$4 sm:$0xff]  }
 0xb9a   : > { %7146 = vmatprep.subr.bf16.mxu1 %v11265_v49  ;;  %v11319_v49 = vld [vmem:[#allocation18 + $0xe94] ss:$8 sps:$4 sm:$0xff]  }
 0xb9d   : > { %7147 = vmatpush1.bf16.msra.mxu1 %v11263_v50  ;;  %v11410_v50 = vld [vmem:[#allocation23 + $0x100] ss:$16 sps:$4 sm:$0xff]  }
 0xb9e   : > { %7148 = vmatprep.subr.bf16.mxu1 %v11268_v52  ;;  %v11415_v52 = vld [vmem:[#allocation23 + $0x124] ss:$16 sps:$4 sm:$0xff]   ;;  %8125 = vmatpush1.bf16.msra.mxu0 %v11410_v50 }
 0xb9f   : > { %8126 = vmatprep.subr.bf16.mxu0 %v11415_v52  ;;  %v11383_v50 = vld [vmem:[#allocation18 + $0xff0] ss:$8 sps:$4 sm:$0xff]   ;;  %v7189_v52 = vrot.slane %v13068_v2, %v12983_v15 }
 0xba1   : > { %7149 = vmatpush1.bf16.msra.mxu1 %v11266_v42  ;;  %v11317_v42 = vld [vmem:[#allocation18 + $0xe90] ss:$8 sps:$4 sm:$0xff]  }
 0xba2   : > { %7150 = vmatprep.subr.bf16.mxu1 %v11271_v53  ;;  %v11322_v53 = vld [vmem:[#allocation18 + $0xea4] ss:$8 sps:$4 sm:$0xff]  }
 0xba5   : > { %7151 = vmatpush1.bf16.msra.mxu1 %v11269_v55  ;;  %v11413_v55 = vld [vmem:[#allocation23 + $0x120] ss:$16 sps:$4 sm:$0xff]  }
 0xba6   : > { %7152 = vmatprep.subr.bf16.mxu1 %v11274_v41  ;;  %v11418_v41 = vld [vmem:[#allocation23 + $0x144] ss:$16 sps:$4 sm:$0xff]   ;;  %8127 = vmatpush1.bf16.msra.mxu0 %v11413_v55 }
 0xba7   : > { %8128 = vmatprep.subr.bf16.mxu0 %v11418_v41  ;;  %v11427_v55 = vld [vmem:[#allocation23 + $0x1a4] ss:$16 sps:$4 sm:$0xff]  }
 0xba8   : > { %v11430_v41 = vld [vmem:[#allocation23 + $0x1c4] ss:$16 sps:$4 sm:$0xff]  }
 0xba9   : > { %7153 = vmatpush1.bf16.msra.mxu1 %v11272_v58  ;;  %v11320_v58 = vld [vmem:[#allocation18 + $0xea0] ss:$8 sps:$4 sm:$0xff]  }
 0xbaa   : > { %7154 = vmatprep.subr.bf16.mxu1 %v11277_v60  ;;  %v11325_v60 = vld [vmem:[#allocation18 + $0xeb4] ss:$8 sps:$4 sm:$0xff]  }
 0xbad   : > { %7155 = vmatpush1.bf16.msra.mxu1 %v11275_v61  ;;  %v11416_v61 = vld [vmem:[#allocation23 + $0x140] ss:$16 sps:$4 sm:$0xff]  }
 0xbae   : > { %7156 = vmatprep.subr.bf16.mxu1 %v11280_v30  ;;  %v11421_v30 = vld [vmem:[#allocation23 + $0x164] ss:$16 sps:$4 sm:$0xff]   ;;  %8129 = vmatpush1.bf16.msra.mxu0 %v11416_v61  ;;  %v11431_v61 = vld [vmem:[#allocation23 + $0x1e0] ss:$16 sps:$4 sm:$0xff]  }
 0xbaf   : > { %8130 = vmatprep.subr.bf16.mxu0 %v11421_v30  ;;  %v11436_v30 = vld [vmem:[#allocation23 + $0xc] ss:$16 sps:$4 sm:$0xff]  }
 0xbb1   : > { %7157 = vmatpush1.bf16.msra.mxu1 %v11278_v62  ;;  %v11323_v62 = vld [vmem:[#allocation18 + $0xeb0] ss:$8 sps:$4 sm:$0xff]  }
 0xbb2   : > { %7158 = vmatprep.subr.bf16.mxu1 %v11283_v63  ;;  %v11328_v63 = vld [vmem:[#allocation18 + $0xec4] ss:$8 sps:$4 sm:$0xff]  }
 0xbb5   : > { %7159 = vmatpush1.bf16.msra.mxu1 %v11281_v33  ;;  %v11419_v33 = vld [vmem:[#allocation23 + $0x160] ss:$16 sps:$4 sm:$0xff]  }
 0xbb6   : > { %7160 = vmatprep.subr.bf16.mxu1 %v11286_v0  ;;  %v11424_v0 = vld [vmem:[#allocation23 + $0x184] ss:$16 sps:$4 sm:$0xff]   ;;  %8131 = vmatpush1.bf16.msra.mxu0 %v11419_v33 }
 0xbb7   : > { %8132 = vmatprep.subr.bf16.mxu0 %v11424_v0 }
 0xbb9   : > { %7161 = vmatpush1.bf16.msra.mxu1 %v11284_v8  ;;  %v11326_v8 = vld [vmem:[#allocation18 + $0xec0] ss:$8 sps:$4 sm:$0xff]  }
 0xbba   : > { %7162 = vmatprep.subr.bf16.mxu1 %v11289_v1  ;;  %v11331_v1 = vld [vmem:[#allocation18 + $0xed4] ss:$8 sps:$4 sm:$0xff]  }
 0xbbd   : > { %7163 = vmatpush1.bf16.msra.mxu1 %v11287_v3  ;;  %v11422_v3 = vld [vmem:[#allocation23 + $0x180] ss:$16 sps:$4 sm:$0xff]  }
 0xbbe   : > { %7586 = vmatprep.subr.bf16.mxu1 %v11292_v7  ;;  %v11334_v7 = vld [vmem:[#allocation18 + $0xee4] ss:$8 sps:$4 sm:$0xff]   ;;  %8133 = vmatpush1.bf16.msra.mxu0 %v11422_v3 }
 0xbbf   : > { %8134 = vmatprep.subr.bf16.mxu0 %v11427_v55  ;;  %v11485_v55 = vld [vmem:[%s13364_s14 + $0x8] sm:$0xff]  }
 0xbc0   : > { %7165 = vmatmul.mubr.bf16.vlgmr.msra.gmra.mrb[16].mxu1 %v6705_v25  ;;  %v11335_v25 = vld [vmem:[#allocation18 + $0xef0] ss:$8 sps:$4 sm:$0xff]  }
 0xbc1   : > { %7587 = vmatpush1.bf16.msra.mxu1 %v11290_v10  ;;  %7618 = vmatprep.mubr.bf16.mxu1 %v7199_v13  ;;  %v11337_v10 = vld [vmem:[#allocation18 + $0xef4] ss:$8 sps:$4 sm:$0xff]   ;;  %v11340_v13 = vld [vmem:[#allocation18 + $0xf04] ss:$8 sps:$4 sm:$0xff]  }
 0xbc2   : > { %7588 = vmatprep.subr.bf16.mxu1 %v11295_v34  ;;  %v7181_v34 = vrot.slane %v13068_v2, %v12918_v57 }
 0xbc5   : > { %7589 = vmatpush1.bf16.msra.mxu1 %v11293_v20  ;;  %v7198_v20 = vpack.c.bf16 %v7181_v34, %v7181_v34 }
 0xbc6   : > { %7590 = vmatprep.subr.bf16.mxu1 %v11298_v22  ;;  %v7201_v22 = vpack.c.bf16 %v7193_v14, %v7193_v14 }
 0xbc9   : > { %7591 = vmatpush1.bf16.msra.mxu1 %v11296_v24  ;;  %v11344_v24 = vld [vmem:[#allocation18 + $0xf20] ss:$8 sps:$4 sm:$0xff]  }
 0xbca   : > { %7592 = vmatprep.subr.bf16.mxu1 %v11301_v54  ;;  %v11349_v54 = vld [vmem:[#allocation18 + $0xf34] ss:$8 sps:$4 sm:$0xff]  }
 0xbcd   : > { %7593 = vmatpush1.bf16.msra.mxu1 %v11299_v56  ;;  %v11350_v56 = vld [vmem:[#allocation18 + $0xf40] ss:$8 sps:$4 sm:$0xff]  }
 0xbce   : > { %7594 = vmatprep.subr.bf16.mxu1 %v11304_v17  ;;  %v11355_v17 = vld [vmem:[#allocation18 + $0xf54] ss:$8 sps:$4 sm:$0xff]  }
 0xbd1   : > { %7595 = vmatpush1.bf16.msra.mxu1 %v11302_v29  ;;  %v11356_v29 = vld [vmem:[#allocation18 + $0xf60] ss:$8 sps:$4 sm:$0xff]  }
 0xbd2   : > { %7596 = vmatprep.subr.bf16.mxu1 %v11307_v31  ;;  %v11361_v31 = vld [vmem:[#allocation18 + $0xf74] ss:$8 sps:$4 sm:$0xff]  }
 0xbd5   : > { %7597 = vmatpush1.bf16.msra.mxu1 %v11305_v35  ;;  %v11362_v35 = vld [vmem:[#allocation18 + $0xf80] ss:$8 sps:$4 sm:$0xff]  }
 0xbd6   : > { %7598 = vmatprep.subr.bf16.mxu1 %v11310_v36  ;;  %v11367_v36 = vld [vmem:[#allocation18 + $0xf94] ss:$8 sps:$4 sm:$0xff]  }
 0xbd9   : > { %7599 = vmatpush1.bf16.msra.mxu1 %v11308_v39  ;;  %v11368_v39 = vld [vmem:[#allocation18 + $0xfa0] ss:$8 sps:$4 sm:$0xff]  }
 0xbda   : > { %7600 = vmatprep.subr.bf16.mxu1 %v11313_v40  ;;  %v11373_v40 = vld [vmem:[#allocation18 + $0xfb4] ss:$8 sps:$4 sm:$0xff]  }
 0xbdd   : > { %7601 = vmatpush1.bf16.msra.mxu1 %v11311_v45  ;;  %v11374_v45 = vld [vmem:[#allocation18 + $0xfc0] ss:$8 sps:$4 sm:$0xff]  }
 0xbde   : > { %7602 = vmatprep.subr.bf16.mxu1 %v11316_v46  ;;  %v11379_v46 = vld [vmem:[#allocation18 + $0xfd4] ss:$8 sps:$4 sm:$0xff]  }
 0xbe1   : > { %7603 = vmatpush1.bf16.msra.mxu1 %v11314_v48  ;;  %v11380_v48 = vld [vmem:[#allocation18 + $0xfe0] ss:$8 sps:$4 sm:$0xff]  }
 0xbe2   : > { %7604 = vmatprep.subr.bf16.mxu1 %v11319_v49  ;;  %v11385_v49 = vld [vmem:[#allocation18 + $0xff4] ss:$8 sps:$4 sm:$0xff]  }
 0xbe5   : > { %7605 = vmatpush1.bf16.msra.mxu1 %v11317_v42  ;;  %v7200_v42 = vpack.c.bf16 %v7189_v52, %v7189_v52  ;;  %v11482_v52 = vld [vmem:[%s13363_s30 + $0x40] sm:$0xff]   ;;  %s13366_s30 = sld [smem:[#allocation56_spill]] }
 0xbe6   : > { %7606 = vmatprep.subr.bf16.mxu1 %v11322_v53  ;;  %v11425_v53 = vld [vmem:[#allocation23 + $0x1a0] ss:$16 sps:$4 sm:$0xff]  }
 0xbe7   : > { %8135 = vmatpush1.bf16.msra.mxu0 %v11425_v53  ;;  %v11484_v53 = vld [vmem:[%s13364_s14 + $0x48] sm:$0xff]  }
 0xbe8   : > { %8136 = vmatprep.subr.bf16.mxu0 %v11430_v41  ;;  %v11486_v41 = vld [vmem:[%s13364_s14 + $0x50] sm:$0xff]  }
 0xbe9   : > { %7607 = vmatpush1.bf16.msra.mxu1 %v11320_v58  ;;  %v11428_v58 = vld [vmem:[#allocation23 + $0x1c0] ss:$16 sps:$4 sm:$0xff]  }
 0xbea   : > { %7608 = vmatprep.subr.bf16.mxu1 %v11325_v60  ;;  %v11433_v60 = vld [vmem:[#allocation23 + $0x1e4] ss:$16 sps:$4 sm:$0xff]  }
 0xbeb   : > { %8137 = vmatpush1.bf16.msra.mxu0 %v11428_v58  ;;  %v11487_v58 = vld [vmem:[%s13364_s14 + $0x10] sm:$0xff]   ;;  %p13368_p7 = scmp.ne.s32.totalorder %s13366_s30, 0 }
 0xbec   : > { %8138 = vmatprep.subr.bf16.mxu0 %v11433_v60  ;;  %v11488_v60 = vld [vmem:[%s13364_s14 + $0x58] sm:$0xff]  }
 0xbed   : > { %7609 = vmatpush1.bf16.msra.mxu1 %v11323_v62  ;;  %v7670_v62 = vld [vmem:[#allocation20] sm:$0x3]  ;;  %p12108_p8 = pnand %p12107_p4, %p13368_p7 }
 0xbee   : > { %7610 = vmatprep.subr.bf16.mxu1 %v11328_v63  ;;  %v7684_v63 = vld [vmem:[#allocation21] sm:$0x3]  ;;  %v7675_v2 = vrot.slane %v7670_v62, %v12918_v57  ;;  %v7679_v0 = vrot.slane %v7670_v62, %v12921_v59  ;;  %v11491_v62 = vld [vmem:[%s13364_s14 + $0x20] sm:$0xff]  }
 0xbef   : > { %8139 = vmatpush1.bf16.msra.mxu0 %v11431_v61  ;;  %v11489_v61 = vld [vmem:[%s13364_s14 + $0x18] sm:$0xff]   ;;  %p12109_p11 = pneg %p12108_p8 }
 0xbf0   : > { %8149 = vmatprep.subr.bf16.mxu0 %v11436_v30  ;;  %v11490_v30 = vld [vmem:[%s13364_s14 + $0x60] sm:$0xff]  }
 0xbf1   : > { %7611 = vmatpush1.bf16.msra.mxu1 %v11326_v8  ;;  %p12116_p6 = pnand %p12115_p0, %p12109_p11 }
 0xbf2   : > { %7612 = vmatprep.subr.bf16.mxu1 %v11331_v1  ;;  %v7689_v1 = vrot.slane %v7684_v63, %v12918_v57 }
 0xbf5   : > { %7613 = vmatpush1.bf16.msra.mxu1 %v11329_v5 }
 0xbf6   : > { %7614 = vmatprep.subr.bf16.mxu1 %v11334_v7  ;;  %v7693_v7 = vrot.slane %v7684_v63, %v12921_v59  ;;  %v11492_v63 = vld [vmem:[%s13364_s14 + $0x68] sm:$0xff]  }
 0xbf9   : > { %7615 = vmatpush1.bf16.msra.mxu1 %v11332_v9 }
 0xbfa   : > { %7616 = vmatprep.subr.bf16.mxu1 %v11337_v10 }
 0xbfd   : > { %7617 = vmatpush1.bf16.msra.mxu1 %v11335_v25 }
 0xbfe   : > { %7627 = vmatprep.subr.bf16.mxu1 %v11340_v13 }
 0xc00   : > { %7619 = vmatmul.mubr.bf16.vlgmr.msra.gmra.mrb[16].mxu1 %v7198_v20 }
 0xc01   : > { %7628 = vmatpush1.bf16.msra.mxu1 %v11338_v19  ;;  %7659 = vmatprep.mubr.bf16.mxu1 %v7201_v22  ;;  %v11434_v22 = vld [vmem:[#allocation23 + $0x8] ss:$16 sps:$4 sm:$0xff]  }
 0xc02   : > { %7629 = vmatprep.subr.bf16.mxu1 %v11343_v21 }
 0xc05   : > { %7630 = vmatpush1.bf16.msra.mxu1 %v11341_v51 }
 0xc06   : > { %7631 = vmatprep.subr.bf16.mxu1 %v11346_v23  ;;  %v11442_v23 = vld [vmem:[#allocation23 + $0x4c] ss:$16 sps:$4 sm:$0xff]  }
 0xc09   : > { %7632 = vmatpush1.bf16.msra.mxu1 %v11344_v24  ;;  %v11440_v24 = vld [vmem:[#allocation23 + $0x48] ss:$16 sps:$4 sm:$0xff]  }
 0xc0a   : > { %7633 = vmatprep.subr.bf16.mxu1 %v11349_v54  ;;  %v11445_v54 = vld [vmem:[#allocation23 + $0x6c] ss:$16 sps:$4 sm:$0xff]  }
 0xc0d   : > { %7634 = vmatpush1.bf16.msra.mxu1 %v11347_v26  ;;  %v11443_v26 = vld [vmem:[#allocation23 + $0x68] ss:$16 sps:$4 sm:$0xff]  }
 0xc0e   : > { %7635 = vmatprep.subr.bf16.mxu1 %v11352_v27  ;;  %v11448_v27 = vld [vmem:[#allocation23 + $0x8c] ss:$16 sps:$4 sm:$0xff]  }
 0xc11   : > { %7636 = vmatpush1.bf16.msra.mxu1 %v11350_v56  ;;  %v11446_v56 = vld [vmem:[#allocation23 + $0x88] ss:$16 sps:$4 sm:$0xff]  }
 0xc12   : > { %7637 = vmatprep.subr.bf16.mxu1 %v11355_v17  ;;  %v11451_v17 = vld [vmem:[#allocation23 + $0xac] ss:$16 sps:$4 sm:$0xff]  }
 0xc15   : > { %7638 = vmatpush1.bf16.msra.mxu1 %v11353_v6  ;;  %v11449_v6 = vld [vmem:[#allocation23 + $0xa8] ss:$16 sps:$4 sm:$0xff]  }
 0xc16   : > { %7639 = vmatprep.subr.bf16.mxu1 %v11358_v4  ;;  %v11454_v4 = vld [vmem:[#allocation23 + $0xcc] ss:$16 sps:$4 sm:$0xff]  }
 0xc19   : > { %7640 = vmatpush1.bf16.msra.mxu1 %v11356_v29  ;;  %v11452_v29 = vld [vmem:[#allocation23 + $0xc8] ss:$16 sps:$4 sm:$0xff]  }
 0xc1a   : > { %7641 = vmatprep.subr.bf16.mxu1 %v11361_v31  ;;  %v11457_v31 = vld [vmem:[#allocation23 + $0xec] ss:$16 sps:$4 sm:$0xff]  }
 0xc1d   : > { %7642 = vmatpush1.bf16.msra.mxu1 %v11359_v28  ;;  %v11455_v28 = vld [vmem:[#allocation23 + $0xe8] ss:$16 sps:$4 sm:$0xff]  }
 0xc1e   : > { %7643 = vmatprep.subr.bf16.mxu1 %v11364_v32  ;;  %v11460_v32 = vld [vmem:[#allocation23 + $0x10c] ss:$16 sps:$4 sm:$0xff]  }
 0xc21   : > { %7644 = vmatpush1.bf16.msra.mxu1 %v11362_v35  ;;  %v11458_v35 = vld [vmem:[#allocation23 + $0x108] ss:$16 sps:$4 sm:$0xff]  }
 0xc22   : > { %7645 = vmatprep.subr.bf16.mxu1 %v11367_v36  ;;  %v11463_v36 = vld [vmem:[#allocation23 + $0x12c] ss:$16 sps:$4 sm:$0xff]  }
 0xc25   : > { %7646 = vmatpush1.bf16.msra.mxu1 %v11365_v37  ;;  %v11461_v37 = vld [vmem:[#allocation23 + $0x128] ss:$16 sps:$4 sm:$0xff]  }
 0xc26   : > { %7647 = vmatprep.subr.bf16.mxu1 %v11370_v38  ;;  %v11466_v38 = vld [vmem:[#allocation23 + $0x14c] ss:$16 sps:$4 sm:$0xff]  }
 0xc29   : > { %7648 = vmatpush1.bf16.msra.mxu1 %v11368_v39  ;;  %v11464_v39 = vld [vmem:[#allocation23 + $0x148] ss:$16 sps:$4 sm:$0xff]  }
 0xc2a   : > { %7649 = vmatprep.subr.bf16.mxu1 %v11373_v40  ;;  %v11469_v40 = vld [vmem:[#allocation23 + $0x16c] ss:$16 sps:$4 sm:$0xff]  }
 0xc2d   : > { %7650 = vmatpush1.bf16.msra.mxu1 %v11371_v43  ;;  %v11467_v43 = vld [vmem:[#allocation23 + $0x168] ss:$16 sps:$4 sm:$0xff]  }
 0xc2e   : > { %7651 = vmatprep.subr.bf16.mxu1 %v11376_v44  ;;  %v11472_v44 = vld [vmem:[#allocation23 + $0x18c] ss:$16 sps:$4 sm:$0xff]  }
 0xc31   : > { %7652 = vmatpush1.bf16.msra.mxu1 %v11374_v45  ;;  %v11470_v45 = vld [vmem:[#allocation23 + $0x188] ss:$16 sps:$4 sm:$0xff]  }
 0xc32   : > { %7653 = vmatprep.subr.bf16.mxu1 %v11379_v46  ;;  %v11475_v46 = vld [vmem:[#allocation23 + $0x1ac] ss:$16 sps:$4 sm:$0xff]  }
 0xc35   : > { %7654 = vmatpush1.bf16.msra.mxu1 %v11377_v47  ;;  %v11473_v47 = vld [vmem:[#allocation23 + $0x1a8] ss:$16 sps:$4 sm:$0xff]  }
 0xc36   : > { %7655 = vmatprep.subr.bf16.mxu1 %v11382_v18  ;;  %v11478_v18 = vld [vmem:[#allocation23 + $0x1cc] ss:$16 sps:$4 sm:$0xff]  }
 0xc39   : > { %7656 = vmatpush1.bf16.msra.mxu1 %v11380_v48  ;;  %v11476_v48 = vld [vmem:[#allocation23 + $0x1c8] ss:$16 sps:$4 sm:$0xff]  }
 0xc3a   : > { %7657 = vmatprep.subr.bf16.mxu1 %v11385_v49  ;;  %v11481_v49 = vld [vmem:[#allocation23 + $0x1ec] ss:$16 sps:$4 sm:$0xff]  }
 0xc3d   : > { %7658 = vmatpush1.bf16.msra.mxu1 %v11383_v50  ;;  %v11479_v50 = vld [vmem:[#allocation23 + $0x1e8] ss:$16 sps:$4 sm:$0xff]  }
 0xc40   : > { %7660 = vmatmul.mubr.bf16.vlgmr.msra.gmra.mrb[16].mxu1 %v7200_v42  ;;  %v11483_v42 = vld [vmem:[%s13364_s14] sm:$0xff]  }
 0xd13   : > { %v7661_v33 = vpop.f32.mrb[16].mxu1 }
 0xd14   : > { %v9884_v8 = vadd.f32 %v7661_v33, %v13044_v11  ;;  %v7663_v3 = vpop.f32.mrb[17].mxu1  ;;  %v11439_v11 = vld [vmem:[#allocation23 + $0x2c] ss:$16 sps:$4 sm:$0xff]  }
 0xd15   : > { %v9885_v5 = vadd.f32 %v7663_v3, %v13046_v12  ;;  %v7665_v9 = vpop.f32.mrb[18].mxu1  ;;  %v11437_v12 = vld [vmem:[#allocation23 + $0x28] ss:$16 sps:$4 sm:$0xff]   ;;  %v11494_v33 = vld [vmem:[%s13364_s14 + $0x70] sm:$0xff]   ;;  %v11498_v3 = vld [vmem:[%s13364_s14 + $0xc0] sm:$0xff]  }
 0xd16   : > { %v7682_v10 = vmul.f32 %v9884_v8, %v7675_v2  ;;  %v7666_v25 = vpop.f32.mrb[19].mxu1  ;;  %v11493_v2 = vld [vmem:[%s13364_s14 + $0x28] sm:$0xff]   ;;  %v11496_v8 = vld [vmem:[%s13364_s14 + $0x78] sm:$0xff]  }
 0xd17   : > { %v7683_v34 = vmul.f32 %v9885_v5, %v7679_v0  ;;  %v11495_v0 = vld [vmem:[%s13364_s14 + $0x30] sm:$0xff]  }
 0xd18   : > { %v7696_v13 = vadd.f32 %v7689_v1, %v7682_v10  ;;  %v11497_v1 = vld [vmem:[%s13364_s14 + $0x38] sm:$0xff]   ;;  %v7766_v5 = vld [vmem:[#allocation24] sm:$0xf] }
 0xd19   : > { %v7697_v14 = vadd.f32 %v7693_v7, %v7683_v34  ;;  %v8091_v7 = vrot.slane %v7766_v5, %v12918_v57  ;;  %v8095_v9 = vrot.slane %v7766_v5, %v12921_v59  ;;  %v11500_v57 = vld [vmem:[%s13364_s14 + $0xc8] sm:$0xff]  }
 0xd1a   : > { %v7698_v19 = vmax.f32 %v7696_v13, 0.0  ;;  %v11501_v59 = vld [vmem:[%s13364_s14 + $0x88] sm:$0xff]  }
 0xd1b   : > { %v7699_v20 = vmax.f32 %v7697_v14, 0.0 }
 0xd1c   : > { %v13086_v51 = vpack.c.bf16 %v7698_v19, %v7698_v19 }
 0xd1d   : > { %v7701_v21 = vpack.c.bf16 %v7699_v20, %v7699_v20 }
 0xd1f   : > { %8140 = vmatprep.mubr.bf16.mxu0 %v7701_v21 }
 0xd20   : > { %8141 = vmatmul.mubr.bf16.vlgmr.msra.gmra.mrb[20].mxu0 %v13086_v51 }
 0xd21   : > { %8150 = vmatpush1.bf16.msra.mxu0 %v11434_v22  ;;  %8181 = vmatprep.mubr.bf16.mxu0 %v7701_v21 }
 0xd22   : > { %8151 = vmatprep.subr.bf16.mxu0 %v11439_v11 }
 0xd25   : > { %8152 = vmatpush1.bf16.msra.mxu0 %v11437_v12  ;;  %v11502_v12 = vld [vmem:[%s13364_s14 + $0xd0] sm:$0xff]  }
 0xd26   : > { %8153 = vmatprep.subr.bf16.mxu0 %v11442_v23  ;;  %v11503_v23 = vld [vmem:[%s13364_s14 + $0x90] sm:$0xff]  }
 0xd29   : > { %8154 = vmatpush1.bf16.msra.mxu0 %v11440_v24  ;;  %v11504_v24 = vld [vmem:[%s13364_s14 + $0xd8] sm:$0xff]  }
 0xd2a   : > { %8155 = vmatprep.subr.bf16.mxu0 %v11445_v54  ;;  %v11505_v54 = vld [vmem:[%s13364_s14 + $0x98] sm:$0xff]  }
 0xd2d   : > { %8156 = vmatpush1.bf16.msra.mxu0 %v11443_v26  ;;  %v11506_v26 = vld [vmem:[%s13364_s14 + $0xe0] sm:$0xff]  }
 0xd2e   : > { %8157 = vmatprep.subr.bf16.mxu0 %v11448_v27  ;;  %v11507_v27 = vld [vmem:[%s13364_s14 + $0xa0] sm:$0xff]  }
 0xd31   : > { %8158 = vmatpush1.bf16.msra.mxu0 %v11446_v56  ;;  %v11508_v56 = vld [vmem:[%s13364_s14 + $0xe8] sm:$0xff]  }
 0xd32   : > { %8159 = vmatprep.subr.bf16.mxu0 %v11451_v17  ;;  %v11509_v17 = vld [vmem:[%s13364_s14 + $0xa8] sm:$0xff]  }
 0xd35   : > { %8160 = vmatpush1.bf16.msra.mxu0 %v11449_v6  ;;  %v11510_v6 = vld [vmem:[%s13364_s14 + $0xf0] sm:$0xff]  }
 0xd36   : > { %8161 = vmatprep.subr.bf16.mxu0 %v11454_v4  ;;  %v11511_v4 = vld [vmem:[%s13364_s14 + $0xb0] sm:$0xff]  }
 0xd39   : > { %8162 = vmatpush1.bf16.msra.mxu0 %v11452_v29  ;;  %v11512_v29 = vld [vmem:[%s13364_s14 + $0xf8] sm:$0xff]  }
 0xd3a   : > { %8163 = vmatprep.subr.bf16.mxu0 %v11457_v31  ;;  %v11513_v31 = vld [vmem:[%s13364_s14 + $0xb8] sm:$0xff]  }
 0xd3d   : > { %8164 = vmatpush1.bf16.msra.mxu0 %v11455_v28  ;;  %v8099_v28 = vrot.slane %v7766_v5, %v12983_v15 }
 0xd3e   : > { %8165 = vmatprep.subr.bf16.mxu0 %v11460_v32  ;;  %v8103_v32 = vrot.slane %v7766_v5, %v12986_v16  ;;  %v8262_v16 = vld [vmem:[#allocation26] sm:$0x1] }
 0xd41   : > { %8166 = vmatpush1.bf16.msra.mxu0 %v11458_v35 }
 0xd42   : > { %8167 = vmatprep.subr.bf16.mxu0 %v11463_v36 }
 0xd45   : > { %8168 = vmatpush1.bf16.msra.mxu0 %v11461_v37 }
 0xd46   : > { %8169 = vmatprep.subr.bf16.mxu0 %v11466_v38 }
 0xd49   : > { %8170 = vmatpush1.bf16.msra.mxu0 %v11464_v39 }
 0xd4a   : > { %8171 = vmatprep.subr.bf16.mxu0 %v11469_v40 }
 0xd4d   : > { %8172 = vmatpush1.bf16.msra.mxu0 %v11467_v43 }
 0xd4e   : > { %8173 = vmatprep.subr.bf16.mxu0 %v11472_v44 }
 0xd51   : > { %8174 = vmatpush1.bf16.msra.mxu0 %v11470_v45 }
 0xd52   : > { %8175 = vmatprep.subr.bf16.mxu0 %v11475_v46 }
 0xd55   : > { %8176 = vmatpush1.bf16.msra.mxu0 %v11473_v47 }
 0xd56   : > { %8177 = vmatprep.subr.bf16.mxu0 %v11478_v18 }
 0xd59   : > { %8178 = vmatpush1.bf16.msra.mxu0 %v11476_v48 }
 0xd5a   : > { %8179 = vmatprep.subr.bf16.mxu0 %v11481_v49 }
 0xd5d   : > { %8180 = vmatpush1.bf16.msra.mxu0 %v11479_v50 }
 0xd5e   : > { %9810 = vmatprep.subr.bf16.mxu0 %v11482_v52 }
 0xd60   : > { %8182 = vmatmul.mubr.bf16.vlgmr.msra.gmra.mrb[24].mxu0 %v13086_v51  ;;  %v11499_v51 = vld [vmem:[%s13364_s14 + $0x80] sm:$0xff]  }
 0xd61   : > { %9811 = vmatpush3.bf16.msra.mxu0 %v11483_v42 }
 0xd62   : > { %9812 = vmatprep.subr.bf16.mxu0 %v11484_v53 }
 0xd65   : > { %9813 = vmatpush3.bf16.msra.mxu0 %v11485_v55 }
 0xd66   : > { %9814 = vmatprep.subr.bf16.mxu0 %v11486_v41 }
 0xd69   : > { %9815 = vmatpush3.bf16.msra.mxu0 %v11487_v58 }
 0xd6a   : > { %9816 = vmatprep.subr.bf16.mxu0 %v11488_v60 }
 0xd6d   : > { %9817 = vmatpush3.bf16.msra.mxu0 %v11489_v61 }
 0xd6e   : > { %9818 = vmatprep.subr.bf16.mxu0 %v11490_v30 }
 0xd71   : > { %9819 = vmatpush3.bf16.msra.mxu0 %v11491_v62 }
 0xd72   : > { %9820 = vmatprep.subr.bf16.mxu0 %v11492_v63 }
 0xd75   : > { %9821 = vmatpush3.bf16.msra.mxu0 %v11493_v2 }
 0xd76   : > { %9822 = vmatprep.subr.bf16.mxu0 %v11494_v33 }
 0xd79   : > { %9823 = vmatpush3.bf16.msra.mxu0 %v11495_v0 }
 0xd7a   : > { %9824 = vmatprep.subr.bf16.mxu0 %v11496_v8 }
 0xd7d   : > { %9825 = vmatpush3.bf16.msra.mxu0 %v11497_v1 }
 0xd7e   : > { %9832 = vmatprep.subr.bf16.mxu0 %v11498_v3 }
 0xdf3   : > { %v8142_v10 = vpop.f32.mrb[20].mxu0 }
 0xdf4   : > { %v8143_v25 = vadd.f32 %v8142_v10, %v8091_v7  ;;  %v8144_v34 = vpop.f32.mrb[21].mxu0 }
 0xdf5   : > { %v8145_v13 = vadd.f32 %v8144_v34, %v8095_v9  ;;  %v8146_v14 = vpop.f32.mrb[22].mxu0 }
 0xdf6   : > { %v8190_v19 = vmax.f32 %v8143_v25, 0.0  ;;  %v8147_v20 = vpop.f32.mrb[23].mxu0 }
 0xdf7   : > { %v8191_v21 = vmax.f32 %v8145_v13, 0.0 }
 0xdf8   : > { %v8194_v11 = vpack.c.bf16 %v8190_v19, %v8190_v19 }
 0xdf9   : > { %v8195_v22 = vpack.c.bf16 %v8191_v21, %v8191_v21 }
 0xdfb   : > { %8487 = vmatprep.mubr.bf16.mxu0 %v8195_v22 }
 0xdfc   : > { %8488 = vmatmul.mubr.bf16.vlgmr.msra.gmra.mrb[28].mxu0 %v8194_v11 }
 0xdfd   : > { %9833 = vmatpush3.bf16.msra.mxu0 %v11499_v51 }
 0xdfe   : > { %9834 = vmatprep.subr.bf16.mxu0 %v11500_v57 }
 0xe01   : > { %9835 = vmatpush3.bf16.msra.mxu0 %v11501_v59 }
 0xe02   : > { %9836 = vmatprep.subr.bf16.mxu0 %v11502_v12 }
 0xe05   : > { %9837 = vmatpush3.bf16.msra.mxu0 %v11503_v23 }
 0xe06   : > { %9838 = vmatprep.subr.bf16.mxu0 %v11504_v24 }
 0xe09   : > { %9839 = vmatpush3.bf16.msra.mxu0 %v11505_v54 }
 0xe0a   : > { %9840 = vmatprep.subr.bf16.mxu0 %v11506_v26 }
 0xe0d   : > { %9841 = vmatpush3.bf16.msra.mxu0 %v11507_v27 }
 0xe0e   : > { %9842 = vmatprep.subr.bf16.mxu0 %v11508_v56 }
 0xe11   : > { %9843 = vmatpush3.bf16.msra.mxu0 %v11509_v17 }
 0xe12   : > { %9844 = vmatprep.subr.bf16.mxu0 %v11510_v6 }
 0xe15   : > { %9845 = vmatpush3.bf16.msra.mxu0 %v11511_v4 }
 0xe16   : > { %9846 = vmatprep.subr.bf16.mxu0 %v11512_v29 }
 0xe19   : > { %9847 = vmatpush3.bf16.msra.mxu0 %v11513_v31 }
 0xe33   : > { %v8183_v35 = vpop.f32.mrb[24].mxu0 }
 0xe34   : > { %v8184_v36 = vadd.f32 %v8183_v35, %v8099_v28  ;;  %v8185_v37 = vpop.f32.mrb[25].mxu0 }
 0xe35   : > { %v8186_v38 = vadd.f32 %v8185_v37, %v8103_v32  ;;  %v8187_v39 = vpop.f32.mrb[26].mxu0 }
 0xe36   : > { %v8192_v40 = vmax.f32 %v8184_v36, 0.0  ;;  %v8188_v43 = vpop.f32.mrb[27].mxu0 }
 0xe37   : > { %v8193_v44 = vmax.f32 %v8186_v38, 0.0 }
 0xe38   : > { %v8196_v46 = vpack.c.bf16 %v8192_v40, %v8192_v40 }
 0xe39   : > { %v8197_v45 = vpack.c.bf16 %v8193_v44, %v8193_v44 }
 0xe3b   : > { %8527 = vmatprep.mubr.bf16.mxu0 %v8197_v45 }
 0xe3c   : > { %8528 = vmatmul.mubr.bf16.vlgmr.msra.gmra.mrb[32].mxu0 %v8196_v46 }
 0xecf   : > { %v9826_v47 = vpop.f32.mrb[28].mxu0 }
 0xed0   : > { %v9827_v18 = vpop.f32.mrb[29].mxu0 }
 0xed1   : > { %v9828_v48 = vadd.f32 %v9827_v18, %v9826_v47  ;;  %v9829_v49 = vpop.f32.mrb[30].mxu0 }
 0xed2   : > { %v9830_v15 = vpop.f32.mrb[31].mxu0 }
 0xed3   : > { %v8490_v42 = vadd.f32 %v9828_v48, %v8262_v16 }
 0xf0f   : > { %v9848_v50 = vpop.f32.mrb[32].mxu0 }
 0xf10   : > { %v9849_v52 = vpop.f32.mrb[33].mxu0 }
 0xf11   : > { %v9850_v53 = vadd.f32 %v9849_v52, %v9848_v50  ;;  %v9851_v55 = vpop.f32.mrb[34].mxu0 }
 0xf12   : > { %v9852_v41 = vpop.f32.mrb[35].mxu0 }
 0xf13   : > { %v8530_v58 = vadd.f32 %v9850_v53, %v8490_v42 }
 0xf15   : > { %v8535_v60 = vsub.f32 0.0, %v8530_v58 }
 0xf17   : > { %v8536_v61 = vmul.f32 1.442695, %v8535_v60 }
 0xf19   : > { %11514 = vpow2.f32 %v8536_v61 }
 0xf23   : > { %v11515_v30 = vpop.eup %11514 }
 0xf24   : > { %v8538_v62 = vadd.f32 1.0, %v11515_v30 }
 0xf26   : > { %11516 = vrcp.f32 %v8538_v62 }
 0xf30   : > { %v11517_v63 = vpop.eup %11516 }
 0xf31   : > { %8541 = vst.msk [vmem:[%s979_s3] sm:$0x1] %vm8540_vm2, %v11517_v63 }
 0xf32   : > { %12119 = shalt.err (!%p12116_p6)
}
 0xf33   : > { %s12120_s8 = scalar_lea.hbm %s13195_s6, 16  ;;  %s12124_s25 = scalar_lea.hbm %s13367_s17, 32 }
 0xf34   : > { %p12121_p5 = scmp.ne.s32.totalorder %s13195_s6, %s12120_s8  ;;  %p12125_p10 = scmp.lt.u32.totalorder %s13195_s6, %s13367_s17 }
 0xf35   : > { %p12126_p2 = scmp.lt.u32.totalorder %s12124_s25, %s12120_s8  ;;  %p12128_p4 = scmp.lt.u32.totalorder %s12120_s8, %s13195_s6 }
 0xf36   : > { %p12122_p9 = pnand %p12121_p5, %p13368_p7 }
 0xf37   : > { %p12127_p3 = por %p12126_p2, %p12125_p10 }
 0xf38   : > { %p12123_p12 = pneg %p12122_p9 }
 0xf39   : > { %p12129_p8 = por %p12128_p4, %p12127_p3 }
 0xf3b   : > { %p12130_p11 = pnand %p12129_p8, %p12123_p12 }
 0xf3d   : > { %12133 = shalt.err (!%p12130_p11)
}
 0xf3e   : > { %10046 = dma.vmem_to_hbm [thread:$0]  (%p13368_p7), %s13197_s15, 16, %s13195_s6, %s8543_s1  }
 0xf3f PF: > { %s13369_s12 = sld [smem:[#allocation52_spill]]  ;;  %s13370_s7 = sld [smem:[#allocation49_spill]] }
 0xf40   : > { %s13371_s24 = sld [smem:[#allocation57_spill]] }
 0xf45   : > { %p10158_p13 = scmp.ge.s32.totalorder %s13369_s12, 2  ;;  %s8567_s29 = sand.u32 1, %s13370_s7  }
 0xf46   : > { %p13372_p1 = scmp.ne.s32.totalorder %s13371_s24, 0  ;;  %s8568_s28 = scalar_lea.sflag [#allocation5], %s8567_s29 }
 0xf48   : > { %p10113_p0 = pnand %p10158_p13, %p13372_p1 }
 0xf4a   : > { %12195 = dma.done.wait (!%p10113_p0), %s8568_s28, 16  }
 0xf4b   : > { %12197 = vsyncadd (!%p10113_p0), %s8568_s28, 4294967280  ;;  %s13373_s25 = sld [smem:[#allocation54_spill]]  ;;  %s13374_s4 = sld [smem:[#allocation50_spill]] }
 0xf4c   : > { %s13375_s30 = sld [smem:[#allocation51_spill]]  ;;  %s13376_s24 = sld [smem:[#allocation55_spill]] }
 0xf51   : > { %p44_p6 = scmp.ge.s32.totalorder %s13373_s25, 4  }
 0xf53   :  { %46 = sbr.rel (!%p44_p6) target bundleno = 31 (0x1f), region = 239 }
 0xf5a   :  { %8572 = vsyncpa [#allocation4], 1 }
 0xf5b   :  { %8574 = vsyncpa [#allocation4 + $0x1], 1 }
 0xf5c   :  { %8575 = vsyncpa [#allocation7], 1 }
 0xf5d   :  { %8576 = vsyncpa [#allocation10], 1 }
 0xf5e   :  { %8577 = vsyncpa [#allocation13], 1 }
 0xf5f   :  { %8578 = vsyncpa [#allocation16], 1 }
 0xf60   :  { %8579 = vsyncpa [#allocation19], 1 }
 0xf61   :  { %8580 = vsyncpa [#allocation22], 1 }
 0xf62   :  { %8581 = vsyncpa [#allocation25], 1 }
 0xf63   :  { %8582 = vsyncpa [#allocation28], 1 }
 0xf64   :  { %8583 = vsyncpa [#allocation31], 1 }
 0xf65   :  { %8584 = vsyncpa [#allocation34], 1 }
 0xf66   :  { %8585 = vsyncpa [#allocation5], 1 }
 0xf67   :  { %8587 = vsyncpa [#allocation5 + $0x1], 1 }

</bundles_post_ra>
